<compile_context>
chip_gen: v5e
topology: v5e:2x2
jax: 0.10.0
libtpu: 0.0.40
codegen_flags: <defaults>
</compile_context>

<pallas_src>
import math
import jax
import jax.numpy as jnp
from jax import lax
from jax.experimental import pallas as pl
from jax.experimental.pallas import tpu as pltpu  # noqa: F401  (TPU backend)

# ----- small deterministic config (LIMU-BERT-like) -----
B   = 2      # batch
S   = 16     # seq_len
DIN = 6      # input feature dim (e.g. 3-axis acc + 3-axis gyro)
H   = 64     # hidden / embed_dim
FF  = 128    # feed-forward hidden
NH  = 4      # attention heads
NL  = 2      # n_layers (parameters shared across layers, as in LIMU-BERT)
EPS = 1e-12  # LayerNorm variance epsilon
DH  = H // NH

# rows of the packed (13, 128) bias / LayerNorm-vector slab
(_BE, _GE, _BEE, _BQ, _BK, _BV, _BP,
 _G1, _B1, _BF2, _G2, _B2, _BF1) = range(13)


def _gelu(x):
    # TODO(synk): PyTorch ref uses exact erf-GELU; Mosaic erf lowering is not
    # guaranteed, so use the tanh approximation (max abs diff ~1e-3).
    return 0.5 * x * (1.0 + jnp.tanh(0.7978845608028654 * (x + 0.044715 * x * x * x)))


def libert_kernel(x_ref, vec_ref, we_ref, pos_ref, wqkvp_ref, wf1_ref, wf2_ref,
                  o_ref):
    BS = B * S
    scale = 1.0 / math.sqrt(DH)

    # ---- unpack the single bias/LN slab (one load, static slices) ----
    vecs = vec_ref[...]                                   # (13, 128)
    row = lambda r, n: vecs[r:r + 1, 0:n]                 # (1, n)
    be, ge, bee = row(_BE, H), row(_GE, H), row(_BEE, H)
    bq, bk, bv, bp = row(_BQ, H), row(_BK, H), row(_BV, H), row(_BP, H)
    g1, b1 = row(_G1, H), row(_B1, H)
    bf2, g2, b2 = row(_BF2, H), row(_G2, H), row(_B2, H)
    bf1 = row(_BF1, FF)

    def ln(x, g, b):
        mu = jnp.mean(x, axis=-1, keepdims=True)
        var = jnp.mean((x - mu) ** 2, axis=-1, keepdims=True)
        return g * (x - mu) * lax.rsqrt(var + EPS) + b    # rsqrt -> EUP

    # ---- Embeddings: linear proj -> LN -> + positional embedding -> LN ----
    x2 = x_ref[...].reshape(BS, DIN)                      # fold batch into M
    e = jnp.dot(x2, we_ref[...], preferred_element_type=jnp.float32) + be
    e = ln(e, ge, bee)                                    # emb_norm = True
    posb = jnp.concatenate([pos_ref[...]] * B, axis=0)    # (B*S, H)
    h = ln(e + posb, ge, bee)

    # hoist weight loads (shared across layers)
    wq, wk, wv, wp = wqkvp_ref[0], wqkvp_ref[1], wqkvp_ref[2], wqkvp_ref[3]
    wf1, wf2 = wf1_ref[...], wf2_ref[...]

    # ---- layer loop, fully unrolled (NL=2, shared parameters) ----
    for _ in range(NL):
        # Multi-headed self-attention; QKV computed for the whole batch at once
        q = jnp.dot(h, wq, preferred_element_type=jnp.float32) + bq
        k = jnp.dot(h, wk, preferred_element_type=jnp.float32) + bk
        v = jnp.dot(h, wv, preferred_element_type=jnp.float32) + bv
        q3 = q.reshape(B, S, H)
        k3 = k.reshape(B, S, H)
        v3 = v.reshape(B, S, H)

        heads = []
        for i in range(NH):                               # static unroll over heads
            qh = q3[:, :, i * DH:(i + 1) * DH]            # (B, S, DH)
            kh = k3[:, :, i * DH:(i + 1) * DH]
            vh = v3[:, :, i * DH:(i + 1) * DH]
            s = jnp.einsum('bqd,bkd->bqk', qh, kh,
                           preferred_element_type=jnp.float32) * scale
            s = s - jnp.max(s, axis=-1, keepdims=True)
            p = jnp.exp(s)
            p = p * pl.reciprocal(jnp.sum(p, axis=-1, keepdims=True), approx=True)
            ctx = jnp.einsum('bqk,bkd->bqd', p, vh,
                             preferred_element_type=jnp.float32)
            heads.append(ctx.reshape(BS, DH))
        a = jnp.concatenate(heads, axis=-1)               # (B*S, H)

        # h = norm1(attn + proj(attn))
        pr = jnp.dot(a, wp, preferred_element_type=jnp.float32) + bp
        h = ln(a + pr, g1, b1)

        # h = norm2(h + FFN(h)),  FFN = fc2(gelu(fc1(h)))
        f = jnp.dot(h, wf1, preferred_element_type=jnp.float32) + bf1
        f = _gelu(f)
        f = jnp.dot(f, wf2, preferred_element_type=jnp.float32) + bf2
        h = ln(h + f, g2, b2)

    o_ref[...] = h.reshape(B, S, H)


def make_params(key):
    ks = jax.random.split(key, 12)
    sc = 0.05
    ones = lambda n: jnp.ones((1, n), jnp.float32)
    zeros = lambda n: jnp.zeros((1, n), jnp.float32)
    params = (
        sc * jax.random.normal(ks[0], (DIN, H), jnp.float32),           # we
        zeros(H),                                                        # be
        sc * jax.random.normal(ks[1], (S, H), jnp.float32),              # pos table
        ones(H), zeros(H),                                               # embed LN gamma/beta
        sc * jax.random.normal(ks[2], (H, H), jnp.float32), zeros(H),    # wq, bq
        sc * jax.random.normal(ks[3], (H, H), jnp.float32), zeros(H),    # wk, bk
        sc * jax.random.normal(ks[4], (H, H), jnp.float32), zeros(H),    # wv, bv
        sc * jax.random.normal(ks[5], (H, H), jnp.float32), zeros(H),    # proj
        ones(H), zeros(H),                                               # norm1
        sc * jax.random.normal(ks[6], (H, FF), jnp.float32), zeros(FF),  # fc1
        sc * jax.random.normal(ks[7], (FF, H), jnp.float32), zeros(H),   # fc2
        ones(H), zeros(H),                                               # norm2
    )
    return params


def _pack_row(v, width=128):
    v = v.reshape(-1)
    return jnp.pad(v, (0, width - v.shape[0]))


@jax.jit
def libert_pretrain_predict(input_seqs, params):
    """mode='pretrain_predict', output_layer=None -> returns bert(input_seqs)."""
    (we, be, pos, ge, bee, wq, bq, wk, bk, wv, bv, wp, bp,
     g1, b1, wf1, bf1, wf2, bf2, g2, b2) = params
    # pack the 13 small vectors into a single (13, 128) slab (one DMA)
    vecs = jnp.stack([_pack_row(v) for v in
                      (be, ge, bee, bq, bk, bv, bp, g1, b1, bf2, g2, b2, bf1)])
    # stack the four (H, H) attention weights (one DMA)
    wqkvp = jnp.stack([wq, wk, wv, wp])
    # single invocation, no grid: all operands are tiny and fully VMEM-resident
    return pl.pallas_call(
        libert_kernel,
        out_shape=jax.ShapeDtypeStruct((B, S, H), jnp.float32),
    )(input_seqs, vecs, we, pos, wqkvp, wf1, wf2)


def reference(x, params):
    (we, be, pos, ge, bee, wq, bq, wk, bk, wv, bv, wp, bp,
     g1, b1, wf1, bf1, wf2, bf2, g2, b2) = params

    def _layernorm(x, g, b):
        mu = jnp.mean(x, axis=-1, keepdims=True)
        var = jnp.mean((x - mu) ** 2, axis=-1, keepdims=True)
        return g * (x - mu) / jnp.sqrt(var + EPS) + b

    e = x @ we + be
    e = _layernorm(e, ge, bee)
    e = e + pos
    h = _layernorm(e, ge, bee)
    for _ in range(NL):
        q, k, v = h @ wq + bq, h @ wk + bk, h @ wv + bv
        heads = []
        for i in range(NH):
            qh = q[..., i * DH:(i + 1) * DH]
            kh = k[..., i * DH:(i + 1) * DH]
            vh = v[..., i * DH:(i + 1) * DH]
            s = jnp.einsum('bqd,bkd->bqk', qh, kh) / math.sqrt(DH)
            p = jax.nn.softmax(s, axis=-1)
            heads.append(jnp.einsum('bqk,bkd->bqd', p, vh))
        a = jnp.concatenate(heads, axis=-1)
        h = _layernorm(a + a @ wp + bp, g1, b1)
        f = _gelu(h @ wf1 + bf1) @ wf2 + bf2
        h = _layernorm(h + f, g2, b2)
    return h


if __name__ == "__main__":
    key = jax.random.PRNGKey(0)
    kx, kp = jax.random.split(key)
    input_seqs = jax.random.normal(kx, (B, S, DIN), dtype=jnp.float32)
    params = make_params(kp)

    out = libert_pretrain_predict(input_seqs, params)
    out = jax.block_until_ready(out)

    ref = reference(input_seqs, params)
    assert out.shape == (B, S, H)
    # 5e-3 tolerance: approx reciprocal (softmax) + rsqrt (LN) add ~1e-4-1e-3
    # level differences vs the exact-division reference; outputs are O(1).
    assert jnp.allclose(out, ref, rtol=5e-3, atol=5e-3), float(jnp.max(jnp.abs(out - ref)))
    print("KERNEL_OK")
</pallas_src>

<mosaic_0001>
module attributes {stable_mosaic.version = 11 : i64} {
  func.func @libert_kernel(%arg0: memref<2x16x6xf32, #tpu.memory_space<vmem>>, %arg1: memref<13x128xf32, #tpu.memory_space<vmem>>, %arg2: memref<6x64xf32, #tpu.memory_space<vmem>>, %arg3: memref<16x64xf32, #tpu.memory_space<vmem>>, %arg4: memref<4x64x64xf32, #tpu.memory_space<vmem>>, %arg5: memref<64x128xf32, #tpu.memory_space<vmem>>, %arg6: memref<128x64xf32, #tpu.memory_space<vmem>>, %arg7: memref<2x16x64xf32, #tpu.memory_space<vmem>>) attributes {dimension_semantics = [], scalar_prefetch = 0 : i64, scratch_operands = 0 : i64, tpu.core_type = #tpu.core_type<tc>} {
    %c0 = arith.constant 0 : index
    %c0_0 = arith.constant 0 : index
    %0 = vector.load %arg1[%c0, %c0_0] : memref<13x128xf32, #tpu.memory_space<vmem>>, vector<13x128xf32>
    %1 = vector.extract_strided_slice %0 {offsets = [0, 0], sizes = [1, 64], strides = [1, 1]} : vector<13x128xf32> to vector<1x64xf32>
    %2 = vector.extract_strided_slice %0 {offsets = [1, 0], sizes = [1, 64], strides = [1, 1]} : vector<13x128xf32> to vector<1x64xf32>
    %3 = vector.extract_strided_slice %0 {offsets = [2, 0], sizes = [1, 64], strides = [1, 1]} : vector<13x128xf32> to vector<1x64xf32>
    %4 = vector.extract_strided_slice %0 {offsets = [3, 0], sizes = [1, 64], strides = [1, 1]} : vector<13x128xf32> to vector<1x64xf32>
    %5 = vector.extract_strided_slice %0 {offsets = [4, 0], sizes = [1, 64], strides = [1, 1]} : vector<13x128xf32> to vector<1x64xf32>
    %6 = vector.extract_strided_slice %0 {offsets = [5, 0], sizes = [1, 64], strides = [1, 1]} : vector<13x128xf32> to vector<1x64xf32>
    %7 = vector.extract_strided_slice %0 {offsets = [6, 0], sizes = [1, 64], strides = [1, 1]} : vector<13x128xf32> to vector<1x64xf32>
    %8 = vector.extract_strided_slice %0 {offsets = [7, 0], sizes = [1, 64], strides = [1, 1]} : vector<13x128xf32> to vector<1x64xf32>
    %9 = vector.extract_strided_slice %0 {offsets = [8, 0], sizes = [1, 64], strides = [1, 1]} : vector<13x128xf32> to vector<1x64xf32>
    %10 = vector.extract_strided_slice %0 {offsets = [9, 0], sizes = [1, 64], strides = [1, 1]} : vector<13x128xf32> to vector<1x64xf32>
    %11 = vector.extract_strided_slice %0 {offsets = [10, 0], sizes = [1, 64], strides = [1, 1]} : vector<13x128xf32> to vector<1x64xf32>
    %12 = vector.extract_strided_slice %0 {offsets = [11, 0], sizes = [1, 64], strides = [1, 1]} : vector<13x128xf32> to vector<1x64xf32>
    %13 = vector.extract_strided_slice %0 {offsets = [12, 0], sizes = [1, 128], strides = [1, 1]} : vector<13x128xf32> to vector<1x128xf32>
    %c0_1 = arith.constant 0 : index
    %c0_2 = arith.constant 0 : index
    %c0_3 = arith.constant 0 : index
    %14 = vector.load %arg0[%c0_1, %c0_2, %c0_3] : memref<2x16x6xf32, #tpu.memory_space<vmem>>, vector<2x16x6xf32>
    %15 = vector.shape_cast %14 : vector<2x16x6xf32> to vector<32x6xf32>
    %c0_4 = arith.constant 0 : index
    %c0_5 = arith.constant 0 : index
    %16 = vector.load %arg2[%c0_4, %c0_5] : memref<6x64xf32, #tpu.memory_space<vmem>>, vector<6x64xf32>
    %cst = arith.constant dense<0.000000e+00> : vector<32x64xf32>
    %17 = tpu.matmul %15, %16, %cst {dimension_numbers = #tpu.dot_dimension_numbers<[1], [0], [0], [1], [0, 0, 1, 1], [], []>} : vector<32x6xf32>, vector<6x64xf32>, vector<32x64xf32> -> vector<32x64xf32>
    %18 = vector.broadcast %1 : vector<1x64xf32> to vector<32x64xf32>
    %19 = arith.addf %17, %18 : vector<32x64xf32>
    %cst_6 = arith.constant dense<0.000000e+00> : vector<32xf32>
    %20 = vector.multi_reduction <add>, %19, %cst_6 [1] : vector<32x64xf32> to vector<32xf32>
    %21 = vector.shape_cast %20 : vector<32xf32> to vector<32x1xf32>
    %cst_7 = arith.constant 6.400000e+01 : f32
    %22 = vector.broadcast %cst_7 : f32 to vector<32x1xf32>
    %23 = arith.divf %21, %22 : vector<32x1xf32>
    %24 = vector.broadcast %23 : vector<32x1xf32> to vector<32x64xf32>
    %25 = arith.subf %19, %24 : vector<32x64xf32>
    %26 = arith.mulf %25, %25 : vector<32x64xf32>
    %cst_8 = arith.constant dense<0.000000e+00> : vector<32xf32>
    %27 = vector.multi_reduction <add>, %26, %cst_8 [1] : vector<32x64xf32> to vector<32xf32>
    %28 = vector.shape_cast %27 : vector<32xf32> to vector<32x1xf32>
    %cst_9 = arith.constant 6.400000e+01 : f32
    %29 = vector.broadcast %cst_9 : f32 to vector<32x1xf32>
    %30 = arith.divf %28, %29 : vector<32x1xf32>
    %31 = vector.broadcast %23 : vector<32x1xf32> to vector<32x64xf32>
    %32 = arith.subf %19, %31 : vector<32x64xf32>
    %33 = vector.broadcast %2 : vector<1x64xf32> to vector<32x64xf32>
    %34 = arith.mulf %33, %32 : vector<32x64xf32>
    %cst_10 = arith.constant 9.99999996E-13 : f32
    %35 = vector.broadcast %cst_10 : f32 to vector<32x1xf32>
    %36 = arith.addf %30, %35 : vector<32x1xf32>
    %37 = math.rsqrt %36 : vector<32x1xf32>
    %38 = vector.broadcast %37 : vector<32x1xf32> to vector<32x64xf32>
    %39 = arith.mulf %34, %38 : vector<32x64xf32>
    %40 = vector.broadcast %3 : vector<1x64xf32> to vector<32x64xf32>
    %41 = arith.addf %39, %40 : vector<32x64xf32>
    %c0_11 = arith.constant 0 : index
    %c0_12 = arith.constant 0 : index
    %42 = vector.load %arg3[%c0_11, %c0_12] : memref<16x64xf32, #tpu.memory_space<vmem>>, vector<16x64xf32>
    %43 = tpu.concatenate %42, %42 in 0 : vector<16x64xf32>, vector<16x64xf32> -> vector<32x64xf32>
    %44 = arith.addf %41, %43 : vector<32x64xf32>
    %cst_13 = arith.constant dense<0.000000e+00> : vector<32xf32>
    %45 = vector.multi_reduction <add>, %44, %cst_13 [1] : vector<32x64xf32> to vector<32xf32>
    %46 = vector.shape_cast %45 : vector<32xf32> to vector<32x1xf32>
    %cst_14 = arith.constant 6.400000e+01 : f32
    %47 = vector.broadcast %cst_14 : f32 to vector<32x1xf32>
    %48 = arith.divf %46, %47 : vector<32x1xf32>
    %49 = vector.broadcast %48 : vector<32x1xf32> to vector<32x64xf32>
    %50 = arith.subf %44, %49 : vector<32x64xf32>
    %51 = arith.mulf %50, %50 : vector<32x64xf32>
    %cst_15 = arith.constant dense<0.000000e+00> : vector<32xf32>
    %52 = vector.multi_reduction <add>, %51, %cst_15 [1] : vector<32x64xf32> to vector<32xf32>
    %53 = vector.shape_cast %52 : vector<32xf32> to vector<32x1xf32>
    %cst_16 = arith.constant 6.400000e+01 : f32
    %54 = vector.broadcast %cst_16 : f32 to vector<32x1xf32>
    %55 = arith.divf %53, %54 : vector<32x1xf32>
    %56 = vector.broadcast %48 : vector<32x1xf32> to vector<32x64xf32>
    %57 = arith.subf %44, %56 : vector<32x64xf32>
    %58 = vector.broadcast %2 : vector<1x64xf32> to vector<32x64xf32>
    %59 = arith.mulf %58, %57 : vector<32x64xf32>
    %cst_17 = arith.constant 9.99999996E-13 : f32
    %60 = vector.broadcast %cst_17 : f32 to vector<32x1xf32>
    %61 = arith.addf %55, %60 : vector<32x1xf32>
    %62 = math.rsqrt %61 : vector<32x1xf32>
    %63 = vector.broadcast %62 : vector<32x1xf32> to vector<32x64xf32>
    %64 = arith.mulf %59, %63 : vector<32x64xf32>
    %65 = vector.broadcast %3 : vector<1x64xf32> to vector<32x64xf32>
    %66 = arith.addf %64, %65 : vector<32x64xf32>
    %c0_18 = arith.constant 0 : index
    %c0_19 = arith.constant 0 : index
    %c0_20 = arith.constant 0 : index
    %67 = vector.load %arg4[%c0_18, %c0_19, %c0_20] : memref<4x64x64xf32, #tpu.memory_space<vmem>>, vector<1x64x64xf32>
    %68 = vector.shape_cast %67 : vector<1x64x64xf32> to vector<64x64xf32>
    %c1 = arith.constant 1 : index
    %c0_21 = arith.constant 0 : index
    %c0_22 = arith.constant 0 : index
    %69 = vector.load %arg4[%c1, %c0_21, %c0_22] : memref<4x64x64xf32, #tpu.memory_space<vmem>>, vector<1x64x64xf32>
    %70 = vector.shape_cast %69 : vector<1x64x64xf32> to vector<64x64xf32>
    %c2 = arith.constant 2 : index
    %c0_23 = arith.constant 0 : index
    %c0_24 = arith.constant 0 : index
    %71 = vector.load %arg4[%c2, %c0_23, %c0_24] : memref<4x64x64xf32, #tpu.memory_space<vmem>>, vector<1x64x64xf32>
    %72 = vector.shape_cast %71 : vector<1x64x64xf32> to vector<64x64xf32>
    %c3 = arith.constant 3 : index
    %c0_25 = arith.constant 0 : index
    %c0_26 = arith.constant 0 : index
    %73 = vector.load %arg4[%c3, %c0_25, %c0_26] : memref<4x64x64xf32, #tpu.memory_space<vmem>>, vector<1x64x64xf32>
    %74 = vector.shape_cast %73 : vector<1x64x64xf32> to vector<64x64xf32>
    %c0_27 = arith.constant 0 : index
    %c0_28 = arith.constant 0 : index
    %75 = vector.load %arg5[%c0_27, %c0_28] : memref<64x128xf32, #tpu.memory_space<vmem>>, vector<64x128xf32>
    %c0_29 = arith.constant 0 : index
    %c0_30 = arith.constant 0 : index
    %76 = vector.load %arg6[%c0_29, %c0_30] : memref<128x64xf32, #tpu.memory_space<vmem>>, vector<128x64xf32>
    %cst_31 = arith.constant dense<0.000000e+00> : vector<32x64xf32>
    %77 = tpu.matmul %66, %68, %cst_31 {dimension_numbers = #tpu.dot_dimension_numbers<[1], [0], [0], [1], [0, 0, 1, 1], [], []>} : vector<32x64xf32>, vector<64x64xf32>, vector<32x64xf32> -> vector<32x64xf32>
    %78 = vector.broadcast %4 : vector<1x64xf32> to vector<32x64xf32>
    %79 = arith.addf %77, %78 : vector<32x64xf32>
    %cst_32 = arith.constant dense<0.000000e+00> : vector<32x64xf32>
    %80 = tpu.matmul %66, %70, %cst_32 {dimension_numbers = #tpu.dot_dimension_numbers<[1], [0], [0], [1], [0, 0, 1, 1], [], []>} : vector<32x64xf32>, vector<64x64xf32>, vector<32x64xf32> -> vector<32x64xf32>
    %81 = vector.broadcast %5 : vector<1x64xf32> to vector<32x64xf32>
    %82 = arith.addf %80, %81 : vector<32x64xf32>
    %cst_33 = arith.constant dense<0.000000e+00> : vector<32x64xf32>
    %83 = tpu.matmul %66, %72, %cst_33 {dimension_numbers = #tpu.dot_dimension_numbers<[1], [0], [0], [1], [0, 0, 1, 1], [], []>} : vector<32x64xf32>, vector<64x64xf32>, vector<32x64xf32> -> vector<32x64xf32>
    %84 = vector.broadcast %6 : vector<1x64xf32> to vector<32x64xf32>
    %85 = arith.addf %83, %84 : vector<32x64xf32>
    %86 = vector.shape_cast %79 : vector<32x64xf32> to vector<2x16x64xf32>
    %87 = vector.shape_cast %82 : vector<32x64xf32> to vector<2x16x64xf32>
    %88 = vector.shape_cast %85 : vector<32x64xf32> to vector<2x16x64xf32>
    %89 = vector.extract_strided_slice %86 {offsets = [0, 0, 0], sizes = [2, 16, 16], strides = [1, 1, 1]} : vector<2x16x64xf32> to vector<2x16x16xf32>
    %90 = vector.extract_strided_slice %87 {offsets = [0, 0, 0], sizes = [2, 16, 16], strides = [1, 1, 1]} : vector<2x16x64xf32> to vector<2x16x16xf32>
    %91 = vector.extract_strided_slice %88 {offsets = [0, 0, 0], sizes = [2, 16, 16], strides = [1, 1, 1]} : vector<2x16x64xf32> to vector<2x16x16xf32>
    "tpu.trace_start"() <{level = 10 : i32, message = "bqd,bkd->bqk"}> : () -> ()
    %cst_34 = arith.constant dense<0.000000e+00> : vector<2x16x16xf32>
    %92 = tpu.matmul %89, %90, %cst_34 {dimension_numbers = #tpu.dot_dimension_numbers<[2], [2], [1], [1], [0, 0, 0, 1, 1, 1], [0], [0]>} : vector<2x16x16xf32>, vector<2x16x16xf32>, vector<2x16x16xf32> -> vector<2x16x16xf32>
    "tpu.trace_stop"() : () -> ()
    %cst_35 = arith.constant 2.500000e-01 : f32
    %93 = vector.broadcast %cst_35 : f32 to vector<2x16x16xf32>
    %94 = arith.mulf %92, %93 : vector<2x16x16xf32>
    %cst_36 = arith.constant dense<0xFF800000> : vector<2x16xf32>
    %95 = vector.multi_reduction <maximumf>, %94, %cst_36 [2] : vector<2x16x16xf32> to vector<2x16xf32>
    %96 = vector.shape_cast %95 : vector<2x16xf32> to vector<2x16x1xf32>
    %97 = vector.broadcast %96 : vector<2x16x1xf32> to vector<2x16x16xf32>
    %98 = arith.subf %94, %97 : vector<2x16x16xf32>
    %99 = math.exp %98 : vector<2x16x16xf32>
    %cst_37 = arith.constant dense<0.000000e+00> : vector<2x16xf32>
    %100 = vector.multi_reduction <add>, %99, %cst_37 [2] : vector<2x16x16xf32> to vector<2x16xf32>
    %101 = vector.shape_cast %100 : vector<2x16xf32> to vector<2x16x1xf32>
    %102 = tpu.reciprocal %101 {approx = true} : vector<2x16x1xf32> -> vector<2x16x1xf32>
    %103 = vector.broadcast %102 : vector<2x16x1xf32> to vector<2x16x16xf32>
    %104 = arith.mulf %99, %103 : vector<2x16x16xf32>
    "tpu.trace_start"() <{level = 10 : i32, message = "bqk,bkd->bqd"}> : () -> ()
    %cst_38 = arith.constant dense<0.000000e+00> : vector<2x16x16xf32>
    %105 = tpu.matmul %104, %91, %cst_38 {dimension_numbers = #tpu.dot_dimension_numbers<[2], [1], [1], [2], [0, 0, 0, 1, 1, 2], [0], [0]>} : vector<2x16x16xf32>, vector<2x16x16xf32>, vector<2x16x16xf32> -> vector<2x16x16xf32>
    "tpu.trace_stop"() : () -> ()
    %106 = vector.shape_cast %105 : vector<2x16x16xf32> to vector<32x16xf32>
    %107 = vector.extract_strided_slice %86 {offsets = [0, 0, 16], sizes = [2, 16, 16], strides = [1, 1, 1]} : vector<2x16x64xf32> to vector<2x16x16xf32>
    %108 = vector.extract_strided_slice %87 {offsets = [0, 0, 16], sizes = [2, 16, 16], strides = [1, 1, 1]} : vector<2x16x64xf32> to vector<2x16x16xf32>
    %109 = vector.extract_strided_slice %88 {offsets = [0, 0, 16], sizes = [2, 16, 16], strides = [1, 1, 1]} : vector<2x16x64xf32> to vector<2x16x16xf32>
    "tpu.trace_start"() <{level = 10 : i32, message = "bqd,bkd->bqk"}> : () -> ()
    %cst_39 = arith.constant dense<0.000000e+00> : vector<2x16x16xf32>
    %110 = tpu.matmul %107, %108, %cst_39 {dimension_numbers = #tpu.dot_dimension_numbers<[2], [2], [1], [1], [0, 0, 0, 1, 1, 1], [0], [0]>} : vector<2x16x16xf32>, vector<2x16x16xf32>, vector<2x16x16xf32> -> vector<2x16x16xf32>
    "tpu.trace_stop"() : () -> ()
    %cst_40 = arith.constant 2.500000e-01 : f32
    %111 = vector.broadcast %cst_40 : f32 to vector<2x16x16xf32>
    %112 = arith.mulf %110, %111 : vector<2x16x16xf32>
    %cst_41 = arith.constant dense<0xFF800000> : vector<2x16xf32>
    %113 = vector.multi_reduction <maximumf>, %112, %cst_41 [2] : vector<2x16x16xf32> to vector<2x16xf32>
    %114 = vector.shape_cast %113 : vector<2x16xf32> to vector<2x16x1xf32>
    %115 = vector.broadcast %114 : vector<2x16x1xf32> to vector<2x16x16xf32>
    %116 = arith.subf %112, %115 : vector<2x16x16xf32>
    %117 = math.exp %116 : vector<2x16x16xf32>
    %cst_42 = arith.constant dense<0.000000e+00> : vector<2x16xf32>
    %118 = vector.multi_reduction <add>, %117, %cst_42 [2] : vector<2x16x16xf32> to vector<2x16xf32>
    %119 = vector.shape_cast %118 : vector<2x16xf32> to vector<2x16x1xf32>
    %120 = tpu.reciprocal %119 {approx = true} : vector<2x16x1xf32> -> vector<2x16x1xf32>
    %121 = vector.broadcast %120 : vector<2x16x1xf32> to vector<2x16x16xf32>
    %122 = arith.mulf %117, %121 : vector<2x16x16xf32>
    "tpu.trace_start"() <{level = 10 : i32, message = "bqk,bkd->bqd"}> : () -> ()
    %cst_43 = arith.constant dense<0.000000e+00> : vector<2x16x16xf32>
    %123 = tpu.matmul %122, %109, %cst_43 {dimension_numbers = #tpu.dot_dimension_numbers<[2], [1], [1], [2], [0, 0, 0, 1, 1, 2], [0], [0]>} : vector<2x16x16xf32>, vector<2x16x16xf32>, vector<2x16x16xf32> -> vector<2x16x16xf32>
    "tpu.trace_stop"() : () -> ()
    %124 = vector.shape_cast %123 : vector<2x16x16xf32> to vector<32x16xf32>
    %125 = vector.extract_strided_slice %86 {offsets = [0, 0, 32], sizes = [2, 16, 16], strides = [1, 1, 1]} : vector<2x16x64xf32> to vector<2x16x16xf32>
    %126 = vector.extract_strided_slice %87 {offsets = [0, 0, 32], sizes = [2, 16, 16], strides = [1, 1, 1]} : vector<2x16x64xf32> to vector<2x16x16xf32>
    %127 = vector.extract_strided_slice %88 {offsets = [0, 0, 32], sizes = [2, 16, 16], strides = [1, 1, 1]} : vector<2x16x64xf32> to vector<2x16x16xf32>
    "tpu.trace_start"() <{level = 10 : i32, message = "bqd,bkd->bqk"}> : () -> ()
    %cst_44 = arith.constant dense<0.000000e+00> : vector<2x16x16xf32>
    %128 = tpu.matmul %125, %126, %cst_44 {dimension_numbers = #tpu.dot_dimension_numbers<[2], [2], [1], [1], [0, 0, 0, 1, 1, 1], [0], [0]>} : vector<2x16x16xf32>, vector<2x16x16xf32>, vector<2x16x16xf32> -> vector<2x16x16xf32>
    "tpu.trace_stop"() : () -> ()
    %cst_45 = arith.constant 2.500000e-01 : f32
    %129 = vector.broadcast %cst_45 : f32 to vector<2x16x16xf32>
    %130 = arith.mulf %128, %129 : vector<2x16x16xf32>
    %cst_46 = arith.constant dense<0xFF800000> : vector<2x16xf32>
    %131 = vector.multi_reduction <maximumf>, %130, %cst_46 [2] : vector<2x16x16xf32> to vector<2x16xf32>
    %132 = vector.shape_cast %131 : vector<2x16xf32> to vector<2x16x1xf32>
    %133 = vector.broadcast %132 : vector<2x16x1xf32> to vector<2x16x16xf32>
    %134 = arith.subf %130, %133 : vector<2x16x16xf32>
    %135 = math.exp %134 : vector<2x16x16xf32>
    %cst_47 = arith.constant dense<0.000000e+00> : vector<2x16xf32>
    %136 = vector.multi_reduction <add>, %135, %cst_47 [2] : vector<2x16x16xf32> to vector<2x16xf32>
    %137 = vector.shape_cast %136 : vector<2x16xf32> to vector<2x16x1xf32>
    %138 = tpu.reciprocal %137 {approx = true} : vector<2x16x1xf32> -> vector<2x16x1xf32>
    %139 = vector.broadcast %138 : vector<2x16x1xf32> to vector<2x16x16xf32>
    %140 = arith.mulf %135, %139 : vector<2x16x16xf32>
    "tpu.trace_start"() <{level = 10 : i32, message = "bqk,bkd->bqd"}> : () -> ()
    %cst_48 = arith.constant dense<0.000000e+00> : vector<2x16x16xf32>
    %141 = tpu.matmul %140, %127, %cst_48 {dimension_numbers = #tpu.dot_dimension_numbers<[2], [1], [1], [2], [0, 0, 0, 1, 1, 2], [0], [0]>} : vector<2x16x16xf32>, vector<2x16x16xf32>, vector<2x16x16xf32> -> vector<2x16x16xf32>
    "tpu.trace_stop"() : () -> ()
    %142 = vector.shape_cast %141 : vector<2x16x16xf32> to vector<32x16xf32>
    %143 = vector.extract_strided_slice %86 {offsets = [0, 0, 48], sizes = [2, 16, 16], strides = [1, 1, 1]} : vector<2x16x64xf32> to vector<2x16x16xf32>
    %144 = vector.extract_strided_slice %87 {offsets = [0, 0, 48], sizes = [2, 16, 16], strides = [1, 1, 1]} : vector<2x16x64xf32> to vector<2x16x16xf32>
    %145 = vector.extract_strided_slice %88 {offsets = [0, 0, 48], sizes = [2, 16, 16], strides = [1, 1, 1]} : vector<2x16x64xf32> to vector<2x16x16xf32>
    "tpu.trace_start"() <{level = 10 : i32, message = "bqd,bkd->bqk"}> : () -> ()
    %cst_49 = arith.constant dense<0.000000e+00> : vector<2x16x16xf32>
    %146 = tpu.matmul %143, %144, %cst_49 {dimension_numbers = #tpu.dot_dimension_numbers<[2], [2], [1], [1], [0, 0, 0, 1, 1, 1], [0], [0]>} : vector<2x16x16xf32>, vector<2x16x16xf32>, vector<2x16x16xf32> -> vector<2x16x16xf32>
    "tpu.trace_stop"() : () -> ()
    %cst_50 = arith.constant 2.500000e-01 : f32
    %147 = vector.broadcast %cst_50 : f32 to vector<2x16x16xf32>
    %148 = arith.mulf %146, %147 : vector<2x16x16xf32>
    %cst_51 = arith.constant dense<0xFF800000> : vector<2x16xf32>
    %149 = vector.multi_reduction <maximumf>, %148, %cst_51 [2] : vector<2x16x16xf32> to vector<2x16xf32>
    %150 = vector.shape_cast %149 : vector<2x16xf32> to vector<2x16x1xf32>
    %151 = vector.broadcast %150 : vector<2x16x1xf32> to vector<2x16x16xf32>
    %152 = arith.subf %148, %151 : vector<2x16x16xf32>
    %153 = math.exp %152 : vector<2x16x16xf32>
    %cst_52 = arith.constant dense<0.000000e+00> : vector<2x16xf32>
    %154 = vector.multi_reduction <add>, %153, %cst_52 [2] : vector<2x16x16xf32> to vector<2x16xf32>
    %155 = vector.shape_cast %154 : vector<2x16xf32> to vector<2x16x1xf32>
    %156 = tpu.reciprocal %155 {approx = true} : vector<2x16x1xf32> -> vector<2x16x1xf32>
    %157 = vector.broadcast %156 : vector<2x16x1xf32> to vector<2x16x16xf32>
    %158 = arith.mulf %153, %157 : vector<2x16x16xf32>
    "tpu.trace_start"() <{level = 10 : i32, message = "bqk,bkd->bqd"}> : () -> ()
    %cst_53 = arith.constant dense<0.000000e+00> : vector<2x16x16xf32>
    %159 = tpu.matmul %158, %145, %cst_53 {dimension_numbers = #tpu.dot_dimension_numbers<[2], [1], [1], [2], [0, 0, 0, 1, 1, 2], [0], [0]>} : vector<2x16x16xf32>, vector<2x16x16xf32>, vector<2x16x16xf32> -> vector<2x16x16xf32>
    "tpu.trace_stop"() : () -> ()
    %160 = vector.shape_cast %159 : vector<2x16x16xf32> to vector<32x16xf32>
    %161 = tpu.concatenate %106, %124, %142, %160 in 1 : vector<32x16xf32>, vector<32x16xf32>, vector<32x16xf32>, vector<32x16xf32> -> vector<32x64xf32>
    %cst_54 = arith.constant dense<0.000000e+00> : vector<32x64xf32>
    %162 = tpu.matmul %161, %74, %cst_54 {dimension_numbers = #tpu.dot_dimension_numbers<[1], [0], [0], [1], [0, 0, 1, 1], [], []>} : vector<32x64xf32>, vector<64x64xf32>, vector<32x64xf32> -> vector<32x64xf32>
    %163 = vector.broadcast %7 : vector<1x64xf32> to vector<32x64xf32>
    %164 = arith.addf %162, %163 : vector<32x64xf32>
    %165 = arith.addf %161, %164 : vector<32x64xf32>
    %cst_55 = arith.constant dense<0.000000e+00> : vector<32xf32>
    %166 = vector.multi_reduction <add>, %165, %cst_55 [1] : vector<32x64xf32> to vector<32xf32>
    %167 = vector.shape_cast %166 : vector<32xf32> to vector<32x1xf32>
    %cst_56 = arith.constant 6.400000e+01 : f32
    %168 = vector.broadcast %cst_56 : f32 to vector<32x1xf32>
    %169 = arith.divf %167, %168 : vector<32x1xf32>
    %170 = vector.broadcast %169 : vector<32x1xf32> to vector<32x64xf32>
    %171 = arith.subf %165, %170 : vector<32x64xf32>
    %172 = arith.mulf %171, %171 : vector<32x64xf32>
    %cst_57 = arith.constant dense<0.000000e+00> : vector<32xf32>
    %173 = vector.multi_reduction <add>, %172, %cst_57 [1] : vector<32x64xf32> to vector<32xf32>
    %174 = vector.shape_cast %173 : vector<32xf32> to vector<32x1xf32>
    %cst_58 = arith.constant 6.400000e+01 : f32
    %175 = vector.broadcast %cst_58 : f32 to vector<32x1xf32>
    %176 = arith.divf %174, %175 : vector<32x1xf32>
    %177 = vector.broadcast %169 : vector<32x1xf32> to vector<32x64xf32>
    %178 = arith.subf %165, %177 : vector<32x64xf32>
    %179 = vector.broadcast %8 : vector<1x64xf32> to vector<32x64xf32>
    %180 = arith.mulf %179, %178 : vector<32x64xf32>
    %cst_59 = arith.constant 9.99999996E-13 : f32
    %181 = vector.broadcast %cst_59 : f32 to vector<32x1xf32>
    %182 = arith.addf %176, %181 : vector<32x1xf32>
    %183 = math.rsqrt %182 : vector<32x1xf32>
    %184 = vector.broadcast %183 : vector<32x1xf32> to vector<32x64xf32>
    %185 = arith.mulf %180, %184 : vector<32x64xf32>
    %186 = vector.broadcast %9 : vector<1x64xf32> to vector<32x64xf32>
    %187 = arith.addf %185, %186 : vector<32x64xf32>
    %cst_60 = arith.constant dense<0.000000e+00> : vector<32x128xf32>
    %188 = tpu.matmul %187, %75, %cst_60 {dimension_numbers = #tpu.dot_dimension_numbers<[1], [0], [0], [1], [0, 0, 1, 1], [], []>} : vector<32x64xf32>, vector<64x128xf32>, vector<32x128xf32> -> vector<32x128xf32>
    %189 = vector.broadcast %13 : vector<1x128xf32> to vector<32x128xf32>
    %190 = arith.addf %188, %189 : vector<32x128xf32>
    %cst_61 = arith.constant 5.000000e-01 : f32
    %191 = vector.broadcast %cst_61 : f32 to vector<32x128xf32>
    %192 = arith.mulf %191, %190 : vector<32x128xf32>
    %cst_62 = arith.constant 4.471500e-02 : f32
    %193 = vector.broadcast %cst_62 : f32 to vector<32x128xf32>
    %194 = arith.mulf %193, %190 : vector<32x128xf32>
    %195 = arith.mulf %194, %190 : vector<32x128xf32>
    %196 = arith.mulf %195, %190 : vector<32x128xf32>
    %197 = arith.addf %190, %196 : vector<32x128xf32>
    %cst_63 = arith.constant 0.797884583 : f32
    %198 = vector.broadcast %cst_63 : f32 to vector<32x128xf32>
    %199 = arith.mulf %198, %197 : vector<32x128xf32>
    %200 = math.tanh %199 : vector<32x128xf32>
    %cst_64 = arith.constant 1.000000e+00 : f32
    %201 = vector.broadcast %cst_64 : f32 to vector<32x128xf32>
    %202 = arith.addf %201, %200 : vector<32x128xf32>
    %203 = arith.mulf %192, %202 : vector<32x128xf32>
    %cst_65 = arith.constant dense<0.000000e+00> : vector<32x64xf32>
    %204 = tpu.matmul %203, %76, %cst_65 {dimension_numbers = #tpu.dot_dimension_numbers<[1], [0], [0], [1], [0, 0, 1, 1], [], []>} : vector<32x128xf32>, vector<128x64xf32>, vector<32x64xf32> -> vector<32x64xf32>
    %205 = vector.broadcast %10 : vector<1x64xf32> to vector<32x64xf32>
    %206 = arith.addf %204, %205 : vector<32x64xf32>
    %207 = arith.addf %187, %206 : vector<32x64xf32>
    %cst_66 = arith.constant dense<0.000000e+00> : vector<32xf32>
    %208 = vector.multi_reduction <add>, %207, %cst_66 [1] : vector<32x64xf32> to vector<32xf32>
    %209 = vector.shape_cast %208 : vector<32xf32> to vector<32x1xf32>
    %cst_67 = arith.constant 6.400000e+01 : f32
    %210 = vector.broadcast %cst_67 : f32 to vector<32x1xf32>
    %211 = arith.divf %209, %210 : vector<32x1xf32>
    %212 = vector.broadcast %211 : vector<32x1xf32> to vector<32x64xf32>
    %213 = arith.subf %207, %212 : vector<32x64xf32>
    %214 = arith.mulf %213, %213 : vector<32x64xf32>
    %cst_68 = arith.constant dense<0.000000e+00> : vector<32xf32>
    %215 = vector.multi_reduction <add>, %214, %cst_68 [1] : vector<32x64xf32> to vector<32xf32>
    %216 = vector.shape_cast %215 : vector<32xf32> to vector<32x1xf32>
    %cst_69 = arith.constant 6.400000e+01 : f32
    %217 = vector.broadcast %cst_69 : f32 to vector<32x1xf32>
    %218 = arith.divf %216, %217 : vector<32x1xf32>
    %219 = vector.broadcast %211 : vector<32x1xf32> to vector<32x64xf32>
    %220 = arith.subf %207, %219 : vector<32x64xf32>
    %221 = vector.broadcast %11 : vector<1x64xf32> to vector<32x64xf32>
    %222 = arith.mulf %221, %220 : vector<32x64xf32>
    %cst_70 = arith.constant 9.99999996E-13 : f32
    %223 = vector.broadcast %cst_70 : f32 to vector<32x1xf32>
    %224 = arith.addf %218, %223 : vector<32x1xf32>
    %225 = math.rsqrt %224 : vector<32x1xf32>
    %226 = vector.broadcast %225 : vector<32x1xf32> to vector<32x64xf32>
    %227 = arith.mulf %222, %226 : vector<32x64xf32>
    %228 = vector.broadcast %12 : vector<1x64xf32> to vector<32x64xf32>
    %229 = arith.addf %227, %228 : vector<32x64xf32>
    %cst_71 = arith.constant dense<0.000000e+00> : vector<32x64xf32>
    %230 = tpu.matmul %229, %68, %cst_71 {dimension_numbers = #tpu.dot_dimension_numbers<[1], [0], [0], [1], [0, 0, 1, 1], [], []>} : vector<32x64xf32>, vector<64x64xf32>, vector<32x64xf32> -> vector<32x64xf32>
    %231 = vector.broadcast %4 : vector<1x64xf32> to vector<32x64xf32>
    %232 = arith.addf %230, %231 : vector<32x64xf32>
    %cst_72 = arith.constant dense<0.000000e+00> : vector<32x64xf32>
    %233 = tpu.matmul %229, %70, %cst_72 {dimension_numbers = #tpu.dot_dimension_numbers<[1], [0], [0], [1], [0, 0, 1, 1], [], []>} : vector<32x64xf32>, vector<64x64xf32>, vector<32x64xf32> -> vector<32x64xf32>
    %234 = vector.broadcast %5 : vector<1x64xf32> to vector<32x64xf32>
    %235 = arith.addf %233, %234 : vector<32x64xf32>
    %cst_73 = arith.constant dense<0.000000e+00> : vector<32x64xf32>
    %236 = tpu.matmul %229, %72, %cst_73 {dimension_numbers = #tpu.dot_dimension_numbers<[1], [0], [0], [1], [0, 0, 1, 1], [], []>} : vector<32x64xf32>, vector<64x64xf32>, vector<32x64xf32> -> vector<32x64xf32>
    %237 = vector.broadcast %6 : vector<1x64xf32> to vector<32x64xf32>
    %238 = arith.addf %236, %237 : vector<32x64xf32>
    %239 = vector.shape_cast %232 : vector<32x64xf32> to vector<2x16x64xf32>
    %240 = vector.shape_cast %235 : vector<32x64xf32> to vector<2x16x64xf32>
    %241 = vector.shape_cast %238 : vector<32x64xf32> to vector<2x16x64xf32>
    %242 = vector.extract_strided_slice %239 {offsets = [0, 0, 0], sizes = [2, 16, 16], strides = [1, 1, 1]} : vector<2x16x64xf32> to vector<2x16x16xf32>
    %243 = vector.extract_strided_slice %240 {offsets = [0, 0, 0], sizes = [2, 16, 16], strides = [1, 1, 1]} : vector<2x16x64xf32> to vector<2x16x16xf32>
    %244 = vector.extract_strided_slice %241 {offsets = [0, 0, 0], sizes = [2, 16, 16], strides = [1, 1, 1]} : vector<2x16x64xf32> to vector<2x16x16xf32>
    "tpu.trace_start"() <{level = 10 : i32, message = "bqd,bkd->bqk"}> : () -> ()
    %cst_74 = arith.constant dense<0.000000e+00> : vector<2x16x16xf32>
    %245 = tpu.matmul %242, %243, %cst_74 {dimension_numbers = #tpu.dot_dimension_numbers<[2], [2], [1], [1], [0, 0, 0, 1, 1, 1], [0], [0]>} : vector<2x16x16xf32>, vector<2x16x16xf32>, vector<2x16x16xf32> -> vector<2x16x16xf32>
    "tpu.trace_stop"() : () -> ()
    %cst_75 = arith.constant 2.500000e-01 : f32
    %246 = vector.broadcast %cst_75 : f32 to vector<2x16x16xf32>
    %247 = arith.mulf %245, %246 : vector<2x16x16xf32>
    %cst_76 = arith.constant dense<0xFF800000> : vector<2x16xf32>
    %248 = vector.multi_reduction <maximumf>, %247, %cst_76 [2] : vector<2x16x16xf32> to vector<2x16xf32>
    %249 = vector.shape_cast %248 : vector<2x16xf32> to vector<2x16x1xf32>
    %250 = vector.broadcast %249 : vector<2x16x1xf32> to vector<2x16x16xf32>
    %251 = arith.subf %247, %250 : vector<2x16x16xf32>
    %252 = math.exp %251 : vector<2x16x16xf32>
    %cst_77 = arith.constant dense<0.000000e+00> : vector<2x16xf32>
    %253 = vector.multi_reduction <add>, %252, %cst_77 [2] : vector<2x16x16xf32> to vector<2x16xf32>
    %254 = vector.shape_cast %253 : vector<2x16xf32> to vector<2x16x1xf32>
    %255 = tpu.reciprocal %254 {approx = true} : vector<2x16x1xf32> -> vector<2x16x1xf32>
    %256 = vector.broadcast %255 : vector<2x16x1xf32> to vector<2x16x16xf32>
    %257 = arith.mulf %252, %256 : vector<2x16x16xf32>
    "tpu.trace_start"() <{level = 10 : i32, message = "bqk,bkd->bqd"}> : () -> ()
    %cst_78 = arith.constant dense<0.000000e+00> : vector<2x16x16xf32>
    %258 = tpu.matmul %257, %244, %cst_78 {dimension_numbers = #tpu.dot_dimension_numbers<[2], [1], [1], [2], [0, 0, 0, 1, 1, 2], [0], [0]>} : vector<2x16x16xf32>, vector<2x16x16xf32>, vector<2x16x16xf32> -> vector<2x16x16xf32>
    "tpu.trace_stop"() : () -> ()
    %259 = vector.shape_cast %258 : vector<2x16x16xf32> to vector<32x16xf32>
    %260 = vector.extract_strided_slice %239 {offsets = [0, 0, 16], sizes = [2, 16, 16], strides = [1, 1, 1]} : vector<2x16x64xf32> to vector<2x16x16xf32>
    %261 = vector.extract_strided_slice %240 {offsets = [0, 0, 16], sizes = [2, 16, 16], strides = [1, 1, 1]} : vector<2x16x64xf32> to vector<2x16x16xf32>
    %262 = vector.extract_strided_slice %241 {offsets = [0, 0, 16], sizes = [2, 16, 16], strides = [1, 1, 1]} : vector<2x16x64xf32> to vector<2x16x16xf32>
    "tpu.trace_start"() <{level = 10 : i32, message = "bqd,bkd->bqk"}> : () -> ()
    %cst_79 = arith.constant dense<0.000000e+00> : vector<2x16x16xf32>
    %263 = tpu.matmul %260, %261, %cst_79 {dimension_numbers = #tpu.dot_dimension_numbers<[2], [2], [1], [1], [0, 0, 0, 1, 1, 1], [0], [0]>} : vector<2x16x16xf32>, vector<2x16x16xf32>, vector<2x16x16xf32> -> vector<2x16x16xf32>
    "tpu.trace_stop"() : () -> ()
    %cst_80 = arith.constant 2.500000e-01 : f32
    %264 = vector.broadcast %cst_80 : f32 to vector<2x16x16xf32>
    %265 = arith.mulf %263, %264 : vector<2x16x16xf32>
    %cst_81 = arith.constant dense<0xFF800000> : vector<2x16xf32>
    %266 = vector.multi_reduction <maximumf>, %265, %cst_81 [2] : vector<2x16x16xf32> to vector<2x16xf32>
    %267 = vector.shape_cast %266 : vector<2x16xf32> to vector<2x16x1xf32>
    %268 = vector.broadcast %267 : vector<2x16x1xf32> to vector<2x16x16xf32>
    %269 = arith.subf %265, %268 : vector<2x16x16xf32>
    %270 = math.exp %269 : vector<2x16x16xf32>
    %cst_82 = arith.constant dense<0.000000e+00> : vector<2x16xf32>
    %271 = vector.multi_reduction <add>, %270, %cst_82 [2] : vector<2x16x16xf32> to vector<2x16xf32>
    %272 = vector.shape_cast %271 : vector<2x16xf32> to vector<2x16x1xf32>
    %273 = tpu.reciprocal %272 {approx = true} : vector<2x16x1xf32> -> vector<2x16x1xf32>
    %274 = vector.broadcast %273 : vector<2x16x1xf32> to vector<2x16x16xf32>
    %275 = arith.mulf %270, %274 : vector<2x16x16xf32>
    "tpu.trace_start"() <{level = 10 : i32, message = "bqk,bkd->bqd"}> : () -> ()
    %cst_83 = arith.constant dense<0.000000e+00> : vector<2x16x16xf32>
    %276 = tpu.matmul %275, %262, %cst_83 {dimension_numbers = #tpu.dot_dimension_numbers<[2], [1], [1], [2], [0, 0, 0, 1, 1, 2], [0], [0]>} : vector<2x16x16xf32>, vector<2x16x16xf32>, vector<2x16x16xf32> -> vector<2x16x16xf32>
    "tpu.trace_stop"() : () -> ()
    %277 = vector.shape_cast %276 : vector<2x16x16xf32> to vector<32x16xf32>
    %278 = vector.extract_strided_slice %239 {offsets = [0, 0, 32], sizes = [2, 16, 16], strides = [1, 1, 1]} : vector<2x16x64xf32> to vector<2x16x16xf32>
    %279 = vector.extract_strided_slice %240 {offsets = [0, 0, 32], sizes = [2, 16, 16], strides = [1, 1, 1]} : vector<2x16x64xf32> to vector<2x16x16xf32>
    %280 = vector.extract_strided_slice %241 {offsets = [0, 0, 32], sizes = [2, 16, 16], strides = [1, 1, 1]} : vector<2x16x64xf32> to vector<2x16x16xf32>
    "tpu.trace_start"() <{level = 10 : i32, message = "bqd,bkd->bqk"}> : () -> ()
    %cst_84 = arith.constant dense<0.000000e+00> : vector<2x16x16xf32>
    %281 = tpu.matmul %278, %279, %cst_84 {dimension_numbers = #tpu.dot_dimension_numbers<[2], [2], [1], [1], [0, 0, 0, 1, 1, 1], [0], [0]>} : vector<2x16x16xf32>, vector<2x16x16xf32>, vector<2x16x16xf32> -> vector<2x16x16xf32>
    "tpu.trace_stop"() : () -> ()
    %cst_85 = arith.constant 2.500000e-01 : f32
    %282 = vector.broadcast %cst_85 : f32 to vector<2x16x16xf32>
    %283 = arith.mulf %281, %282 : vector<2x16x16xf32>
    %cst_86 = arith.constant dense<0xFF800000> : vector<2x16xf32>
    %284 = vector.multi_reduction <maximumf>, %283, %cst_86 [2] : vector<2x16x16xf32> to vector<2x16xf32>
    %285 = vector.shape_cast %284 : vector<2x16xf32> to vector<2x16x1xf32>
    %286 = vector.broadcast %285 : vector<2x16x1xf32> to vector<2x16x16xf32>
    %287 = arith.subf %283, %286 : vector<2x16x16xf32>
    %288 = math.exp %287 : vector<2x16x16xf32>
    %cst_87 = arith.constant dense<0.000000e+00> : vector<2x16xf32>
    %289 = vector.multi_reduction <add>, %288, %cst_87 [2] : vector<2x16x16xf32> to vector<2x16xf32>
    %290 = vector.shape_cast %289 : vector<2x16xf32> to vector<2x16x1xf32>
    %291 = tpu.reciprocal %290 {approx = true} : vector<2x16x1xf32> -> vector<2x16x1xf32>
    %292 = vector.broadcast %291 : vector<2x16x1xf32> to vector<2x16x16xf32>
    %293 = arith.mulf %288, %292 : vector<2x16x16xf32>
    "tpu.trace_start"() <{level = 10 : i32, message = "bqk,bkd->bqd"}> : () -> ()
    %cst_88 = arith.constant dense<0.000000e+00> : vector<2x16x16xf32>
    %294 = tpu.matmul %293, %280, %cst_88 {dimension_numbers = #tpu.dot_dimension_numbers<[2], [1], [1], [2], [0, 0, 0, 1, 1, 2], [0], [0]>} : vector<2x16x16xf32>, vector<2x16x16xf32>, vector<2x16x16xf32> -> vector<2x16x16xf32>
    "tpu.trace_stop"() : () -> ()
    %295 = vector.shape_cast %294 : vector<2x16x16xf32> to vector<32x16xf32>
    %296 = vector.extract_strided_slice %239 {offsets = [0, 0, 48], sizes = [2, 16, 16], strides = [1, 1, 1]} : vector<2x16x64xf32> to vector<2x16x16xf32>
    %297 = vector.extract_strided_slice %240 {offsets = [0, 0, 48], sizes = [2, 16, 16], strides = [1, 1, 1]} : vector<2x16x64xf32> to vector<2x16x16xf32>
    %298 = vector.extract_strided_slice %241 {offsets = [0, 0, 48], sizes = [2, 16, 16], strides = [1, 1, 1]} : vector<2x16x64xf32> to vector<2x16x16xf32>
    "tpu.trace_start"() <{level = 10 : i32, message = "bqd,bkd->bqk"}> : () -> ()
    %cst_89 = arith.constant dense<0.000000e+00> : vector<2x16x16xf32>
    %299 = tpu.matmul %296, %297, %cst_89 {dimension_numbers = #tpu.dot_dimension_numbers<[2], [2], [1], [1], [0, 0, 0, 1, 1, 1], [0], [0]>} : vector<2x16x16xf32>, vector<2x16x16xf32>, vector<2x16x16xf32> -> vector<2x16x16xf32>
    "tpu.trace_stop"() : () -> ()
    %cst_90 = arith.constant 2.500000e-01 : f32
    %300 = vector.broadcast %cst_90 : f32 to vector<2x16x16xf32>
    %301 = arith.mulf %299, %300 : vector<2x16x16xf32>
    %cst_91 = arith.constant dense<0xFF800000> : vector<2x16xf32>
    %302 = vector.multi_reduction <maximumf>, %301, %cst_91 [2] : vector<2x16x16xf32> to vector<2x16xf32>
    %303 = vector.shape_cast %302 : vector<2x16xf32> to vector<2x16x1xf32>
    %304 = vector.broadcast %303 : vector<2x16x1xf32> to vector<2x16x16xf32>
    %305 = arith.subf %301, %304 : vector<2x16x16xf32>
    %306 = math.exp %305 : vector<2x16x16xf32>
    %cst_92 = arith.constant dense<0.000000e+00> : vector<2x16xf32>
    %307 = vector.multi_reduction <add>, %306, %cst_92 [2] : vector<2x16x16xf32> to vector<2x16xf32>
    %308 = vector.shape_cast %307 : vector<2x16xf32> to vector<2x16x1xf32>
    %309 = tpu.reciprocal %308 {approx = true} : vector<2x16x1xf32> -> vector<2x16x1xf32>
    %310 = vector.broadcast %309 : vector<2x16x1xf32> to vector<2x16x16xf32>
    %311 = arith.mulf %306, %310 : vector<2x16x16xf32>
    "tpu.trace_start"() <{level = 10 : i32, message = "bqk,bkd->bqd"}> : () -> ()
    %cst_93 = arith.constant dense<0.000000e+00> : vector<2x16x16xf32>
    %312 = tpu.matmul %311, %298, %cst_93 {dimension_numbers = #tpu.dot_dimension_numbers<[2], [1], [1], [2], [0, 0, 0, 1, 1, 2], [0], [0]>} : vector<2x16x16xf32>, vector<2x16x16xf32>, vector<2x16x16xf32> -> vector<2x16x16xf32>
    "tpu.trace_stop"() : () -> ()
    %313 = vector.shape_cast %312 : vector<2x16x16xf32> to vector<32x16xf32>
    %314 = tpu.concatenate %259, %277, %295, %313 in 1 : vector<32x16xf32>, vector<32x16xf32>, vector<32x16xf32>, vector<32x16xf32> -> vector<32x64xf32>
    %cst_94 = arith.constant dense<0.000000e+00> : vector<32x64xf32>
    %315 = tpu.matmul %314, %74, %cst_94 {dimension_numbers = #tpu.dot_dimension_numbers<[1], [0], [0], [1], [0, 0, 1, 1], [], []>} : vector<32x64xf32>, vector<64x64xf32>, vector<32x64xf32> -> vector<32x64xf32>
    %316 = vector.broadcast %7 : vector<1x64xf32> to vector<32x64xf32>
    %317 = arith.addf %315, %316 : vector<32x64xf32>
    %318 = arith.addf %314, %317 : vector<32x64xf32>
    %cst_95 = arith.constant dense<0.000000e+00> : vector<32xf32>
    %319 = vector.multi_reduction <add>, %318, %cst_95 [1] : vector<32x64xf32> to vector<32xf32>
    %320 = vector.shape_cast %319 : vector<32xf32> to vector<32x1xf32>
    %cst_96 = arith.constant 6.400000e+01 : f32
    %321 = vector.broadcast %cst_96 : f32 to vector<32x1xf32>
    %322 = arith.divf %320, %321 : vector<32x1xf32>
    %323 = vector.broadcast %322 : vector<32x1xf32> to vector<32x64xf32>
    %324 = arith.subf %318, %323 : vector<32x64xf32>
    %325 = arith.mulf %324, %324 : vector<32x64xf32>
    %cst_97 = arith.constant dense<0.000000e+00> : vector<32xf32>
    %326 = vector.multi_reduction <add>, %325, %cst_97 [1] : vector<32x64xf32> to vector<32xf32>
    %327 = vector.shape_cast %326 : vector<32xf32> to vector<32x1xf32>
    %cst_98 = arith.constant 6.400000e+01 : f32
    %328 = vector.broadcast %cst_98 : f32 to vector<32x1xf32>
    %329 = arith.divf %327, %328 : vector<32x1xf32>
    %330 = vector.broadcast %322 : vector<32x1xf32> to vector<32x64xf32>
    %331 = arith.subf %318, %330 : vector<32x64xf32>
    %332 = vector.broadcast %8 : vector<1x64xf32> to vector<32x64xf32>
    %333 = arith.mulf %332, %331 : vector<32x64xf32>
    %cst_99 = arith.constant 9.99999996E-13 : f32
    %334 = vector.broadcast %cst_99 : f32 to vector<32x1xf32>
    %335 = arith.addf %329, %334 : vector<32x1xf32>
    %336 = math.rsqrt %335 : vector<32x1xf32>
    %337 = vector.broadcast %336 : vector<32x1xf32> to vector<32x64xf32>
    %338 = arith.mulf %333, %337 : vector<32x64xf32>
    %339 = vector.broadcast %9 : vector<1x64xf32> to vector<32x64xf32>
    %340 = arith.addf %338, %339 : vector<32x64xf32>
    %cst_100 = arith.constant dense<0.000000e+00> : vector<32x128xf32>
    %341 = tpu.matmul %340, %75, %cst_100 {dimension_numbers = #tpu.dot_dimension_numbers<[1], [0], [0], [1], [0, 0, 1, 1], [], []>} : vector<32x64xf32>, vector<64x128xf32>, vector<32x128xf32> -> vector<32x128xf32>
    %342 = vector.broadcast %13 : vector<1x128xf32> to vector<32x128xf32>
    %343 = arith.addf %341, %342 : vector<32x128xf32>
    %cst_101 = arith.constant 5.000000e-01 : f32
    %344 = vector.broadcast %cst_101 : f32 to vector<32x128xf32>
    %345 = arith.mulf %344, %343 : vector<32x128xf32>
    %cst_102 = arith.constant 4.471500e-02 : f32
    %346 = vector.broadcast %cst_102 : f32 to vector<32x128xf32>
    %347 = arith.mulf %346, %343 : vector<32x128xf32>
    %348 = arith.mulf %347, %343 : vector<32x128xf32>
    %349 = arith.mulf %348, %343 : vector<32x128xf32>
    %350 = arith.addf %343, %349 : vector<32x128xf32>
    %cst_103 = arith.constant 0.797884583 : f32
    %351 = vector.broadcast %cst_103 : f32 to vector<32x128xf32>
    %352 = arith.mulf %351, %350 : vector<32x128xf32>
    %353 = math.tanh %352 : vector<32x128xf32>
    %cst_104 = arith.constant 1.000000e+00 : f32
    %354 = vector.broadcast %cst_104 : f32 to vector<32x128xf32>
    %355 = arith.addf %354, %353 : vector<32x128xf32>
    %356 = arith.mulf %345, %355 : vector<32x128xf32>
    %cst_105 = arith.constant dense<0.000000e+00> : vector<32x64xf32>
    %357 = tpu.matmul %356, %76, %cst_105 {dimension_numbers = #tpu.dot_dimension_numbers<[1], [0], [0], [1], [0, 0, 1, 1], [], []>} : vector<32x128xf32>, vector<128x64xf32>, vector<32x64xf32> -> vector<32x64xf32>
    %358 = vector.broadcast %10 : vector<1x64xf32> to vector<32x64xf32>
    %359 = arith.addf %357, %358 : vector<32x64xf32>
    %360 = arith.addf %340, %359 : vector<32x64xf32>
    %cst_106 = arith.constant dense<0.000000e+00> : vector<32xf32>
    %361 = vector.multi_reduction <add>, %360, %cst_106 [1] : vector<32x64xf32> to vector<32xf32>
    %362 = vector.shape_cast %361 : vector<32xf32> to vector<32x1xf32>
    %cst_107 = arith.constant 6.400000e+01 : f32
    %363 = vector.broadcast %cst_107 : f32 to vector<32x1xf32>
    %364 = arith.divf %362, %363 : vector<32x1xf32>
    %365 = vector.broadcast %364 : vector<32x1xf32> to vector<32x64xf32>
    %366 = arith.subf %360, %365 : vector<32x64xf32>
    %367 = arith.mulf %366, %366 : vector<32x64xf32>
    %cst_108 = arith.constant dense<0.000000e+00> : vector<32xf32>
    %368 = vector.multi_reduction <add>, %367, %cst_108 [1] : vector<32x64xf32> to vector<32xf32>
    %369 = vector.shape_cast %368 : vector<32xf32> to vector<32x1xf32>
    %cst_109 = arith.constant 6.400000e+01 : f32
    %370 = vector.broadcast %cst_109 : f32 to vector<32x1xf32>
    %371 = arith.divf %369, %370 : vector<32x1xf32>
    %372 = vector.broadcast %364 : vector<32x1xf32> to vector<32x64xf32>
    %373 = arith.subf %360, %372 : vector<32x64xf32>
    %374 = vector.broadcast %11 : vector<1x64xf32> to vector<32x64xf32>
    %375 = arith.mulf %374, %373 : vector<32x64xf32>
    %cst_110 = arith.constant 9.99999996E-13 : f32
    %376 = vector.broadcast %cst_110 : f32 to vector<32x1xf32>
    %377 = arith.addf %371, %376 : vector<32x1xf32>
    %378 = math.rsqrt %377 : vector<32x1xf32>
    %379 = vector.broadcast %378 : vector<32x1xf32> to vector<32x64xf32>
    %380 = arith.mulf %375, %379 : vector<32x64xf32>
    %381 = vector.broadcast %12 : vector<1x64xf32> to vector<32x64xf32>
    %382 = arith.addf %380, %381 : vector<32x64xf32>
    %383 = vector.shape_cast %382 : vector<32x64xf32> to vector<2x16x64xf32>
    %c0_111 = arith.constant 0 : index
    %c0_112 = arith.constant 0 : index
    %c0_113 = arith.constant 0 : index
    %384 = vector.load %arg7[%c0_111, %c0_112, %c0_113] : memref<2x16x64xf32, #tpu.memory_space<vmem>>, vector<2x16x64xf32>
    tpu.vector_store %arg7[%c0_111, %c0_112, %c0_113], %383 {strides = array<i32>} : memref<2x16x64xf32, #tpu.memory_space<vmem>>, vector<2x16x64xf32>,
    return
  }
}

</mosaic_0001>

<bundles_post_ra>
// kernel: libert_pretrain_predict.1
= control target key start
LH: loop header
LB: loop body
LE: loop exit
PB: predicated region body
PF: predicated region fallthrough
CT: control target
= control target key end

     0   :  { %vm48_vm0 = vcmask 1045504   ;;  %vm35_vm1 = vcmask 48128   ;;  %s4807_s0 = inlined_call_operand.vmem [shape: f32[2,16,6], index: 0, kind: input, shape index: {}]   ;;  %s4808_s1 = inlined_call_operand.vmem [shape: f32[13,128], index: 1, kind: input, shape index: {}]   ;;  %s4809_s2 = inlined_call_operand.vmem [shape: f32[6,64], index: 2, kind: input, shape index: {}]   ;;  %s4810_s3 = inlined_call_operand.vmem [shape: f32[16,64], index: 3, kind: input, shape index: {}]   ;;  %s4811_s4 = inlined_call_operand.vmem [shape: f32[4,64,64], index: 4, kind: input, shape index: {}]   ;;  %s4812_s5 = inlined_call_operand.vmem [shape: f32[64,128], index: 5, kind: input, shape index: {}]   ;;  %s4813_s6 = inlined_call_operand.vmem [shape: f32[128,64], index: 6, kind: input, shape index: {}]   ;;  %s4814_s7 = inlined_call_operand.hbm [shape: f32[2,16,64], index: 7, kind: output, shape index: {}]  }
   0x1   :  { %v33_v0 = vld [vmem:[%s4809_s2] sm:$0x3f] }
   0x2   :  { %v29_v1 = vld [vmem:[%s4807_s0] sm:$0xff]  ;;  %2931 = vmatpush.msk.msra.mxu0 %vm48_vm0, %v33_v0 }
   0x3   :  { %12 = vsyncpa [#allocation3], 0  ;;  %2932 = vmatmul.msk.f32.vlgmr.msra.gmra.mxu0 %vm35_vm1, %v29_v1  ;;  %v30_v2 = vld [vmem:[%s4807_s0 + $0x8] sm:$0xff]  ;;  %v31_v3 = vld [vmem:[%s4807_s0 + $0x10] sm:$0xff]  ;;  %vm81_vm2 = vcmask 523264   ;;  %v3439_v19 = vmov 64.0  }
   0x4   :  { %v32_v4 = vld [vmem:[%s4807_s0 + $0x18] sm:$0xff]  ;;  %v3507_v5 = vld [vmem:[%s4808_s1] sm:$0xff]  ;;  %3174 = vrcp.f32 %v3439_v19  ;;  %s3440_s0 = smov 112   ;;  %s3441_s12 = smov 96  }
   0x5   :  { %v34_v6 = vperm.slane %v3507_v5, 0  ;;  %v3535_v57 = vperm.slane %v3507_v5, 1  ;;  %v3540_v1 = vperm.slane %v3507_v5, 2  ;;  %s3442_s13 = smov 80   ;;  %s3443_s21 = smov 16  }
   0x6   :  { %s3444_s22 = smov 32   ;;  %s3445_s23 = smov 48  }
   0x7   :  { %s2919_s14 = sshll.u32 %s4814_s7, 4  ;;  %s3448_s15 = smov 8   ;;  %s2920_s14 = int_to_ptr.hbm [resolvable:$true] %s2919_s14 }
   0xa   :  { %v3175_v20 = vpop.eup %3174 }
   0xb   :  { %2933 = vmatmul.msk.f32.gmra.mxu0 %vm35_vm1, %v30_v2  ;;  %v95_v21 = vmul.f32 64.0, %v3175_v20  ;;  %vm99_vm3 = vweird.f32 %v3175_v20 }
   0xd   :  { %v96_v22 = vsub.f32 1.0, %v95_v21 }
   0xf   :  { %v97_v23 = vmul.f32 %v3175_v20, %v96_v22 }
  0x11   :  { %v98_v24 = vadd.f32 %v3175_v20, %v97_v23  ;;  %v188_v23 = vld [vmem:[%s4810_s3 + $0x8] sm:$0xff] }
  0x13   :  { %2934 = vmatmul.msk.f32.gmra.mxu0 %vm35_vm1, %v31_v3  ;;  %v3514_v25 = vsel %vm99_vm3, %v3175_v20, %v98_v24 }
  0x1b   :  { %2935 = vmatmul.msk.f32.gmra.mxu0 %vm35_vm1, %v32_v4 }
  0x80   :  { %v69_v7 = vpop.f32.mrf.mxu0 }
  0x81   :  { %v70_v8 = vadd.f32 %v69_v7, %v34_v6 }
  0x83   :  { %v82_v9 = vsel %vm81_vm2, %v70_v8, 0.0 }
  0x84   :  { %83 = vadd.xlane.f32.xlu0 %v82_v9 }
  0x88   :  { %v72_v10 = vpop.f32.mrf.mxu0 }
  0x89   :  { %v73_v11 = vadd.f32 %v72_v10, %v34_v6 }
  0x8b   :  { %v85_v12 = vsel %vm81_vm2, %v73_v11, 0.0 }
  0x8c   :  { %86 = vadd.xlane.f32.xlu0 %v85_v12 }
  0x90   :  { %v75_v13 = vpop.f32.mrf.mxu0 }
  0x91   :  { %v76_v14 = vadd.f32 %v75_v13, %v34_v6 }
  0x93   :  { %v88_v15 = vsel %vm81_vm2, %v76_v14, 0.0 }
  0x94   :  { %89 = vadd.xlane.f32.xlu1 %v88_v15 }
  0x98   :  { %v78_v16 = vpop.f32.mrf.mxu0 }
  0x99   :  { %v79_v17 = vadd.f32 %v78_v16, %v34_v6 }
  0x9b   :  { %v91_v18 = vsel %vm81_vm2, %v79_v17, 0.0 }
  0x9c   :  { %92 = vadd.xlane.f32.xlu1 %v91_v18 }
  0xf7   :  { %v84_v26 = vpop.xlane.xlu0 %83 }
  0xf8   :  { %v101_v27 = vmul.f32 %v3514_v25, %v84_v26 }
  0xfa   :  { %v105_v28 = vsub.f32 %v70_v8, %v101_v27  ;;  %v187_v8 = vld [vmem:[%s4810_s3] sm:$0xff]  ;;  %s3447_s3 = smov 128  }
  0xfc   :  { %v109_v29 = vmul.f32 %v105_v28, %v105_v28  ;;  %v130_v0 = vmul.f32 %v3535_v57, %v105_v28 }
  0xfe   :  { %v113_v30 = vsel %vm81_vm2, %v109_v29, 0.0 }
  0xff   :  { %114 = vadd.xlane.f32.xlu2 %v113_v30  ;;  %v87_v31 = vpop.xlane.xlu0 %86 }
 0x100   :  { %v102_v32 = vmul.f32 %v3514_v25, %v87_v31 }
 0x102   :  { %v106_v33 = vsub.f32 %v73_v11, %v102_v32 }
 0x104   :  { %v110_v34 = vmul.f32 %v106_v33, %v106_v33 }
 0x106   :  { %v116_v35 = vsel %vm81_vm2, %v110_v34, 0.0 }
 0x107   :  { %v90_v36 = vpop.xlane.xlu1 %89  ;;  %117 = vadd.xlane.f32.xlu2 %v116_v35 }
 0x108   :  { %v103_v37 = vmul.f32 %v3514_v25, %v90_v36 }
 0x10a   :  { %v3521_v38 = vsub.f32 %v76_v14, %v103_v37 }
 0x10c   :  { %v111_v39 = vmul.f32 %v3521_v38, %v3521_v38  ;;  %v132_v31 = vmul.f32 %v3535_v57, %v3521_v38 }
 0x10e   :  { %v119_v40 = vsel %vm81_vm2, %v111_v39, 0.0 }
 0x10f   :  { %v93_v41 = vpop.xlane.xlu1 %92  ;;  %120 = vadd.xlane.f32.xlu0 %v119_v40 }
 0x110   :  { %v104_v42 = vmul.f32 %v3514_v25, %v93_v41 }
 0x112   :  { %v3527_v43 = vsub.f32 %v79_v17, %v104_v42  ;;  %v131_v17 = vmul.f32 %v3535_v57, %v106_v33 }
 0x114   :  { %v112_v44 = vmul.f32 %v3527_v43, %v3527_v43  ;;  %v133_v42 = vmul.f32 %v3535_v57, %v3527_v43 }
 0x116   :  { %v122_v45 = vsel %vm81_vm2, %v112_v44, 0.0 }
 0x117   :  { %123 = vadd.xlane.f32.xlu1 %v122_v45 }
 0x172   :  { %v115_v46 = vpop.xlane.xlu2 %114 }
 0x173   :  { %v125_v47 = vmul.f32 %v115_v46, %v3514_v25 }
 0x175   :  { %v134_v48 = vadd.f32 1e-12, %v125_v47 }
 0x177   :  { %3176 = vrsqrt.f32 %v134_v48  ;;  %vm144_vm5 = vweird.f32 %v134_v48 }
 0x17a   :  { %v118_v49 = vpop.xlane.xlu2 %117 }
 0x17b   :  { %v126_v50 = vmul.f32 %v118_v49, %v3514_v25 }
 0x17d   :  { %v3177_v51 = vpop.eup %3176  ;;  %v135_v52 = vadd.f32 1e-12, %v126_v50 }
 0x17e   :  { %v139_v53 = vmul.f32 %v3177_v51, %v134_v48  ;;  %vm145_vm4 = vweird.f32 %v3177_v51 }
 0x17f   :  { %3178 = vrsqrt.f32 %v135_v52  ;;  %vm146_vm6 = vmor %vm144_vm5, %vm145_vm4  ;;  %vm154_vm8 = vweird.f32 %v135_v52 }
 0x180   :  { %v140_v54 = vmul.f32 %v3177_v51, %v139_v53 }
 0x182   :  { %v141_v55 = vmul.f32 0.5, %v140_v54  ;;  %v121_v56 = vpop.xlane.xlu0 %120 }
 0x183   :  { %v127_v58 = vmul.f32 %v121_v56, %v3514_v25 }
 0x184   :  { %v142_v59 = vsub.f32 1.5, %v141_v55 }
 0x185   :  { %v3179_v60 = vpop.eup %3178  ;;  %v136_v61 = vadd.f32 1e-12, %v127_v58 }
 0x186   :  { %v143_v62 = vmul.f32 %v3177_v51, %v142_v59  ;;  %v149_v63 = vmul.f32 %v3179_v60, %v135_v52  ;;  %vm155_vm7 = vweird.f32 %v3179_v60 }
 0x187   :  { %3180 = vrsqrt.f32 %v136_v61  ;;  %vm156_vm9 = vmor %vm154_vm8, %vm155_vm7  ;;  %vm164_vm11 = vweird.f32 %v136_v61 }
 0x188   :  { %v150_v2 = vmul.f32 %v3179_v60, %v149_v63  ;;  %v147_v3 = vsel %vm146_vm6, %v3177_v51, %v143_v62 }
 0x189   :  { %v178_v4 = vmul.f32 %v147_v3, %v130_v0 }
 0x18a   :  { %v151_v6 = vmul.f32 0.5, %v150_v2  ;;  %v124_v7 = vpop.xlane.xlu1 %123 }
 0x18b   :  { %v128_v9 = vmul.f32 %v124_v7, %v3514_v25  ;;  %v183_v10 = vadd.f32 %v3540_v1, %v178_v4  ;;  %v296_v7 = vld [vmem:[%s4811_s4 + $0x38] sm:$0xff] }
 0x18c   :  { %v152_v11 = vsub.f32 1.5, %v151_v6  ;;  %369 = vmatpush.msra.mxu1 %v296_v7 }
 0x18d   :  { %v3181_v12 = vpop.eup %3180  ;;  %v137_v13 = vadd.f32 1e-12, %v128_v9  ;;  %v189_v14 = vadd.f32 %v187_v8, %v183_v10  ;;  %v2951_v9 = vld [vmem:[%s4811_s4 + $0xb8] sm:$0xff]  ;;  %v295_v10 = vld [vmem:[%s4811_s4 + $0x30] sm:$0xff] }
 0x18e   :  { %v153_v15 = vmul.f32 %v3179_v60, %v152_v11  ;;  %v159_v16 = vmul.f32 %v3181_v12, %v136_v61  ;;  %vm165_vm10 = vweird.f32 %v3181_v12  ;;  %429 = vmatpush.msrb.mxu0 %v2951_v9  ;;  %v2942_v11 = vld [vmem:[%s4811_s4 + $0x70] sm:$0xff]  ;;  %3096 = vmatpush.msra.mxu3 %v2951_v9 }
 0x18f   :  { %3182 = vrsqrt.f32 %v137_v13  ;;  %v193_v18 = vsel %vm81_vm2, %v189_v14, 0.0  ;;  %vm166_vm12 = vmor %vm164_vm11, %vm165_vm10  ;;  %vm174_vm14 = vweird.f32 %v137_v13  ;;  %370 = vmatpush.msra.mxu1 %v295_v10 }
 0x190   :  { %v160_v19 = vmul.f32 %v3181_v12, %v159_v16  ;;  %194 = vadd.xlane.f32.xlu2 %v193_v18  ;;  %v157_v20 = vsel %vm156_vm9, %v3179_v60, %v153_v15  ;;  %v2949_v15 = vld [vmem:[%s4811_s4 + $0xa8] sm:$0xff]  ;;  %v293_v16 = vld [vmem:[%s4811_s4 + $0x20] sm:$0xff] }
 0x191   :  { %v179_v21 = vmul.f32 %v157_v20, %v131_v17  ;;  %v2940_v17 = vld [vmem:[%s4811_s4 + $0x60] sm:$0xff]  ;;  %v2939_v20 = vld [vmem:[%s4811_s4 + $0x58] sm:$0xff] }
 0x192   :  { %v161_v22 = vmul.f32 0.5, %v160_v19  ;;  %v2948_v18 = vld [vmem:[%s4811_s4 + $0xa0] sm:$0xff]  ;;  %v3625_v19 = vld [vmem:[%s4811_s4 + $0x18] sm:$0xff] }
 0x193   :  { %v184_v24 = vadd.f32 %v3540_v1, %v179_v21  ;;  %v2947_v21 = vld [vmem:[%s4811_s4 + $0x98] sm:$0xff] }
 0x194   :  { %v162_v26 = vsub.f32 1.5, %v161_v22  ;;  %v3637_v22 = vld [vmem:[%s4811_s4 + $0x10] sm:$0xff] }
 0x195   :  { %v3183_v27 = vpop.eup %3182  ;;  %v190_v28 = vadd.f32 %v188_v23, %v184_v24  ;;  %v2946_v24 = vld [vmem:[%s4811_s4 + $0x90] sm:$0xff] }
 0x196   :  { %v163_v29 = vmul.f32 %v3181_v12, %v162_v26  ;;  %v169_v30 = vmul.f32 %v3183_v27, %v137_v13  ;;  %vm175_vm13 = vweird.f32 %v3183_v27  ;;  %v294_v13 = vld [vmem:[%s4811_s4 + $0x28] sm:$0xff] }
 0x197   :  { %v196_v32 = vsel %vm81_vm2, %v190_v28, 0.0  ;;  %vm176_vm15 = vmor %vm174_vm14, %vm175_vm13  ;;  %371 = vmatpush.msra.mxu1 %v294_v13  ;;  %v3649_v26 = vld [vmem:[%s4811_s4 + $0x8] sm:$0xff]  ;;  %vm450_vm13 = vcmask 130048   ;;  %vm1271_vm14 = vcmask 261120  }
 0x198   :  { %v170_v33 = vmul.f32 %v3183_v27, %v169_v30  ;;  %197 = vadd.xlane.f32.xlu0 %v196_v32  ;;  %v167_v34 = vsel %vm166_vm12, %v3181_v12, %v163_v29  ;;  %v2950_v12 = vld [vmem:[%s4811_s4 + $0xb0] sm:$0xff]  ;;  %v3661_v29 = vld [vmem:[%s4811_s4] sm:$0xff] }
 0x199   :  { %v180_v35 = vmul.f32 %v167_v34, %v132_v31  ;;  %430 = vmatpush.msrb.mxu0 %v2950_v12  ;;  %3097 = vmatpush.msra.mxu3 %v2950_v12  ;;  %v2936_v30 = vld [vmem:[%s4811_s4 + $0x40] sm:$0xff] }
 0x19a   :  { %v171_v36 = vmul.f32 0.5, %v170_v33  ;;  %372 = vmatpush.msra.mxu1 %v293_v16  ;;  %v2944_v31 = vld [vmem:[%s4811_s4 + $0x80] sm:$0xff] }
 0x19b   :  { %v185_v37 = vadd.f32 %v3540_v1, %v180_v35  ;;  %431 = vmatpush.msrb.mxu0 %v2949_v15  ;;  %3098 = vmatpush.msra.mxu3 %v2949_v15 }
 0x19c   :  { %v172_v39 = vsub.f32 1.5, %v171_v36  ;;  %373 = vmatpush.msra.mxu1 %v3625_v19 }
 0x19d   :  { %v191_v40 = vadd.f32 %v187_v8, %v185_v37  ;;  %v2943_v8 = vld [vmem:[%s4811_s4 + $0x78] sm:$0xff]  ;;  %432 = vmatpush.msrb.mxu0 %v2948_v18  ;;  %3099 = vmatpush.msra.mxu3 %v2948_v18 }
 0x19e   :  { %v173_v41 = vmul.f32 %v3183_v27, %v172_v39  ;;  %399 = vmatpush.msra.mxu2 %v2943_v8  ;;  %374 = vmatpush.msra.mxu1 %v3637_v22 }
 0x19f   :  { %v199_v38 = vsel %vm81_vm2, %v191_v40, 0.0  ;;  %433 = vmatpush.msrb.mxu0 %v2947_v21  ;;  %3100 = vmatpush.msra.mxu3 %v2947_v21 }
 0x1a0   :  { %200 = vadd.xlane.f32.xlu1 %v199_v38  ;;  %v177_v44 = vsel %vm176_vm15, %v3183_v27, %v173_v41  ;;  %400 = vmatpush.msra.mxu2 %v2942_v11  ;;  %v2937_v27 = vld [vmem:[%s4811_s4 + $0x48] sm:$0xff]  ;;  %vm1276_vm15 = vcmask 392192  }
 0x1a1   :  { %v181_v45 = vmul.f32 %v177_v44, %v133_v42  ;;  %434 = vmatpush.msrb.mxu0 %v2946_v24  ;;  %3101 = vmatpush.msra.mxu3 %v2946_v24 }
 0x1a2   :  { %375 = vmatpush.msra.mxu1 %v3649_v26 }
 0x1a3   :  { %v186_v46 = vadd.f32 %v3540_v1, %v181_v45 }
 0x1a4   :  { %376 = vmatpush.msra.mxu1 %v3661_v29 }
 0x1a5   :  { %v192_v47 = vadd.f32 %v188_v23, %v186_v46  ;;  %v2938_v23 = vld [vmem:[%s4811_s4 + $0x50] sm:$0xff] }
 0x1a7   :  { %v202_v48 = vsel %vm81_vm2, %v192_v47, 0.0 }
 0x1a8   :  { %203 = vadd.xlane.f32.xlu2 %v202_v48 }
 0x203   :  { %v195_v49 = vpop.xlane.xlu2 %194 }
 0x204   :  { %v205_v50 = vmul.f32 %v195_v49, %v3514_v25 }
 0x206   :  { %v3563_v51 = vsub.f32 %v189_v14, %v205_v50  ;;  %v2941_v14 = vld [vmem:[%s4811_s4 + $0x68] sm:$0xff] }
 0x207   :  { %401 = vmatpush.msra.mxu2 %v2941_v14 }
 0x208   :  { %v213_v43 = vmul.f32 %v3563_v51, %v3563_v51  ;;  %v233_v50 = vmul.f32 %v3563_v51, %v3535_v57 }
 0x209   :  { %402 = vmatpush.msra.mxu2 %v2940_v17 }
 0x20a   :  { %v217_v52 = vsel %vm81_vm2, %v213_v43, 0.0 }
 0x20b   :  { %218 = vadd.xlane.f32.xlu0 %v217_v52  ;;  %v198_v53 = vpop.xlane.xlu0 %197  ;;  %403 = vmatpush.msra.mxu2 %v2939_v20 }
 0x20c   :  { %v206_v54 = vmul.f32 %v198_v53, %v3514_v25 }
 0x20d   :  { %404 = vmatpush.msra.mxu2 %v2938_v23 }
 0x20e   :  { %v3569_v55 = vsub.f32 %v190_v28, %v206_v54  ;;  %v2945_v28 = vld [vmem:[%s4811_s4 + $0x88] sm:$0xff] }
 0x20f   :  { %405 = vmatpush.msra.mxu2 %v2937_v27  ;;  %435 = vmatpush.msrb.mxu0 %v2945_v28 }
 0x210   :  { %v214_v56 = vmul.f32 %v3569_v55, %v3569_v55  ;;  %3102 = vmatpush.msra.mxu3 %v2945_v28  ;;  %v3699_v28 = vperm.slane %v3507_v5, 3 }
 0x211   :  { %406 = vmatpush.msra.mxu2 %v2936_v30  ;;  %436 = vmatpush.msrb.mxu0 %v2944_v31 }
 0x212   :  { %v220_v58 = vsel %vm81_vm2, %v214_v56, 0.0  ;;  %3103 = vmatpush.msra.mxu3 %v2944_v31 }
 0x213   :  { %v201_v59 = vpop.xlane.xlu1 %200  ;;  %221 = vadd.xlane.f32.xlu1 %v220_v58 }
 0x214   :  { %v207_v60 = vmul.f32 %v201_v59, %v3514_v25 }
 0x216   :  { %v3575_v61 = vsub.f32 %v191_v40, %v207_v60 }
 0x218   :  { %v215_v62 = vmul.f32 %v3575_v61, %v3575_v61  ;;  %v235_v13 = vmul.f32 %v3575_v61, %v3535_v57 }
 0x21a   :  { %v223_v63 = vsel %vm81_vm2, %v215_v62, 0.0 }
 0x21b   :  { %v204_v0 = vpop.xlane.xlu2 %203  ;;  %224 = vadd.xlane.f32.xlu2 %v223_v63 }
 0x21c   :  { %v208_v2 = vmul.f32 %v204_v0, %v3514_v25 }
 0x21e   :  { %v3581_v3 = vsub.f32 %v192_v47, %v208_v2  ;;  %v234_v2 = vmul.f32 %v3569_v55, %v3535_v57 }
 0x220   :  { %v216_v4 = vmul.f32 %v3581_v3, %v3581_v3  ;;  %v236_v61 = vmul.f32 %v3581_v3, %v3535_v57  ;;  %v3704_v57 = vperm.slane %v3507_v5, 4 }
 0x222   :  { %v226_v6 = vsel %vm81_vm2, %v216_v4, 0.0 }
 0x223   :  { %227 = vadd.xlane.f32.xlu0 %v226_v6 }
 0x27e   :  { %v219_v32 = vpop.xlane.xlu0 %218 }
 0x27f   :  { %v229_v33 = vmul.f32 %v219_v32, %v3514_v25 }
 0x281   :  { %v237_v34 = vadd.f32 1e-12, %v229_v33 }
 0x283   :  { %3184 = vrsqrt.f32 %v237_v34  ;;  %vm247_vm1 = vweird.f32 %v237_v34 }
 0x286   :  { %v222_v35 = vpop.xlane.xlu1 %221 }
 0x287   :  { %v230_v36 = vmul.f32 %v222_v35, %v3514_v25 }
 0x289   :  { %v3185_v37 = vpop.eup %3184  ;;  %v238_v39 = vadd.f32 1e-12, %v230_v36 }
 0x28a   :  { %v242_v40 = vmul.f32 %v3185_v37, %v237_v34  ;;  %vm248_vm0 = vweird.f32 %v3185_v37 }
 0x28b   :  { %3186 = vrsqrt.f32 %v238_v39  ;;  %vm249_vm3 = vmor %vm247_vm1, %vm248_vm0  ;;  %vm257_vm5 = vweird.f32 %v238_v39 }
 0x28c   :  { %v243_v41 = vmul.f32 %v3185_v37, %v242_v40 }
 0x28e   :  { %v244_v42 = vmul.f32 0.5, %v243_v41  ;;  %v225_v38 = vpop.xlane.xlu2 %224 }
 0x28f   :  { %v231_v44 = vmul.f32 %v225_v38, %v3514_v25 }
 0x290   :  { %v245_v45 = vsub.f32 1.5, %v244_v42 }
 0x291   :  { %v3187_v46 = vpop.eup %3186  ;;  %v239_v47 = vadd.f32 1e-12, %v231_v44 }
 0x292   :  { %v252_v48 = vmul.f32 %v3187_v46, %v238_v39  ;;  %v246_v49 = vmul.f32 %v3185_v37, %v245_v45  ;;  %vm258_vm4 = vweird.f32 %v3187_v46 }
 0x293   :  { %3188 = vrsqrt.f32 %v239_v47  ;;  %vm259_vm6 = vmor %vm257_vm5, %vm258_vm4  ;;  %vm267_vm8 = vweird.f32 %v239_v47 }
 0x294   :  { %v253_v43 = vmul.f32 %v3187_v46, %v252_v48  ;;  %v250_v52 = vsel %vm249_vm3, %v3185_v37, %v246_v49 }
 0x295   :  { %v281_v53 = vmul.f32 %v250_v52, %v233_v50 }
 0x296   :  { %v254_v54 = vmul.f32 0.5, %v253_v43  ;;  %v228_v56 = vpop.xlane.xlu0 %227 }
 0x297   :  { %v232_v58 = vmul.f32 %v228_v56, %v3514_v25  ;;  %v285_v59 = vadd.f32 %v281_v53, %v3540_v1 }
 0x298   :  { %v255_v60 = vsub.f32 1.5, %v254_v54 }
 0x299   :  { %v3189_v62 = vpop.eup %3188  ;;  %v240_v63 = vadd.f32 1e-12, %v232_v58  ;;  %2960 = vmatmul.msk.f32.vlgmr.msra.gmra.mxu1 %vm81_vm2, %v285_v59  ;;  %2964 = vmatmul.msk.f32.vlgmr.msra.gmra.mxu2 %vm81_vm2, %v285_v59 }
 0x29a   :  { %v262_v51 = vmul.f32 %v3189_v62, %v239_v47  ;;  %2968 = vmatmul.msk.f32.vlgmr.msrb.gmra.mxu0 %vm81_vm2, %v285_v59  ;;  %v256_v0 = vmul.f32 %v3187_v46, %v255_v60  ;;  %vm268_vm7 = vweird.f32 %v3189_v62 }
 0x29b   :  { %3190 = vrsqrt.f32 %v240_v63  ;;  %vm269_vm9 = vmor %vm267_vm8, %vm268_vm7  ;;  %vm277_vm11 = vweird.f32 %v240_v63 }
 0x29c   :  { %v263_v4 = vmul.f32 %v3189_v62, %v262_v51  ;;  %v260_v6 = vsel %vm259_vm6, %v3187_v46, %v256_v0 }
 0x29d   :  { %v282_v7 = vmul.f32 %v260_v6, %v234_v2 }
 0x29e   :  { %v264_v8 = vmul.f32 0.5, %v263_v4 }
 0x29f   :  { %v286_v9 = vadd.f32 %v282_v7, %v3540_v1 }
 0x2a0   :  { %v265_v10 = vsub.f32 1.5, %v264_v8 }
 0x2a1   :  { %v3191_v11 = vpop.eup %3190  ;;  %2961 = vmatmul.msk.f32.gmra.mxu1 %vm81_vm2, %v286_v9  ;;  %2965 = vmatmul.msk.f32.gmra.mxu2 %vm81_vm2, %v286_v9 }
 0x2a2   :  { %v272_v12 = vmul.f32 %v3191_v11, %v240_v63  ;;  %2969 = vmatmul.msk.f32.gmra.mxu0 %vm81_vm2, %v286_v9  ;;  %v266_v55 = vmul.f32 %v3189_v62, %v265_v10  ;;  %vm278_vm10 = vweird.f32 %v3191_v11 }
 0x2a3   :  { %vm279_vm12 = vmor %vm277_vm11, %vm278_vm10 }
 0x2a4   :  { %v273_v14 = vmul.f32 %v3191_v11, %v272_v12  ;;  %v270_v15 = vsel %vm269_vm9, %v3189_v62, %v266_v55 }
 0x2a5   :  { %v283_v16 = vmul.f32 %v270_v15, %v235_v13 }
 0x2a6   :  { %v274_v17 = vmul.f32 0.5, %v273_v14 }
 0x2a7   :  { %v287_v18 = vadd.f32 %v283_v16, %v3540_v1 }
 0x2a8   :  { %v275_v20 = vsub.f32 1.5, %v274_v17 }
 0x2a9   :  { %2962 = vmatmul.msk.f32.gmra.mxu1 %vm81_vm2, %v287_v18  ;;  %2966 = vmatmul.msk.f32.gmra.mxu2 %vm81_vm2, %v287_v18 }
 0x2aa   :  { %2970 = vmatmul.msk.f32.gmra.mxu0 %vm81_vm2, %v287_v18  ;;  %v276_v21 = vmul.f32 %v3191_v11, %v275_v20 }
 0x2ac   :  { %v280_v23 = vsel %vm279_vm12, %v3191_v11, %v276_v21 }
 0x2ad   :  { %v284_v24 = vmul.f32 %v280_v23, %v236_v61 }
 0x2af   :  { %v288_v27 = vadd.f32 %v284_v24, %v3540_v1  ;;  %v3707_v1 = vperm.slane %v3507_v5, 5 }
 0x2b1   :  { %2963 = vmatmul.msk.f32.gmra.mxu1 %vm81_vm2, %v288_v27  ;;  %2967 = vmatmul.msk.f32.gmra.mxu2 %vm81_vm2, %v288_v27 }
 0x2b2   :  { %2971 = vmatmul.msk.f32.vlgmr.msra.gmra.mxu3 %vm81_vm2, %v288_v27 }
 0x316   :  { %v378_v30 = vpop.f32.mrf.mxu1 }
 0x317   :  { %v379_v31 = vadd.f32 %v378_v30, %v3699_v28  ;;  %v438_v32 = vpop.f32.mrf.mxu0 }
 0x318   :  { %v439_v35 = vadd.f32 %v438_v32, %v3707_v1 }
 0x319   :  { %627 = vrot.lane.b32.xlu0 %v379_v31, %s3440_s0 }
 0x31c   :  { %v408_v3 = vpop.f32.mrf.mxu2 }
 0x31d   :  { %v409_v33 = vadd.f32 %v408_v3, %v3704_v57 }
 0x31e   :  { %v381_v37 = vpop.f32.mrf.mxu1 }
 0x31f   :  { %v441_v34 = vpop.f32.mrf.mxu0  ;;  %631 = vrot.lane.b32.xlu2 %v409_v33, %s3440_s0  ;;  %v382_v41 = vadd.f32 %v381_v37, %v3699_v28 }
 0x320   :  { %v442_v36 = vadd.f32 %v441_v34, %v3707_v1 }
 0x322   :  { %589 = vmatpush.msrb.mxu2 %v442_v36  ;;  %v3713_v39 = vpack.i.bf16 %v439_v35, %v442_v36 }
 0x324   :  { %590 = vmatpush.msrb.mxu2 %v439_v35  ;;  %v411_v40 = vpop.f32.mrf.mxu2 }
 0x325   :  { %v412_v5 = vadd.f32 %v411_v40, %v3704_v57 }
 0x326   :  { %v384_v42 = vpop.f32.mrf.mxu1 }
 0x327   :  { %633 = vrot.lane.b32.xlu1 %v412_v5, %s3440_s0  ;;  %2972 = vmatpush.xpose.msk.msra.mxu0 %vm450_vm13, %v412_v5  ;;  %v385_v44 = vadd.f32 %v384_v42, %v3699_v28  ;;  %v444_v45 = vpop.f32.mrf.mxu0 }
 0x328   :  { %629 = vrot.lane.b32.xlu2 %v382_v41, %s3440_s0  ;;  %833 = vrot.lane.b32.xlu0 %v412_v5, %s3441_s12  ;;  %v445_v49 = vadd.f32 %v444_v45, %v3707_v1 }
 0x32b   :  { %2973 = vmatpush.xpose.msk.msra.mxu0 %vm450_vm13, %v409_v33 }
 0x32c   :  { %v414_v38 = vpop.f32.mrf.mxu2 }
 0x32d   :  { %v415_v50 = vadd.f32 %v414_v38, %v3704_v57 }
 0x32e   :  { %2974 = vmatmul.msk.f32.vlgmr.msra.gmra.mxu0 %vm450_vm13, %v379_v31  ;;  %v387_v53 = vpop.f32.mrf.mxu1 }
 0x32f   :  { %831 = vrot.lane.b32.xlu1 %v409_v33, %s3441_s12  ;;  %v388_v54 = vadd.f32 %v387_v53, %v3699_v28 }
 0x330   :  { %827 = vrot.lane.b32.xlu2 %v379_v31, %s3441_s12  ;;  %666 = vrot.lane.b32.xlu0 %v385_v44, %s3440_s0 }
 0x334   :  { %v417_v46 = vpop.f32.mrf.mxu2 }
 0x335   :  { %v418_v47 = vadd.f32 %v417_v46, %v3704_v57  ;;  %v447_v48 = vpop.f32.mrf.mxu3 }
 0x336   :  { %v448_v43 = vadd.f32 %v447_v48, %v3707_v1  ;;  %2975 = vmatmul.msk.f32.gmra.mxu0 %vm450_vm13, %v382_v41 }
 0x337   :  { %672 = vrot.lane.b32.xlu1 %v418_v47, %s3440_s0  ;;  %2976 = vmatpush.xpose.msk.msrb.mxu1 %vm450_vm13, %v418_v47 }
 0x338   :  { %670 = vrot.lane.b32.xlu2 %v415_v50, %s3440_s0  ;;  %829 = vrot.lane.b32.xlu0 %v382_v41, %s3441_s12  ;;  %v3736_v52 = vpack.i.bf16 %v445_v49, %v448_v43 }
 0x339   :  { %618 = vmatpush.msrb.mxu3 %v448_v43 }
 0x33b   :  { %619 = vmatpush.msrb.mxu3 %v445_v49  ;;  %2977 = vmatpush.xpose.msk.msrb.mxu1 %vm450_vm13, %v415_v50 }
 0x33e   :  { %2978 = vmatmul.msk.f32.vlgmr.msrb.gmra.mxu1 %vm450_vm13, %v385_v44 }
 0x33f   :  { %668 = vrot.lane.b32.xlu1 %v388_v54, %s3440_s0 }
 0x340   :  { %870 = vrot.lane.b32.xlu0 %v415_v50, %s3441_s12  ;;  %872 = vrot.lane.b32.xlu2 %v418_v47, %s3441_s12 }
 0x346   :  { %2979 = vmatmul.msk.f32.gmra.mxu1 %vm450_vm13, %v388_v54 }
 0x347   :  { %1029 = vrot.lane.b32.xlu1 %v412_v5, %s3442_s13 }
 0x348   :  { %1023 = vrot.lane.b32.xlu0 %v379_v31, %s3442_s13  ;;  %1027 = vrot.lane.b32.xlu2 %v409_v33, %s3442_s13 }
 0x34f   :  { %866 = vrot.lane.b32.xlu1 %v385_v44, %s3441_s12 }
 0x350   :  { %1068 = vrot.lane.b32.xlu0 %v418_v47, %s3442_s13  ;;  %868 = vrot.lane.b32.xlu2 %v388_v54, %s3441_s12 }
 0x357   :  { %1025 = vrot.lane.b32.xlu1 %v382_v41, %s3442_s13 }
 0x358   :  { %1064 = vrot.lane.b32.xlu0 %v388_v54, %s3442_s13  ;;  %1066 = vrot.lane.b32.xlu2 %v415_v50, %s3442_s13 }
 0x35f   :  { %1062 = vrot.lane.b32.xlu1 %v385_v44, %s3442_s13 }
 0x360   :  { %3115 = vrot.lane.b32.xlu0 %v3713_v39, %s3440_s0  ;;  %3120 = vrot.lane.b32.xlu2 %v3736_v52, %s3440_s0 }
 0x379   :  { %v632_v56 = vpop.permute.xlu2 %631 }
 0x382   :  { %v630_v58 = vpop.permute.xlu2 %629 }
 0x38a   :  { %v828_v59 = vpop.permute.xlu2 %827 }
 0x38b   :  { %v628_v60 = vpop.permute.xlu0 %627 }
 0x392   :  { %v671_v62 = vpop.permute.xlu2 %670 }
 0x399   :  { %v634_v63 = vpop.permute.xlu1 %633 }
 0x39a   :  { %v873_v51 = vpop.permute.xlu2 %872  ;;  %v834_v0 = vpop.permute.xlu0 %833  ;;  %2984 = vmatpush.xpose.msk.msrb.mxu0 %vm450_vm13, %v634_v63 }
 0x39e   :  { %2985 = vmatpush.xpose.msk.msrb.mxu0 %vm450_vm13, %v632_v56 }
 0x3a1   :  { %v832_v2 = vpop.permute.xlu1 %831  ;;  %2986 = vmatmul.msk.f32.vlgmr.msrb.gmra.mxu0 %vm450_vm13, %v628_v60 }
 0x3a2   :  { %2996 = vmatpush.xpose.msk.msra.mxu0 %vm450_vm13, %v834_v0  ;;  %v1028_v4 = vpop.permute.xlu2 %1027  ;;  %v667_v6 = vpop.permute.xlu0 %666 }
 0x3a6   :  { %2997 = vmatpush.xpose.msk.msra.mxu0 %vm450_vm13, %v832_v2 }
 0x3a9   :  { %v673_v7 = vpop.permute.xlu1 %672  ;;  %2987 = vmatmul.msk.f32.gmra.mxu0 %vm450_vm13, %v630_v58 }
 0x3aa   :  { %v869_v8 = vpop.permute.xlu2 %868  ;;  %v830_v9 = vpop.permute.xlu0 %829  ;;  %2988 = vmatpush.xpose.msk.msra.mxu1 %vm450_vm13, %v673_v7 }
 0x3ab   :  { %v480_v10 = vpop.f32.mrf.mxu0 }
 0x3ac   :  { %v521_v11 = vmul.f32 0.25, %v480_v10 }
 0x3ae   :  { %2989 = vmatpush.xpose.msk.msra.mxu1 %vm450_vm13, %v671_v62  ;;  %v525_v12 = vsel %vm450_vm13, %v521_v11, -inf }
 0x3af   :  { %526 = vmax.xlane.f32.xlu2 %v525_v12 }
 0x3b1   :  { %v669_v55 = vpop.permute.xlu1 %668  ;;  %2990 = vmatmul.msk.f32.vlgmr.msra.gmra.mxu1 %vm450_vm13, %v667_v6  ;;  %2998 = vmatmul.msk.f32.vlgmr.msra.gmra.mxu0 %vm450_vm13, %v828_v59 }
 0x3b2   :  { %3000 = vmatpush.xpose.msk.msrb.mxu1 %vm450_vm13, %v873_v51  ;;  %v1067_v13 = vpop.permute.xlu2 %1066  ;;  %v871_v14 = vpop.permute.xlu0 %870 }
 0x3b3   :  { %v483_v15 = vpop.f32.mrf.mxu0 }
 0x3b4   :  { %v522_v16 = vmul.f32 0.25, %v483_v15 }
 0x3b6   :  { %3001 = vmatpush.xpose.msk.msrb.mxu1 %vm450_vm13, %v871_v14  ;;  %v528_v17 = vsel %vm450_vm13, %v522_v16, -inf }
 0x3b7   :  { %529 = vmax.xlane.f32.xlu1 %v528_v17 }
 0x3b9   :  { %v1030_v18 = vpop.permute.xlu1 %1029  ;;  %2991 = vmatmul.msk.f32.gmra.mxu1 %vm450_vm13, %v669_v55  ;;  %2999 = vmatmul.msk.f32.gmra.mxu0 %vm450_vm13, %v830_v9 }
 0x3ba   :  { %v3121_v20 = vpop.permute.xlu2 %3120  ;;  %v1024_v21 = vpop.permute.xlu0 %1023  ;;  %3008 = vmatpush.xpose.msk.msrb.mxu0 %vm450_vm13, %v1030_v18 }
 0x3bb   :  { %v3122_v61 = vunpack.i.l.bf16 %v3121_v20  ;;  %v515_v23 = vpop.f32.mrf.mxu1  ;;  %v3123_v27 = vunpack.i.h.bf16 %v3121_v20 }
 0x3bc   :  { %v523_v24 = vmul.f32 0.25, %v515_v23 }
 0x3bd   :  { %818 = vmatpush.msra.mxu3 %v3122_v61 }
 0x3be   :  { %3009 = vmatpush.xpose.msk.msrb.mxu0 %vm450_vm13, %v1028_v4  ;;  %v531_v30 = vsel %vm450_vm13, %v523_v24, -inf }
 0x3bf   :  { %819 = vmatpush.msra.mxu3 %v3123_v27  ;;  %532 = vmax.xlane.f32.xlu0 %v531_v30 }
 0x3c1   :  { %v867_v31 = vpop.permute.xlu1 %866  ;;  %3010 = vmatmul.msk.f32.vlgmr.msrb.gmra.mxu0 %vm450_vm13, %v1024_v21 }
 0x3c2   :  { %v1069_v32 = vpop.permute.xlu0 %1068  ;;  %3002 = vmatmul.msk.f32.vlgmr.msrb.gmra.mxu1 %vm450_vm13, %v867_v31 }
 0x3c3   :  { %3012 = vmatpush.xpose.msk.msra.mxu1 %vm450_vm13, %v1069_v32  ;;  %v518_v3 = vpop.f32.mrf.mxu1 }
 0x3c4   :  { %v524_v33 = vmul.f32 0.25, %v518_v3 }
 0x3c6   :  { %v534_v34 = vsel %vm450_vm13, %v524_v33, -inf }
 0x3c7   :  { %3013 = vmatpush.xpose.msk.msra.mxu1 %vm450_vm13, %v1067_v13  ;;  %535 = vmax.xlane.f32.xlu1 %v534_v34 }
 0x3c9   :  { %v1026_v35 = vpop.permute.xlu1 %1025 }
 0x3ca   :  { %v1065_v36 = vpop.permute.xlu0 %1064  ;;  %3003 = vmatmul.msk.f32.gmra.mxu1 %vm450_vm13, %v869_v8  ;;  %3011 = vmatmul.msk.f32.gmra.mxu0 %vm450_vm13, %v1026_v35 }
 0x3d1   :  { %v1063_v37 = vpop.permute.xlu1 %1062 }
 0x3d2   :  { %v3116_v40 = vpop.permute.xlu0 %3115  ;;  %3014 = vmatmul.msk.f32.vlgmr.msra.gmra.mxu1 %vm450_vm13, %v1063_v37 }
 0x3d3   :  { %v3117_v5 = vunpack.i.l.bf16 %v3116_v40  ;;  %v3118_v41 = vunpack.i.h.bf16 %v3116_v40 }
 0x3d5   :  { %781 = vmatpush.msra.mxu2 %v3117_v5 }
 0x3d7   :  { %782 = vmatpush.msra.mxu2 %v3118_v41 }
 0x3da   :  { %3015 = vmatmul.msk.f32.gmra.mxu1 %vm450_vm13, %v1065_v36 }
 0x41e   :  { %v660_v42 = vpop.f32.mrf.mxu0 }
 0x41f   :  { %v3787_v38 = vmul.f32 0.25, %v660_v42 }
 0x421   :  { %v709_v44 = vsel %vm450_vm13, %v3787_v38, -inf }
 0x422   :  { %v527_v45 = vpop.xlane.xlu2 %526  ;;  %710 = vmax.xlane.f32.xlu2 %v709_v44 }
 0x423   :  { %v537_v46 = vsub.f32 %v521_v11, %v527_v45 }
 0x425   :  { %v541_v47 = vmul.f32 1.442695, %v537_v46 }
 0x426   :  { %v663_v48 = vpop.f32.mrf.mxu0 }
 0x427   :  { %3192 = vpow2.f32 %v541_v47  ;;  %v3791_v49 = vmul.f32 0.25, %v663_v48 }
 0x429   :  { %v712_v50 = vsel %vm450_vm13, %v3791_v49, -inf }
 0x42a   :  { %v530_v43 = vpop.xlane.xlu1 %529  ;;  %713 = vmax.xlane.f32.xlu0 %v712_v50 }
 0x42b   :  { %v538_v54 = vsub.f32 %v522_v16, %v530_v43 }
 0x42d   :  { %v3795_v53 = vpop.eup %3192  ;;  %v543_v62 = vmul.f32 1.442695, %v538_v54 }
 0x42e   :  { %v699_v56 = vpop.f32.mrf.mxu1  ;;  %v860_v58 = vpop.f32.mrf.mxu0  ;;  %v549_v59 = vsel %vm450_vm13, %v3795_v53, 0.0 }
 0x42f   :  { %v3799_v60 = vmul.f32 0.25, %v860_v58  ;;  %550 = vadd.xlane.f32.xlu2 %v549_v59  ;;  %v3803_v51 = vmul.f32 0.25, %v699_v56  ;;  %3194 = vpow2.f32 %v543_v62 }
 0x431   :  { %v909_v63 = vsel %vm450_vm13, %v3799_v60, -inf  ;;  %v715_v8 = vsel %vm450_vm13, %v3803_v51, -inf }
 0x432   :  { %910 = vmax.xlane.f32.xlu1 %v909_v63  ;;  %v533_v0 = vpop.xlane.xlu0 %532 }
 0x433   :  { %v539_v2 = vsub.f32 %v523_v24, %v533_v0 }
 0x435   :  { %v545_v4 = vmul.f32 1.442695, %v539_v2  ;;  %v3811_v12 = vpop.eup %3194 }
 0x436   :  { %v702_v6 = vpop.f32.mrf.mxu1  ;;  %v863_v7 = vpop.f32.mrf.mxu0  ;;  %v552_v14 = vsel %vm450_vm13, %v3811_v12, 0.0 }
 0x437   :  { %v3807_v9 = vmul.f32 0.25, %v702_v6  ;;  %716 = vmax.xlane.f32.xlu2 %v715_v8  ;;  %3196 = vpow2.f32 %v545_v4  ;;  %v3821_v21 = vmul.f32 0.25, %v863_v7 }
 0x439   :  { %v718_v10 = vsel %vm450_vm13, %v3807_v9, -inf  ;;  %v912_v24 = vsel %vm450_vm13, %v3821_v21, -inf }
 0x43a   :  { %v536_v11 = vpop.xlane.xlu1 %535  ;;  %719 = vmax.xlane.f32.xlu0 %v718_v10 }
 0x43b   :  { %v540_v55 = vsub.f32 %v524_v33, %v536_v11 }
 0x43d   :  { %v3813_v13 = vpop.eup %3196  ;;  %v547_v18 = vmul.f32 1.442695, %v540_v55 }
 0x43e   :  { %v1056_v16 = vpop.f32.mrf.mxu0  ;;  %v555_v20 = vsel %vm450_vm13, %v3813_v13, 0.0 }
 0x43f   :  { %553 = vadd.xlane.f32.xlu2 %v552_v14  ;;  %v899_v15 = vpop.f32.mrf.mxu1  ;;  %3198 = vpow2.f32 %v547_v18  ;;  %v3825_v23 = vmul.f32 0.25, %v1056_v16 }
 0x440   :  { %v3817_v17 = vmul.f32 0.25, %v899_v15 }
 0x441   :  { %v1105_v31 = vsel %vm450_vm13, %v3825_v23, -inf }
 0x442   :  { %556 = vadd.xlane.f32.xlu0 %v555_v20  ;;  %v915_v61 = vsel %vm450_vm13, %v3817_v17, -inf }
 0x443   :  { %916 = vmax.xlane.f32.xlu1 %v915_v61 }
 0x445   :  { %v3835_v33 = vpop.eup %3198 }
 0x446   :  { %v558_v35 = vsel %vm450_vm13, %v3835_v33, 0.0 }
 0x447   :  { %913 = vmax.xlane.f32.xlu2 %v912_v24  ;;  %v902_v27 = vpop.f32.mrf.mxu1  ;;  %v1059_v32 = vpop.f32.mrf.mxu0 }
 0x448   :  { %v3829_v30 = vmul.f32 0.25, %v902_v27  ;;  %v3837_v34 = vmul.f32 0.25, %v1059_v32 }
 0x44a   :  { %1106 = vmax.xlane.f32.xlu0 %v1105_v31  ;;  %v918_v3 = vsel %vm450_vm13, %v3829_v30, -inf  ;;  %v1108_v40 = vsel %vm450_vm13, %v3837_v34, -inf }
 0x44b   :  { %919 = vmax.xlane.f32.xlu1 %v918_v3 }
 0x44f   :  { %559 = vadd.xlane.f32.xlu2 %v558_v35  ;;  %v1095_v36 = vpop.f32.mrf.mxu1 }
 0x450   :  { %v3841_v37 = vmul.f32 0.25, %v1095_v36 }
 0x452   :  { %1109 = vmax.xlane.f32.xlu0 %v1108_v40  ;;  %v1111_v5 = vsel %vm450_vm13, %v3841_v37, -inf }
 0x453   :  { %1112 = vmax.xlane.f32.xlu1 %v1111_v5 }
 0x457   :  { %v1098_v41 = vpop.f32.mrf.mxu1 }
 0x458   :  { %v3847_v42 = vmul.f32 0.25, %v1098_v41 }
 0x45a   :  { %v1114_v44 = vsel %vm450_vm13, %v3847_v42, -inf }
 0x45b   :  { %1115 = vmax.xlane.f32.xlu1 %v1114_v44 }
 0x466   :  { %3125 = vrot.lane.b32.xlu0 %v3713_v39, %s3441_s12 }
 0x495   :  { %v711_v45 = vpop.xlane.xlu2 %710 }
 0x496   :  { %v721_v46 = vsub.f32 %v3787_v38, %v711_v45 }
 0x498   :  { %v725_v47 = vmul.f32 1.442695, %v721_v46 }
 0x49a   :  { %3200 = vpow2.f32 %v725_v47 }
 0x49d   :  { %v714_v48 = vpop.xlane.xlu0 %713 }
 0x49e   :  { %v722_v50 = vsub.f32 %v3791_v49, %v714_v48 }
 0x4a0   :  { %v3855_v43 = vpop.eup %3200  ;;  %v727_v54 = vmul.f32 1.442695, %v722_v50 }
 0x4a1   :  { %v733_v56 = vsel %vm450_vm13, %v3855_v43, 0.0 }
 0x4a2   :  { %3202 = vpow2.f32 %v727_v54  ;;  %v551_v58 = vpop.xlane.xlu2 %550  ;;  %734 = vadd.xlane.f32.xlu2 %v733_v56 }
 0x4a3   :  { %3204 = vrcp.f32 %v551_v58 }
 0x4a5   :  { %v911_v59 = vpop.xlane.xlu1 %910 }
 0x4a6   :  { %v921_v62 = vsub.f32 %v3799_v60, %v911_v59 }
 0x4a8   :  { %v3860_v63 = vpop.eup %3202  ;;  %v925_v38 = vmul.f32 1.442695, %v921_v62 }
 0x4a9   :  { %v3205_v0 = vpop.eup %3204  ;;  %v736_v49 = vsel %vm450_vm13, %v3860_v63, 0.0 }
 0x4aa   :  { %3206 = vpow2.f32 %v925_v38  ;;  %v717_v2 = vpop.xlane.xlu2 %716  ;;  %737 = vadd.xlane.f32.xlu1 %v736_v49  ;;  %v565_v4 = vmul.f32 %v3205_v0, %v3795_v53 }
 0x4ab   :  { %v723_v6 = vsub.f32 %v3803_v51, %v717_v2 }
 0x4ac   :  { %2980 = vmatmul.msk.f32.vlgmr.msrb.gmra.mxu2 %vm450_vm13, %v565_v4 }
 0x4ad   :  { %v729_v7 = vmul.f32 1.442695, %v723_v6  ;;  %v720_v8 = vpop.xlane.xlu0 %719 }
 0x4ae   :  { %v724_v60 = vsub.f32 %v3807_v9, %v720_v8 }
 0x4af   :  { %3208 = vpow2.f32 %v729_v7 }
 0x4b0   :  { %v3868_v10 = vpop.eup %3206  ;;  %v731_v11 = vmul.f32 1.442695, %v724_v60 }
 0x4b1   :  { %v933_v55 = vsel %vm450_vm13, %v3868_v10, 0.0 }
 0x4b2   :  { %3210 = vpow2.f32 %v731_v11  ;;  %v554_v14 = vpop.xlane.xlu2 %553  ;;  %934 = vadd.xlane.f32.xlu1 %v933_v55 }
 0x4b3   :  { %3212 = vrcp.f32 %v554_v14 }
 0x4b5   :  { %v3872_v53 = vpop.eup %3208  ;;  %v557_v51 = vpop.xlane.xlu0 %556 }
 0x4b6   :  { %3214 = vrcp.f32 %v557_v51  ;;  %v917_v15 = vpop.xlane.xlu1 %916  ;;  %v739_v16 = vsel %vm450_vm13, %v3872_v53, 0.0 }
 0x4b7   :  { %v923_v9 = vsub.f32 %v3817_v17, %v917_v15  ;;  %740 = vadd.xlane.f32.xlu2 %v739_v16 }
 0x4b8   :  { %v3877_v18 = vpop.eup %3210 }
 0x4b9   :  { %v3213_v20 = vpop.eup %3212  ;;  %v929_v61 = vmul.f32 1.442695, %v923_v9  ;;  %v742_v24 = vsel %vm450_vm13, %v3877_v18, 0.0 }
 0x4ba   :  { %v914_v27 = vpop.xlane.xlu2 %913  ;;  %743 = vadd.xlane.f32.xlu1 %v742_v24  ;;  %v566_v31 = vmul.f32 %v3213_v20, %v3811_v12 }
 0x4bb   :  { %3216 = vpow2.f32 %v929_v61  ;;  %v922_v32 = vsub.f32 %v3821_v21, %v914_v27 }
 0x4bc   :  { %v3215_v3 = vpop.eup %3214  ;;  %2981 = vmatmul.msk.f32.gmra.mxu2 %vm450_vm13, %v566_v31 }
 0x4bd   :  { %v927_v35 = vmul.f32 1.442695, %v922_v32  ;;  %v1107_v17 = vpop.xlane.xlu0 %1106  ;;  %v567_v36 = vmul.f32 %v3215_v3, %v3813_v13 }
 0x4be   :  { %v1117_v40 = vsub.f32 %v3825_v23, %v1107_v17  ;;  %v920_v58 = vpop.xlane.xlu1 %919 }
 0x4bf   :  { %3218 = vpow2.f32 %v927_v35  ;;  %2982 = vmatmul.msk.f32.vlgmr.msrb.gmra.mxu3 %vm450_vm13, %v567_v36 }
 0x4c0   :  { %v1121_v5 = vmul.f32 1.442695, %v1117_v40 }
 0x4c1   :  { %v3887_v41 = vpop.eup %3216 }
 0x4c2   :  { %3220 = vpow2.f32 %v1121_v5  ;;  %v560_v12 = vpop.xlane.xlu2 %559  ;;  %v939_v21 = vsel %vm450_vm13, %v3887_v41, 0.0 }
 0x4c3   :  { %940 = vadd.xlane.f32.xlu1 %v939_v21  ;;  %3222 = vrcp.f32 %v560_v12 }
 0x4c5   :  { %v3891_v44 = vpop.eup %3218  ;;  %v1110_v45 = vpop.xlane.xlu0 %1109 }
 0x4c6   :  { %v1118_v13 = vsub.f32 %v3837_v34, %v1110_v45  ;;  %v936_v23 = vsel %vm450_vm13, %v3891_v44, 0.0  ;;  %v1113_v0 = vpop.xlane.xlu1 %1112 }
 0x4c7   :  { %937 = vadd.xlane.f32.xlu0 %v936_v23 }
 0x4c8   :  { %v3896_v46 = vpop.eup %3220  ;;  %v1123_v47 = vmul.f32 1.442695, %v1118_v13 }
 0x4c9   :  { %v1129_v48 = vsel %vm450_vm13, %v3896_v46, 0.0  ;;  %v3223_v50 = vpop.eup %3222 }
 0x4ca   :  { %3224 = vpow2.f32 %v1123_v47  ;;  %v568_v54 = vmul.f32 %v3223_v50, %v3835_v33  ;;  %v924_v33 = vsub.f32 %v3829_v30, %v920_v58  ;;  %v3369_v58 = vld [vmem:[%s4811_s4 + $0x30] sm:$0xff] }
 0x4cb   :  { %1130 = vadd.xlane.f32.xlu1 %v1129_v48 }
 0x4cc   :  { %2983 = vmatmul.msk.f32.gmra.mxu3 %vm450_vm13, %v568_v54  ;;  %v931_v49 = vmul.f32 1.442695, %v924_v33 }
 0x4ce   :  { %v1116_v2 = vpop.xlane.xlu1 %1115  ;;  %3226 = vpow2.f32 %v931_v49 }
 0x4cf   :  { %3130 = vrot.lane.b32.xlu2 %v3736_v52, %s3441_s12  ;;  %v1120_v4 = vsub.f32 %v3847_v42, %v1116_v2 }
 0x4d0   :  { %v3904_v34 = vpop.eup %3224 }
 0x4d1   :  { %v1132_v56 = vsel %vm450_vm13, %v3904_v34, 0.0  ;;  %v1127_v6 = vmul.f32 1.442695, %v1120_v4 }
 0x4d2   :  { %1133 = vadd.xlane.f32.xlu0 %v1132_v56 }
 0x4d3   :  { %3228 = vpow2.f32 %v1127_v6 }
 0x4d4   :  { %v3914_v7 = vpop.eup %3226 }
 0x4d5   :  { %v942_v8 = vsel %vm450_vm13, %v3914_v7, 0.0 }
 0x4d8   :  { %v3126_v59 = vpop.permute.xlu0 %3125 }
 0x4d9   :  { %v3127_v62 = vunpack.i.l.bf16 %v3126_v59  ;;  %v3128_v38 = vunpack.i.h.bf16 %v3126_v59  ;;  %v3918_v60 = vpop.eup %3228 }
 0x4db   :  { %979 = vmatpush.msrb.mxu2 %v3127_v62  ;;  %v3371_v62 = vld [vmem:[%s4811_s4 + $0x20] sm:$0xff] }
 0x4dd   :  { %980 = vmatpush.msrb.mxu2 %v3128_v38 }
 0x4e4   :  { %3135 = vrot.lane.b32.xlu1 %v3713_v39, %s3442_s13  ;;  %v1119_v39 = vsub.f32 %v3841_v37, %v1113_v0 }
 0x4e6   :  { %3140 = vrot.lane.b32.xlu0 %v3736_v52, %s3442_s13  ;;  %v1138_v52 = vsel %vm450_vm13, %v3918_v60, 0.0  ;;  %v1125_v30 = vmul.f32 1.442695, %v1119_v39 }
 0x4e8   :  { %3230 = vpow2.f32 %v1125_v30 }
 0x4ee   :  { %v3923_v11 = vpop.eup %3230 }
 0x4ef   :  { %v1135_v42 = vsel %vm450_vm13, %v3923_v11, 0.0 }
 0x4f8   :  { %943 = vadd.xlane.f32.xlu2 %v942_v8 }
 0x500   :  { %1139 = vadd.xlane.f32.xlu2 %v1138_v52 }
 0x50e   :  { %1136 = vadd.xlane.f32.xlu1 %v1135_v42 }
 0x515   :  { %v735_v55 = vpop.xlane.xlu2 %734 }
 0x516   :  { %3232 = vrcp.f32 %v735_v55 }
 0x51c   :  { %v3233_v14 = vpop.eup %3232 }
 0x51d   :  { %v749_v51 = vmul.f32 %v3233_v14, %v3855_v43  ;;  %v738_v15 = vpop.xlane.xlu1 %737 }
 0x51e   :  { %3234 = vrcp.f32 %v738_v15 }
 0x51f   :  { %2992 = vmatmul.msk.f32.vlgmr.msra.gmra.mxu2 %vm450_vm13, %v749_v51 }
 0x524   :  { %v3235_v37 = vpop.eup %3234 }
 0x525   :  { %v935_v16 = vpop.xlane.xlu1 %934  ;;  %v750_v9 = vmul.f32 %v3235_v37, %v3860_v63 }
 0x526   :  { %3236 = vrcp.f32 %v935_v16  ;;  %v2959_v16 = vld [vmem:[%s4811_s4 + $0xf8] sm:$0xff] }
 0x527   :  { %2993 = vmatmul.msk.f32.gmra.mxu2 %vm450_vm13, %v750_v9  ;;  %v2958_v9 = vld [vmem:[%s4811_s4 + $0xf0] sm:$0xff]  ;;  %1302 = vmatpush.msra.mxu0 %v2959_v16 }
 0x529   :  { %1303 = vmatpush.msra.mxu0 %v2958_v9 }
 0x52a   :  { %v741_v20 = vpop.xlane.xlu2 %740 }
 0x52b   :  { %3238 = vrcp.f32 %v741_v20  ;;  %v2957_v20 = vld [vmem:[%s4811_s4 + $0xe8] sm:$0xff] }
 0x52c   :  { %v3237_v61 = vpop.eup %3236  ;;  %1304 = vmatpush.msra.mxu0 %v2957_v20 }
 0x52d   :  { %v949_v24 = vmul.f32 %v3237_v61, %v3868_v10  ;;  %v744_v27 = vpop.xlane.xlu1 %743  ;;  %v2956_v61 = vld [vmem:[%s4811_s4 + $0xe0] sm:$0xff] }
 0x52e   :  { %3240 = vrcp.f32 %v744_v27  ;;  %1305 = vmatpush.msra.mxu0 %v2956_v61  ;;  %v2954_v27 = vld [vmem:[%s4811_s4 + $0xd0] sm:$0xff] }
 0x52f   :  { %3004 = vmatmul.msk.f32.vlgmr.msrb.gmra.mxu2 %vm450_vm13, %v949_v24  ;;  %v3966_v4 = vpop.f32.mrf.mxu2  ;;  %v2955_v24 = vld [vmem:[%s4811_s4 + $0xd8] sm:$0xff] }
 0x530   :  { %1306 = vmatpush.msra.mxu0 %v2955_v24 }
 0x531   :  { %v3239_v43 = vpop.eup %3238 }
 0x532   :  { %v751_v31 = vmul.f32 %v3239_v43, %v3872_v53  ;;  %v3131_v32 = vpop.permute.xlu2 %3130  ;;  %v2953_v43 = vld [vmem:[%s4811_s4 + $0xc8] sm:$0xff]  ;;  %1307 = vmatpush.msra.mxu0 %v2954_v27 }
 0x533   :  { %v3132_v3 = vunpack.i.l.bf16 %v3131_v32  ;;  %v3133_v63 = vunpack.i.h.bf16 %v3131_v32  ;;  %v3372_v32 = vld [vmem:[%s4811_s4 + $0x78] sm:$0xff] }
 0x534   :  { %2994 = vmatmul.msk.f32.vlgmr.msra.gmra.mxu3 %vm450_vm13, %v751_v31  ;;  %v3241_v17 = vpop.eup %3240  ;;  %1308 = vmatpush.msra.mxu0 %v2953_v43  ;;  %v2952_v31 = vld [vmem:[%s4811_s4 + $0xc0] sm:$0xff] }
 0x535   :  { %1014 = vmatpush.msrb.mxu3 %v3132_v3  ;;  %v752_v10 = vmul.f32 %v3241_v17, %v3877_v18  ;;  %v3373_v3 = vld [vmem:[%s4811_s4 + $0x70] sm:$0xff]  ;;  %v3376_v17 = vld [vmem:[%s4811_s4 + $0x58] sm:$0xff] }
 0x536   :  { %v941_v35 = vpop.xlane.xlu1 %940  ;;  %1309 = vmatpush.msra.mxu0 %v2952_v31 }
 0x537   :  { %1015 = vmatpush.msrb.mxu3 %v3133_v63  ;;  %3242 = vrcp.f32 %v941_v35  ;;  %v3374_v63 = vld [vmem:[%s4811_s4 + $0x68] sm:$0xff]  ;;  %v3375_v35 = vld [vmem:[%s4811_s4 + $0x60] sm:$0xff] }
 0x538   :  { %1684 = vmatpush.msrb.mxu0 %v3372_v32 }
 0x53a   :  { %v938_v36 = vpop.xlane.xlu0 %937  ;;  %1685 = vmatpush.msrb.mxu0 %v3373_v3 }
 0x53b   :  { %3244 = vrcp.f32 %v938_v36  ;;  %v3377_v36 = vld [vmem:[%s4811_s4 + $0x50] sm:$0xff] }
 0x53c   :  { %2995 = vmatmul.msk.f32.gmra.mxu3 %vm450_vm13, %v752_v10  ;;  %1686 = vmatpush.msrb.mxu0 %v3374_v63  ;;  %v3378_v10 = vld [vmem:[%s4811_s4 + $0x48] sm:$0xff] }
 0x53d   :  { %v3243_v40 = vpop.eup %3242 }
 0x53e   :  { %v951_v53 = vmul.f32 %v3243_v40, %v3887_v41  ;;  %v1131_v21 = vpop.xlane.xlu1 %1130  ;;  %1687 = vmatpush.msrb.mxu0 %v3375_v35 }
 0x53f   :  { %3246 = vrcp.f32 %v1131_v21 }
 0x540   :  { %1688 = vmatpush.msrb.mxu0 %v3376_v17 }
 0x541   :  { %v3245_v5 = vpop.eup %3244 }
 0x542   :  { %v950_v12 = vmul.f32 %v3245_v5, %v3891_v44  ;;  %v3368_v44 = vld [vmem:[%s4811_s4 + $0x38] sm:$0xff]  ;;  %1689 = vmatpush.msrb.mxu0 %v3377_v36  ;;  %v3379_v5 = vld [vmem:[%s4811_s4 + $0x40] sm:$0xff] }
 0x544   :  { %3005 = vmatmul.msk.f32.gmra.mxu2 %vm450_vm13, %v950_v12  ;;  %3006 = vmatmul.msk.f32.vlgmr.msrb.gmra.mxu3 %vm450_vm13, %v951_v53 }
 0x545   :  { %v1134_v45 = vpop.xlane.xlu0 %1133  ;;  %v3247_v23 = vpop.eup %3246  ;;  %1690 = vmatpush.msrb.mxu0 %v3378_v10 }
 0x546   :  { %3248 = vrcp.f32 %v1134_v45  ;;  %v1145_v54 = vmul.f32 %v3247_v23, %v3896_v46  ;;  %v3370_v46 = vld [vmem:[%s4811_s4 + $0x28] sm:$0xff] }
 0x547   :  { %1691 = vmatpush.msrb.mxu0 %v3379_v5 }
 0x54c   :  { %v3249_v56 = vpop.eup %3248 }
 0x54d   :  { %v1146_v59 = vmul.f32 %v3249_v56, %v3904_v34 }
 0x556   :  { %v3136_v13 = vpop.permute.xlu1 %3135 }
 0x557   :  { %v3137_v47 = vunpack.i.l.bf16 %v3136_v13  ;;  %v3138_v48 = vunpack.i.h.bf16 %v3136_v13 }
 0x558   :  { %v3141_v18 = vpop.permute.xlu0 %3140 }
 0x559   :  { %v3142_v50 = vunpack.i.l.bf16 %v3141_v18  ;;  %1175 = vmatpush.msra.mxu2 %v3137_v47  ;;  %v3143_v41 = vunpack.i.h.bf16 %v3141_v18 }
 0x55b   :  { %1176 = vmatpush.msra.mxu2 %v3138_v48  ;;  %1210 = vmatpush.msra.mxu3 %v3142_v50 }
 0x55c   :  { %3016 = vmatmul.msk.f32.vlgmr.msra.gmra.mxu2 %vm450_vm13, %v1145_v54 }
 0x55d   :  { %1211 = vmatpush.msra.mxu3 %v3143_v41 }
 0x55f   :  { %1655 = vmatpush.msrb.mxu3 %v3368_v44 }
 0x561   :  { %1656 = vmatpush.msrb.mxu3 %v3369_v58 }
 0x563   :  { %1657 = vmatpush.msrb.mxu3 %v3370_v46 }
 0x564   :  { %3017 = vmatmul.msk.f32.gmra.mxu2 %vm450_vm13, %v1146_v59 }
 0x565   :  { %1658 = vmatpush.msrb.mxu3 %v3371_v62 }
 0x567   :  { %1659 = vmatpush.msrb.mxu3 %v3625_v19 }
 0x569   :  { %1660 = vmatpush.msrb.mxu3 %v3637_v22 }
 0x56b   :  { %1661 = vmatpush.msrb.mxu3 %v3649_v26  ;;  %v944_v38 = vpop.xlane.xlu2 %943 }
 0x56c   :  { %3250 = vrcp.f32 %v944_v38 }
 0x56d   :  { %1662 = vmatpush.msrb.mxu3 %v3661_v29  ;;  %v3969_v29 = vpop.f32.mrf.mxu2 }
 0x572   :  { %v3251_v34 = vpop.eup %3250 }
 0x573   :  { %v952_v0 = vmul.f32 %v3251_v34, %v3914_v7  ;;  %v1140_v49 = vpop.xlane.xlu2 %1139  ;;  %v3972_v7 = vpop.f32.mrf.mxu3 }
 0x575   :  { %3007 = vmatmul.msk.f32.gmra.mxu3 %vm450_vm13, %v952_v0 }
 0x57b   :  { %v3975_v39 = vpop.f32.mrf.mxu3 }
 0x581   :  { %v1137_v33 = vpop.xlane.xlu1 %1136 }
 0x582   :  { %3252 = vrcp.f32 %v1137_v33 }
 0x583   :  { %3254 = vrcp.f32 %v1140_v49 }
 0x588   :  { %v3253_v2 = vpop.eup %3252 }
 0x589   :  { %v1147_v19 = vmul.f32 %v3253_v2, %v3923_v11  ;;  %v3255_v22 = vpop.eup %3254  ;;  %v4058_v2 = vld [vmem:[%s4808_s1] sm:$0xff] }
 0x58a   :  { %v1148_v26 = vmul.f32 %v3255_v22, %v3918_v60 }
 0x58b   :  { %3018 = vmatmul.msk.f32.vlgmr.msra.gmra.mxu3 %vm450_vm13, %v1147_v19  ;;  %v4061_v19 = vperm.slane %v4058_v2, 6 }
 0x593   :  { %3019 = vmatmul.msk.f32.gmra.mxu3 %vm450_vm13, %v1148_v26 }
 0x5a2   :  { %v784_v6 = vpop.f32.mrf.mxu2 }
 0x5a3   :  { %1223 = vrot.lane.b32.xlu0 %v784_v6, %s3443_s21 }
 0x5aa   :  { %v787_v8 = vpop.f32.mrf.mxu2 }
 0x5ab   :  { %1225 = vrot.lane.b32.xlu1 %v787_v8, %s3443_s21 }
 0x5b2   :  { %v982_v52 = vpop.f32.mrf.mxu2 }
 0x5b3   :  { %1239 = vrot.lane.b32.xlu2 %v982_v52, %s3444_s22 }
 0x5b7   :  { %v821_v60 = vpop.f32.mrf.mxu3 }
 0x5bb   :  { %1227 = vrot.lane.b32.xlu2 %v821_v60, %s3443_s21 }
 0x5bf   :  { %v824_v30 = vpop.f32.mrf.mxu3 }
 0x5c0   :  { %1229 = vrot.lane.b32.xlu1 %v824_v30, %s3443_s21 }
 0x5c7   :  { %v985_v11 = vpop.f32.mrf.mxu2  ;;  %v1017_v14 = vpop.f32.mrf.mxu3 }
 0x5c8   :  { %1241 = vrot.lane.b32.xlu0 %v985_v11, %s3444_s22 }
 0x5df   :  { %v1178_v42 = vpop.f32.mrf.mxu2 }
 0x5e0   :  { %1255 = vrot.lane.b32.xlu0 %v1178_v42, %s3445_s23 }
 0x5e7   :  { %v1181_v55 = vpop.f32.mrf.mxu2 }
 0x5e8   :  { %1257 = vrot.lane.b32.xlu0 %v1181_v55, %s3445_s23 }
 0x5f0   :  { %1243 = vrot.lane.b32.xlu0 %v1017_v14, %s3444_s22 }
 0x5f8   :  { %v1020_v51 = vpop.f32.mrf.mxu3 }
 0x5f9   :  { %1245 = vrot.lane.b32.xlu0 %v1020_v51, %s3444_s22 }
 0x60d   :  { %v1240_v21 = vpop.permute.xlu2 %1239 }
 0x60e   :  { %v1213_v15 = vpop.f32.mrf.mxu3 }
 0x60f   :  { %1259 = vrot.lane.b32.xlu2 %v1213_v15, %s3445_s23 }
 0x615   :  { %v1224_v40 = vpop.permute.xlu0 %1223  ;;  %v1228_v41 = vpop.permute.xlu2 %1227 }
 0x616   :  { %v1216_v37 = vpop.f32.mrf.mxu3  ;;  %v1267_v12 = vsel %vm450_vm13, %v3966_v4, %v1224_v40  ;;  %v1269_v56 = vsel %vm450_vm13, %v3972_v7, %v1228_v41 }
 0x617   :  { %1261 = vrot.lane.b32.xlu2 %v1216_v37, %s3445_s23  ;;  %v1272_v45 = vsel %vm1271_vm14, %v1267_v12, %v1240_v21  ;;  %v4098_v12 = vld [vmem:[%s4812_s5 + $0x38] sm:$0xff]  ;;  %v4104_v21 = vld [vmem:[%s4812_s5 + $0x30] sm:$0xff] }
 0x618   :  { %1446 = vmatpush.msrb.mxu1 %v4098_v12 }
 0x61a   :  { %1447 = vmatpush.msrb.mxu1 %v4104_v21 }
 0x61d   :  { %v1226_v47 = vpop.permute.xlu1 %1225 }
 0x61e   :  { %v1268_v18 = vsel %vm450_vm13, %v3969_v29, %v1226_v47  ;;  %v4128_v47 = vld [vmem:[%s4812_s5 + $0x10] sm:$0xff] }
 0x632   :  { %v1230_v62 = vpop.permute.xlu1 %1229 }
 0x633   :  { %v1270_v34 = vsel %vm450_vm13, %v3975_v39, %v1230_v62  ;;  %v3386_v62 = vld [vmem:[%s4811_s4 + $0x90] sm:$0xff] }
 0x63a   :  { %v1242_v53 = vpop.permute.xlu0 %1241 }
 0x63b   :  { %v1273_v48 = vsel %vm1271_vm14, %v1268_v18, %v1242_v53  ;;  %v4134_v18 = vld [vmem:[%s4812_s5 + $0x8] sm:$0xff] }
 0x652   :  { %v1256_v13 = vpop.permute.xlu0 %1255 }
 0x653   :  { %v1277_v23 = vsel %vm1276_vm15, %v1272_v45, %v1256_v13  ;;  %v4110_v45 = vld [vmem:[%s4812_s5 + $0x28] sm:$0xff]  ;;  %v4116_v13 = vld [vmem:[%s4812_s5 + $0x20] sm:$0xff] }
 0x654   :  { %3020 = vmatmul.msk.f32.vlgmr.msra.gmra.mxu0 %vm81_vm2, %v1277_v23  ;;  %1448 = vmatpush.msrb.mxu1 %v4110_v45 }
 0x656   :  { %1449 = vmatpush.msrb.mxu1 %v4116_v13 }
 0x65a   :  { %v1258_v50 = vpop.permute.xlu0 %1257 }
 0x65b   :  { %v1278_v54 = vsel %vm1276_vm15, %v1273_v48, %v1258_v50  ;;  %v4140_v48 = vld [vmem:[%s4812_s5] sm:$0xff]  ;;  %v3381_v50 = vld [vmem:[%s4811_s4 + $0xb8] sm:$0xff] }
 0x65c   :  { %3021 = vmatmul.msk.f32.gmra.mxu0 %vm81_vm2, %v1278_v54 }
 0x662   :  { %v1244_v44 = vpop.permute.xlu0 %1243 }
 0x663   :  { %v1274_v58 = vsel %vm1271_vm14, %v1269_v56, %v1244_v44  ;;  %v3383_v56 = vld [vmem:[%s4811_s4 + $0xa8] sm:$0xff] }
 0x669   :  { %v1260_v59 = vpop.permute.xlu2 %1259 }
 0x66a   :  { %v1279_v46 = vsel %vm1276_vm15, %v1274_v58, %v1260_v59  ;;  %v3384_v59 = vld [vmem:[%s4811_s4 + $0xa0] sm:$0xff] }
 0x66b   :  { %3022 = vmatmul.msk.f32.gmra.mxu0 %vm81_vm2, %v1279_v46  ;;  %v1246_v38 = vpop.permute.xlu0 %1245 }
 0x66c   :  { %v1275_v0 = vsel %vm1271_vm14, %v1270_v34, %v1246_v38 }
 0x671   :  { %v1262_v33 = vpop.permute.xlu2 %1261 }
 0x672   :  { %v1280_v49 = vsel %vm1276_vm15, %v1275_v0, %v1262_v33  ;;  %v3387_v0 = vld [vmem:[%s4811_s4 + $0x88] sm:$0xff] }
 0x673   :  { %3023 = vmatmul.msk.f32.gmra.mxu0 %vm81_vm2, %v1280_v49 }
 0x6d1   :  { %v1311_v22 = vpop.f32.mrf.mxu0 }
 0x6d2   :  { %v1312_v26 = vadd.f32 %v1311_v22, %v4061_v19  ;;  %v3388_v22 = vld [vmem:[%s4811_s4 + $0x80] sm:$0xff] }
 0x6d4   :  { %v1323_v4 = vadd.f32 %v1312_v26, %v1277_v23  ;;  %v4122_v23 = vld [vmem:[%s4812_s5 + $0x18] sm:$0xff] }
 0x6d5   :  { %1450 = vmatpush.msrb.mxu1 %v4122_v23 }
 0x6d6   :  { %v1327_v29 = vsel %vm81_vm2, %v1323_v4, 0.0 }
 0x6d7   :  { %1328 = vadd.xlane.f32.xlu1 %v1327_v29  ;;  %1451 = vmatpush.msrb.mxu1 %v4128_v47 }
 0x6d9   :  { %v1314_v6 = vpop.f32.mrf.mxu0  ;;  %1452 = vmatpush.msrb.mxu1 %v4134_v18 }
 0x6da   :  { %v1315_v7 = vadd.f32 %v1314_v6, %v4061_v19  ;;  %v4170_v6 = vperm.slane %v4058_v2, 7 }
 0x6db   :  { %1453 = vmatpush.msrb.mxu1 %v4140_v48 }
 0x6dc   :  { %v1324_v8 = vadd.f32 %v1315_v7, %v1278_v54  ;;  %v3382_v54 = vld [vmem:[%s4811_s4 + $0xb0] sm:$0xff]  ;;  %v4175_v7 = vld [vmem:[%s4808_s1 + $0x8] sm:$0x1f] }
 0x6dd   :  { %1713 = vmatpush.msra.mxu1 %v3381_v50 }
 0x6de   :  { %v1330_v39 = vsel %vm81_vm2, %v1324_v8, 0.0 }
 0x6df   :  { %1331 = vadd.xlane.f32.xlu0 %v1330_v39  ;;  %1714 = vmatpush.msra.mxu1 %v3382_v54 }
 0x6e1   :  { %1715 = vmatpush.msra.mxu1 %v3383_v56 }
 0x6e3   :  { %1716 = vmatpush.msra.mxu1 %v3384_v59 }
 0x6e8   :  { %v1317_v52 = vpop.f32.mrf.mxu0 }
 0x6e9   :  { %v1318_v60 = vadd.f32 %v1317_v52, %v4061_v19 }
 0x6eb   :  { %v1325_v30 = vadd.f32 %v1318_v60, %v1279_v46  ;;  %v3385_v46 = vld [vmem:[%s4811_s4 + $0x98] sm:$0xff] }
 0x6ec   :  { %1717 = vmatpush.msra.mxu1 %v3385_v46 }
 0x6ed   :  { %v1333_v11 = vsel %vm81_vm2, %v1325_v30, 0.0 }
 0x6ee   :  { %1334 = vadd.xlane.f32.xlu2 %v1333_v11  ;;  %1718 = vmatpush.msra.mxu1 %v3386_v62  ;;  %v4180_v11 = vperm.slane %v4175_v7, 0 }
 0x6f0   :  { %v1320_v42 = vpop.f32.mrf.mxu0  ;;  %1719 = vmatpush.msra.mxu1 %v3387_v0 }
 0x6f1   :  { %v1321_v55 = vadd.f32 %v1320_v42, %v4061_v19 }
 0x6f2   :  { %1720 = vmatpush.msra.mxu1 %v3388_v22 }
 0x6f3   :  { %v1326_v14 = vadd.f32 %v1321_v55, %v1280_v49 }
 0x6f5   :  { %v1336_v51 = vsel %vm81_vm2, %v1326_v14, 0.0 }
 0x6f6   :  { %1337 = vadd.xlane.f32.xlu1 %v1336_v51 }
 0x74a   :  { %v1329_v15 = vpop.xlane.xlu1 %1328 }
 0x74b   :  { %v1339_v37 = vmul.f32 %v1329_v15, %v3514_v25 }
 0x74d   :  { %v4072_v16 = vsub.f32 %v1323_v4, %v1339_v37 }
 0x74f   :  { %v1347_v9 = vmul.f32 %v4072_v16, %v4072_v16 }
 0x751   :  { %v1351_v20 = vsel %vm81_vm2, %v1347_v9, 0.0 }
 0x752   :  { %1352 = vadd.xlane.f32.xlu0 %v1351_v20  ;;  %v1332_v61 = vpop.xlane.xlu0 %1331 }
 0x753   :  { %v1340_v24 = vmul.f32 %v1332_v61, %v3514_v25  ;;  %v346_v61 = vld [vmem:[%s4813_s6 + $0x70] sm:$0xff] }
 0x755   :  { %v4078_v27 = vsub.f32 %v1324_v8, %v1340_v24 }
 0x757   :  { %v1348_v43 = vmul.f32 %v4078_v27, %v4078_v27 }
 0x759   :  { %v1354_v31 = vsel %vm81_vm2, %v1348_v43, 0.0  ;;  %v345_v43 = vld [vmem:[%s4813_s6 + $0x68] sm:$0xff] }
 0x75a   :  { %1355 = vadd.xlane.f32.xlu2 %v1354_v31  ;;  %v1369_v31 = vmul.f32 %v4170_v6, %v4078_v27 }
 0x761   :  { %v1335_v32 = vpop.xlane.xlu2 %1334 }
 0x762   :  { %v1341_v3 = vmul.f32 %v1335_v32, %v3514_v25 }
 0x764   :  { %v4084_v63 = vsub.f32 %v1325_v30, %v1341_v3  ;;  %v1368_v30 = vmul.f32 %v4170_v6, %v4072_v16  ;;  %v347_v16 = vld [vmem:[%s4813_s6 + $0x78] sm:$0xff]  ;;  %v344_v3 = vld [vmem:[%s4813_s6 + $0x60] sm:$0xff] }
 0x765   :  { %1504 = vmatpush.msrb.mxu2 %v347_v16 }
 0x766   :  { %v1349_v35 = vmul.f32 %v4084_v63, %v4084_v63  ;;  %v1370_v59 = vmul.f32 %v4170_v6, %v4084_v63 }
 0x767   :  { %1505 = vmatpush.msrb.mxu2 %v346_v61 }
 0x768   :  { %v1357_v17 = vsel %vm81_vm2, %v1349_v35, 0.0 }
 0x769   :  { %1358 = vadd.xlane.f32.xlu1 %v1357_v17  ;;  %v1338_v36 = vpop.xlane.xlu1 %1337  ;;  %1506 = vmatpush.msrb.mxu2 %v345_v43 }
 0x76a   :  { %v1342_v10 = vmul.f32 %v1338_v36, %v3514_v25 }
 0x76b   :  { %1507 = vmatpush.msrb.mxu2 %v344_v3 }
 0x76c   :  { %v4090_v40 = vsub.f32 %v1326_v14, %v1342_v10 }
 0x76e   :  { %v1350_v5 = vmul.f32 %v4090_v40, %v4090_v40  ;;  %v1371_v22 = vmul.f32 %v4170_v6, %v4090_v40  ;;  %v341_v40 = vld [vmem:[%s4813_s6 + $0x48] sm:$0xff] }
 0x770   :  { %v1360_v53 = vsel %vm81_vm2, %v1350_v5, 0.0 }
 0x771   :  { %1361 = vadd.xlane.f32.xlu0 %v1360_v53 }
 0x7c5   :  { %v1353_v41 = vpop.xlane.xlu0 %1352 }
 0x7c6   :  { %v1363_v44 = vmul.f32 %v1353_v41, %v3514_v25 }
 0x7c8   :  { %v1372_v58 = vadd.f32 1e-12, %v1363_v44 }
 0x7ca   :  { %3256 = vrsqrt.f32 %v1372_v58  ;;  %vm1382_vm1 = vweird.f32 %v1372_v58 }
 0x7cd   :  { %v1356_v38 = vpop.xlane.xlu2 %1355 }
 0x7ce   :  { %v1364_v34 = vmul.f32 %v1356_v38, %v3514_v25 }
 0x7d0   :  { %v3257_v33 = vpop.eup %3256  ;;  %v1373_v49 = vadd.f32 1e-12, %v1364_v34 }
 0x7d1   :  { %v1377_v26 = vmul.f32 %v3257_v33, %v1372_v58  ;;  %vm1383_vm0 = vweird.f32 %v3257_v33 }
 0x7d2   :  { %3258 = vrsqrt.f32 %v1373_v49  ;;  %vm1384_vm3 = vmor %vm1382_vm1, %vm1383_vm0  ;;  %vm1392_vm5 = vweird.f32 %v1373_v49 }
 0x7d3   :  { %v1378_v4 = vmul.f32 %v3257_v33, %v1377_v26 }
 0x7d5   :  { %v1379_v29 = vmul.f32 0.5, %v1378_v4 }
 0x7d7   :  { %v1380_v8 = vsub.f32 1.5, %v1379_v29  ;;  %v343_v29 = vld [vmem:[%s4813_s6 + $0x58] sm:$0xff] }
 0x7d8   :  { %v3259_v39 = vpop.eup %3258  ;;  %1508 = vmatpush.msrb.mxu2 %v343_v29 }
 0x7d9   :  { %v1381_v52 = vmul.f32 %v3257_v33, %v1380_v8  ;;  %v1387_v60 = vmul.f32 %v3259_v39, %v1373_v49  ;;  %vm1393_vm4 = vweird.f32 %v3259_v39  ;;  %v342_v8 = vld [vmem:[%s4813_s6 + $0x50] sm:$0xff] }
 0x7da   :  { %vm1394_vm6 = vmor %vm1392_vm5, %vm1393_vm4  ;;  %1509 = vmatpush.msrb.mxu2 %v342_v8 }
 0x7db   :  { %v1385_v2 = vsel %vm1384_vm3, %v3257_v33, %v1381_v52  ;;  %v1388_v42 = vmul.f32 %v3259_v39, %v1387_v60  ;;  %v339_v52 = vld [vmem:[%s4813_s6 + $0x38] sm:$0xff]  ;;  %v338_v60 = vld [vmem:[%s4813_s6 + $0x30] sm:$0xff] }
 0x7dc   :  { %v1416_v55 = vmul.f32 %v1385_v2, %v1368_v30  ;;  %v1359_v14 = vpop.xlane.xlu1 %1358  ;;  %1510 = vmatpush.msrb.mxu2 %v341_v40  ;;  %v337_v30 = vld [vmem:[%s4813_s6 + $0x28] sm:$0xff]  ;;  %v336_v2 = vld [vmem:[%s4813_s6 + $0x20] sm:$0xff] }
 0x7dd   :  { %v1389_v51 = vmul.f32 0.5, %v1388_v42  ;;  %v1365_v15 = vmul.f32 %v1359_v14, %v3514_v25  ;;  %v335_v42 = vld [vmem:[%s4813_s6 + $0x18] sm:$0xff]  ;;  %v333_v14 = vld [vmem:[%s4813_s6 + $0x8] sm:$0xff] }
 0x7de   :  { %v4184_v37 = vadd.f32 %v4180_v11, %v1416_v55  ;;  %v334_v55 = vld [vmem:[%s4813_s6 + $0x10] sm:$0xff] }
 0x7df   :  { %v1390_v9 = vsub.f32 1.5, %v1389_v51  ;;  %v1374_v20 = vadd.f32 1e-12, %v1365_v15  ;;  %v332_v51 = vld [vmem:[%s4813_s6] sm:$0xff]  ;;  %v4259_v15 = vperm.slane %v4175_v7, 4 }
 0x7e0   :  { %3024 = vmatmul.msk.f32.vlgmr.msrb.gmra.mxu1 %vm81_vm2, %v4184_v37 }
 0x7e1   :  { %v1391_v24 = vmul.f32 %v3259_v39, %v1390_v9  ;;  %3260 = vrsqrt.f32 %v1374_v20  ;;  %vm1402_vm8 = vweird.f32 %v1374_v20 }
 0x7e3   :  { %v1395_v32 = vsel %vm1394_vm6, %v3259_v39, %v1391_v24  ;;  %v340_v39 = vld [vmem:[%s4813_s6 + $0x40] sm:$0xff] }
 0x7e4   :  { %v1362_v35 = vpop.xlane.xlu0 %1361  ;;  %v1417_v17 = vmul.f32 %v1395_v32, %v1369_v31  ;;  %1511 = vmatpush.msrb.mxu2 %v340_v39 }
 0x7e5   :  { %v1366_v36 = vmul.f32 %v1362_v35, %v3514_v25 }
 0x7e6   :  { %v4204_v10 = vadd.f32 %v4180_v11, %v1417_v17  ;;  %1512 = vmatpush.msrb.mxu2 %v339_v52 }
 0x7e7   :  { %v3261_v5 = vpop.eup %3260  ;;  %v1375_v53 = vadd.f32 1e-12, %v1366_v36 }
 0x7e8   :  { %v1397_v50 = vmul.f32 %v3261_v5, %v1374_v20  ;;  %3025 = vmatmul.msk.f32.gmra.mxu1 %vm81_vm2, %v4204_v10  ;;  %vm1403_vm7 = vweird.f32 %v3261_v5  ;;  %1513 = vmatpush.msrb.mxu2 %v338_v60 }
 0x7e9   :  { %3262 = vrsqrt.f32 %v1375_v53  ;;  %vm1404_vm9 = vmor %vm1402_vm8, %vm1403_vm7  ;;  %vm1412_vm11 = vweird.f32 %v1375_v53 }
 0x7ea   :  { %v1398_v27 = vmul.f32 %v3261_v5, %v1397_v50  ;;  %1514 = vmatpush.msrb.mxu2 %v337_v30 }
 0x7ec   :  { %v1399_v54 = vmul.f32 0.5, %v1398_v27  ;;  %1515 = vmatpush.msrb.mxu2 %v336_v2 }
 0x7ee   :  { %v1400_v41 = vsub.f32 1.5, %v1399_v54  ;;  %1516 = vmatpush.msrb.mxu2 %v335_v42 }
 0x7ef   :  { %v3263_v44 = vpop.eup %3262 }
 0x7f0   :  { %v1401_v56 = vmul.f32 %v3261_v5, %v1400_v41  ;;  %v1407_v58 = vmul.f32 %v3263_v44, %v1375_v53  ;;  %vm1413_vm10 = vweird.f32 %v3263_v44  ;;  %1517 = vmatpush.msrb.mxu2 %v334_v55 }
 0x7f1   :  { %vm1414_vm12 = vmor %vm1412_vm11, %vm1413_vm10 }
 0x7f2   :  { %v1408_v46 = vmul.f32 %v3263_v44, %v1407_v58  ;;  %v1405_v62 = vsel %vm1404_vm9, %v3261_v5, %v1401_v56  ;;  %1518 = vmatpush.msrb.mxu2 %v333_v14 }
 0x7f3   :  { %v1418_v38 = vmul.f32 %v1405_v62, %v1370_v59 }
 0x7f4   :  { %v1409_v34 = vmul.f32 0.5, %v1408_v46  ;;  %1519 = vmatpush.msrb.mxu2 %v332_v51 }
 0x7f5   :  { %v4211_v0 = vadd.f32 %v4180_v11, %v1418_v38 }
 0x7f6   :  { %v1410_v33 = vsub.f32 1.5, %v1409_v34 }
 0x7f7   :  { %3026 = vmatmul.msk.f32.gmra.mxu1 %vm81_vm2, %v4211_v0 }
 0x7f8   :  { %v1411_v49 = vmul.f32 %v3263_v44, %v1410_v33 }
 0x7fa   :  { %v1415_v63 = vsel %vm1414_vm12, %v3263_v44, %v1411_v49 }
 0x7fb   :  { %v1419_v26 = vmul.f32 %v1415_v63, %v1371_v22 }
 0x7fd   :  { %v4218_v4 = vadd.f32 %v4180_v11, %v1419_v26 }
 0x7ff   :  { %3027 = vmatmul.msk.f32.gmra.mxu1 %vm81_vm2, %v4218_v4 }
 0x85d   :  { %v1455_v9 = vpop.f32.mrf.mxu1 }
 0x85e   :  { %v1456_v20 = vadd.f32 %v1455_v9, %v4259_v15 }
 0x860   :  { %v1471_v16 = vmul.f32 0.044715, %v1456_v20  ;;  %v1467_v27 = vmul.f32 0.5, %v1456_v20 }
 0x862   :  { %v1475_v61 = vmul.f32 %v1471_v16, %v1456_v20 }
 0x864   :  { %v1479_v24 = vmul.f32 %v1475_v61, %v1456_v20 }
 0x865   :  { %v1458_v43 = vpop.f32.mrf.mxu1 }
 0x866   :  { %v1459_v31 = vadd.f32 %v1458_v43, %v4259_v15  ;;  %v1483_v32 = vadd.f32 %v1479_v24, %v1456_v20  ;;  %v4266_v20 = vperm.slane %v4175_v7, 1 }
 0x868   :  { %v1487_v3 = vmul.f32 0.7978846, %v1483_v32  ;;  %v1472_v35 = vmul.f32 0.044715, %v1459_v31  ;;  %v1468_v46 = vmul.f32 0.5, %v1459_v31 }
 0x86a   :  { %3264 = vtanh.f32 %v1487_v3  ;;  %v1476_v17 = vmul.f32 %v1472_v35, %v1459_v31 }
 0x86c   :  { %v1480_v36 = vmul.f32 %v1476_v17, %v1459_v31 }
 0x86e   :  { %v1484_v5 = vadd.f32 %v1480_v36, %v1459_v31 }
 0x870   :  { %v3265_v53 = vpop.eup %3264  ;;  %v1488_v50 = vmul.f32 0.7978846, %v1484_v5 }
 0x871   :  { %v1495_v54 = vadd.f32 1.0, %v3265_v53 }
 0x872   :  { %3266 = vtanh.f32 %v1488_v50 }
 0x873   :  { %v1499_v41 = vmul.f32 %v1495_v54, %v1467_v27 }
 0x874   :  { %v1461_v44 = vpop.f32.mrf.mxu1 }
 0x875   :  { %v1462_v56 = vadd.f32 %v1461_v44, %v4259_v15  ;;  %1520 = vmatmul.f32.vlgmr.msrb.gmra.mxu2 %v1499_v41 }
 0x877   :  { %v1473_v58 = vmul.f32 0.044715, %v1462_v56  ;;  %v1469_v30 = vmul.f32 0.5, %v1462_v56 }
 0x878   :  { %v3267_v59 = vpop.eup %3266 }
 0x879   :  { %v1496_v62 = vadd.f32 1.0, %v3267_v59  ;;  %v1477_v38 = vmul.f32 %v1473_v58, %v1462_v56 }
 0x87b   :  { %v1500_v34 = vmul.f32 %v1496_v62, %v1468_v46  ;;  %v1481_v33 = vmul.f32 %v1477_v38, %v1462_v56 }
 0x87c   :  { %v1464_v49 = vpop.f32.mrf.mxu1 }
 0x87d   :  { %v1465_v22 = vadd.f32 %v1464_v49, %v4259_v15  ;;  %1523 = vmatmul.f32.gmra.mxu2 %v1500_v34  ;;  %v1485_v63 = vadd.f32 %v1481_v33, %v1462_v56 }
 0x87f   :  { %v1489_v26 = vmul.f32 0.7978846, %v1485_v63  ;;  %v1474_v29 = vmul.f32 0.044715, %v1465_v22  ;;  %v1470_v14 = vmul.f32 0.5, %v1465_v22 }
 0x881   :  { %3268 = vtanh.f32 %v1489_v26  ;;  %v1478_v8 = vmul.f32 %v1474_v29, %v1465_v22 }
 0x883   :  { %v1482_v40 = vmul.f32 %v1478_v8, %v1465_v22 }
 0x885   :  { %v1486_v39 = vadd.f32 %v1482_v40, %v1465_v22 }
 0x887   :  { %v3269_v52 = vpop.eup %3268  ;;  %v1490_v60 = vmul.f32 0.7978846, %v1486_v39 }
 0x888   :  { %v1497_v2 = vadd.f32 1.0, %v3269_v52 }
 0x889   :  { %3270 = vtanh.f32 %v1490_v60 }
 0x88a   :  { %v1501_v42 = vmul.f32 %v1497_v2, %v1469_v30 }
 0x88c   :  { %1526 = vmatmul.f32.gmra.mxu2 %v1501_v42 }
 0x88f   :  { %v3271_v55 = vpop.eup %3270 }
 0x890   :  { %v1498_v51 = vadd.f32 1.0, %v3271_v55 }
 0x892   :  { %v1502_v9 = vmul.f32 %v1498_v51, %v1470_v14 }
 0x894   :  { %1529 = vmatmul.f32.gmra.mxu2 %v1502_v9 }
 0x8f8   :  { %v1521_v16 = vpop.f32.mrf.mxu2 }
 0x8f9   :  { %v1522_v61 = vadd.f32 %v1521_v16, %v4266_v20  ;;  %v4299_v16 = vperm.slane %v4175_v7, 2 }
 0x8fb   :  { %v1533_v24 = vadd.f32 %v1522_v61, %v4184_v37 }
 0x8fd   :  { %v1537_v43 = vsel %vm81_vm2, %v1533_v24, 0.0 }
 0x8fe   :  { %1538 = vadd.xlane.f32.xlu2 %v1537_v43 }
 0x900   :  { %v1524_v31 = vpop.f32.mrf.mxu2 }
 0x901   :  { %v1525_v32 = vadd.f32 %v1524_v31, %v4266_v20 }
 0x903   :  { %v1534_v3 = vadd.f32 %v1525_v32, %v4204_v10 }
 0x905   :  { %v1540_v35 = vsel %vm81_vm2, %v1534_v3, 0.0 }
 0x906   :  { %1541 = vadd.xlane.f32.xlu1 %v1540_v35 }
 0x90f   :  { %v1527_v17 = vpop.f32.mrf.mxu2 }
 0x910   :  { %v1528_v36 = vadd.f32 %v1527_v17, %v4266_v20 }
 0x912   :  { %v1535_v5 = vadd.f32 %v1528_v36, %v4211_v0 }
 0x914   :  { %v1543_v53 = vsel %vm81_vm2, %v1535_v5, 0.0 }
 0x915   :  { %1544 = vadd.xlane.f32.xlu0 %v1543_v53 }
 0x917   :  { %v1530_v37 = vpop.f32.mrf.mxu2 }
 0x918   :  { %v1531_v50 = vadd.f32 %v1530_v37, %v4266_v20 }
 0x91a   :  { %v1536_v27 = vadd.f32 %v1531_v50, %v4218_v4 }
 0x91c   :  { %v1546_v54 = vsel %vm81_vm2, %v1536_v27, 0.0 }
 0x91d   :  { %1547 = vadd.xlane.f32.xlu2 %v1546_v54 }
 0x971   :  { %v1539_v10 = vpop.xlane.xlu2 %1538 }
 0x972   :  { %v1549_v41 = vmul.f32 %v1539_v10, %v3514_v25 }
 0x974   :  { %v1553_v44 = vsub.f32 %v1533_v24, %v1549_v41 }
 0x976   :  { %v1557_v56 = vmul.f32 %v1553_v44, %v1553_v44  ;;  %v1578_v32 = vmul.f32 %v4299_v16, %v1553_v44 }
 0x978   :  { %v1561_v58 = vsel %vm81_vm2, %v1557_v56, 0.0 }
 0x979   :  { %v1542_v59 = vpop.xlane.xlu1 %1541  ;;  %1562 = vadd.xlane.f32.xlu1 %v1561_v58 }
 0x97a   :  { %v1550_v0 = vmul.f32 %v1542_v59, %v3514_v25 }
 0x97c   :  { %v1554_v46 = vsub.f32 %v1534_v3, %v1550_v0  ;;  %v4303_v3 = vperm.slane %v4175_v7, 3 }
 0x97e   :  { %v1558_v62 = vmul.f32 %v1554_v46, %v1554_v46  ;;  %v1579_v7 = vmul.f32 %v4299_v16, %v1554_v46 }
 0x980   :  { %v1564_v38 = vsel %vm81_vm2, %v1558_v62, 0.0 }
 0x981   :  { %1565 = vadd.xlane.f32.xlu0 %v1564_v38 }
 0x988   :  { %v1545_v4 = vpop.xlane.xlu0 %1544 }
 0x989   :  { %v1551_v34 = vmul.f32 %v1545_v4, %v3514_v25 }
 0x98b   :  { %v4285_v33 = vsub.f32 %v1535_v5, %v1551_v34 }
 0x98d   :  { %v1559_v49 = vmul.f32 %v4285_v33, %v4285_v33 }
 0x98f   :  { %v1567_v22 = vsel %vm81_vm2, %v1559_v49, 0.0 }
 0x990   :  { %v1548_v63 = vpop.xlane.xlu2 %1547  ;;  %1568 = vadd.xlane.f32.xlu2 %v1567_v22 }
 0x991   :  { %v1552_v26 = vmul.f32 %v1548_v63, %v3514_v25 }
 0x993   :  { %v4291_v29 = vsub.f32 %v1536_v27, %v1552_v26  ;;  %v1580_v26 = vmul.f32 %v4299_v16, %v4285_v33 }
 0x995   :  { %v1560_v8 = vmul.f32 %v4291_v29, %v4291_v29  ;;  %v1581_v33 = vmul.f32 %v4299_v16, %v4291_v29 }
 0x997   :  { %v1570_v40 = vsel %vm81_vm2, %v1560_v8, 0.0 }
 0x998   :  { %1571 = vadd.xlane.f32.xlu1 %v1570_v40 }
 0x9ec   :  { %v1563_v39 = vpop.xlane.xlu1 %1562 }
 0x9ed   :  { %v1573_v52 = vmul.f32 %v1563_v39, %v3514_v25 }
 0x9ef   :  { %v1582_v60 = vadd.f32 1e-12, %v1573_v52 }
 0x9f1   :  { %3272 = vrsqrt.f32 %v1582_v60  ;;  %vm1592_vm1 = vweird.f32 %v1582_v60 }
 0x9f4   :  { %v1566_v30 = vpop.xlane.xlu0 %1565 }
 0x9f5   :  { %v1574_v2 = vmul.f32 %v1566_v30, %v3514_v25 }
 0x9f7   :  { %v3273_v42 = vpop.eup %3272  ;;  %v1583_v55 = vadd.f32 1e-12, %v1574_v2 }
 0x9f8   :  { %v1587_v14 = vmul.f32 %v3273_v42, %v1582_v60  ;;  %vm1593_vm0 = vweird.f32 %v3273_v42 }
 0x9f9   :  { %3274 = vrsqrt.f32 %v1583_v55  ;;  %vm1594_vm3 = vmor %vm1592_vm1, %vm1593_vm0  ;;  %vm1602_vm5 = vweird.f32 %v1583_v55 }
 0x9fa   :  { %v1588_v51 = vmul.f32 %v3273_v42, %v1587_v14 }
 0x9fc   :  { %v1589_v9 = vmul.f32 0.5, %v1588_v51 }
 0x9fe   :  { %v1590_v61 = vsub.f32 1.5, %v1589_v9 }
 0x9ff   :  { %v3275_v24 = vpop.eup %3274 }
 0xa00   :  { %v1591_v43 = vmul.f32 %v3273_v42, %v1590_v61  ;;  %v1597_v31 = vmul.f32 %v3275_v24, %v1583_v55  ;;  %vm1603_vm4 = vweird.f32 %v3275_v24 }
 0xa01   :  { %vm1604_vm6 = vmor %vm1602_vm5, %vm1603_vm4 }
 0xa02   :  { %v1595_v35 = vsel %vm1594_vm3, %v3273_v42, %v1591_v43  ;;  %v1598_v17 = vmul.f32 %v3275_v24, %v1597_v31 }
 0xa03   :  { %v1626_v36 = vmul.f32 %v1595_v35, %v1578_v32  ;;  %v1569_v5 = vpop.xlane.xlu2 %1568 }
 0xa04   :  { %v1599_v53 = vmul.f32 0.5, %v1598_v17  ;;  %v1575_v37 = vmul.f32 %v1569_v5, %v3514_v25 }
 0xa05   :  { %v1631_v50 = vadd.f32 %v4303_v3, %v1626_v36 }
 0xa06   :  { %v1600_v27 = vsub.f32 1.5, %v1599_v53  ;;  %v1584_v54 = vadd.f32 1e-12, %v1575_v37 }
 0xa07   :  { %3028 = vmatmul.msk.f32.vlgmr.msrb.gmra.mxu3 %vm81_vm2, %v1631_v50  ;;  %3032 = vmatmul.msk.f32.vlgmr.msrb.gmra.mxu0 %vm81_vm2, %v1631_v50 }
 0xa08   :  { %v1601_v10 = vmul.f32 %v3275_v24, %v1600_v27  ;;  %3276 = vrsqrt.f32 %v1584_v54  ;;  %3036 = vmatmul.msk.f32.vlgmr.msra.gmra.mxu1 %vm81_vm2, %v1631_v50  ;;  %vm1612_vm8 = vweird.f32 %v1584_v54 }
 0xa0a   :  { %v1605_v41 = vsel %vm1604_vm6, %v3275_v24, %v1601_v10 }
 0xa0b   :  { %v1572_v44 = vpop.xlane.xlu1 %1571  ;;  %v1627_v56 = vmul.f32 %v1605_v41, %v1579_v7 }
 0xa0c   :  { %v1576_v58 = vmul.f32 %v1572_v44, %v3514_v25 }
 0xa0d   :  { %v1632_v59 = vadd.f32 %v4303_v3, %v1627_v56 }
 0xa0e   :  { %v3277_v0 = vpop.eup %3276  ;;  %v1585_v62 = vadd.f32 1e-12, %v1576_v58 }
 0xa0f   :  { %v1607_v38 = vmul.f32 %v3277_v0, %v1584_v54  ;;  %3029 = vmatmul.msk.f32.gmra.mxu3 %vm81_vm2, %v1632_v59  ;;  %3033 = vmatmul.msk.f32.gmra.mxu0 %vm81_vm2, %v1632_v59  ;;  %vm1613_vm7 = vweird.f32 %v3277_v0 }
 0xa10   :  { %3278 = vrsqrt.f32 %v1585_v62  ;;  %3037 = vmatmul.msk.f32.gmra.mxu1 %vm81_vm2, %v1632_v59  ;;  %vm1614_vm9 = vmor %vm1612_vm8, %vm1613_vm7  ;;  %vm1622_vm11 = vweird.f32 %v1585_v62 }
 0xa11   :  { %v1608_v4 = vmul.f32 %v3277_v0, %v1607_v38 }
 0xa13   :  { %v1609_v46 = vmul.f32 0.5, %v1608_v4 }
 0xa15   :  { %v1610_v34 = vsub.f32 1.5, %v1609_v46 }
 0xa16   :  { %v3279_v49 = vpop.eup %3278 }
 0xa17   :  { %v1611_v22 = vmul.f32 %v3277_v0, %v1610_v34  ;;  %v1617_v63 = vmul.f32 %v3279_v49, %v1585_v62  ;;  %vm1623_vm10 = vweird.f32 %v3279_v49 }
 0xa18   :  { %vm1624_vm12 = vmor %vm1622_vm11, %vm1623_vm10 }
 0xa19   :  { %v1618_v8 = vmul.f32 %v3279_v49, %v1617_v63  ;;  %v1615_v40 = vsel %vm1614_vm9, %v3277_v0, %v1611_v22 }
 0xa1a   :  { %v1628_v39 = vmul.f32 %v1615_v40, %v1580_v26 }
 0xa1b   :  { %v1619_v52 = vmul.f32 0.5, %v1618_v8 }
 0xa1c   :  { %v1633_v60 = vadd.f32 %v4303_v3, %v1628_v39 }
 0xa1d   :  { %v1620_v30 = vsub.f32 1.5, %v1619_v52 }
 0xa1e   :  { %3030 = vmatmul.msk.f32.gmra.mxu3 %vm81_vm2, %v1633_v60  ;;  %3034 = vmatmul.msk.f32.gmra.mxu0 %vm81_vm2, %v1633_v60 }
 0xa1f   :  { %v1621_v2 = vmul.f32 %v3279_v49, %v1620_v30  ;;  %3038 = vmatmul.msk.f32.gmra.mxu1 %vm81_vm2, %v1633_v60 }
 0xa21   :  { %v1625_v42 = vsel %vm1624_vm12, %v3279_v49, %v1621_v2 }
 0xa22   :  { %v1629_v55 = vmul.f32 %v1625_v42, %v1581_v33 }
 0xa24   :  { %v1634_v14 = vadd.f32 %v4303_v3, %v1629_v55 }
 0xa26   :  { %3031 = vmatmul.msk.f32.gmra.mxu3 %vm81_vm2, %v1634_v14  ;;  %3035 = vmatmul.msk.f32.gmra.mxu0 %vm81_vm2, %v1634_v14 }
 0xa27   :  { %3039 = vmatmul.msk.f32.gmra.mxu1 %vm81_vm2, %v1634_v14 }
 0xa84   :  { %v1693_v51 = vpop.f32.mrf.mxu0 }
 0xa85   :  { %v1694_v9 = vadd.f32 %v1693_v51, %v3704_v57  ;;  %v1722_v61 = vpop.f32.mrf.mxu1  ;;  %v3389_v51 = vld [vmem:[%s4811_s4 + $0xf8] sm:$0xff] }
 0xa86   :  { %v1723_v35 = vadd.f32 %v1722_v61, %v3707_v1  ;;  %v3390_v61 = vld [vmem:[%s4811_s4 + $0xf0] sm:$0xff] }
 0xa87   :  { %1914 = vrot.lane.b32.xlu2 %v1694_v9, %s3440_s0 }
 0xa8a   :  { %v1664_v24 = vpop.f32.mrf.mxu3 }
 0xa8b   :  { %v1665_v29 = vadd.f32 %v1664_v24, %v3699_v28 }
 0xa8c   :  { %v1696_v43 = vpop.f32.mrf.mxu0 }
 0xa8d   :  { %v1697_v31 = vadd.f32 %v1696_v43, %v3704_v57  ;;  %v1725_v32 = vpop.f32.mrf.mxu1  ;;  %1910 = vrot.lane.b32.xlu1 %v1665_v29, %s3440_s0 }
 0xa8e   :  { %v1726_v17 = vadd.f32 %v1725_v32, %v3707_v1  ;;  %v3393_v32 = vld [vmem:[%s4811_s4 + $0xd8] sm:$0xff] }
 0xa8f   :  { %2114 = vrot.lane.b32.xlu2 %v1694_v9, %s3441_s12  ;;  %1916 = vrot.lane.b32.xlu0 %v1697_v31, %s3440_s0 }
 0xa90   :  { %3040 = vmatpush.xpose.msk.msra.mxu3 %vm450_vm13, %v1697_v31  ;;  %v4338_v36 = vpack.i.bf16 %v1723_v35, %v1726_v17 }
 0xa92   :  { %v1667_v5 = vpop.f32.mrf.mxu3 }
 0xa93   :  { %v1668_v27 = vadd.f32 %v1667_v5, %v3699_v28 }
 0xa94   :  { %3041 = vmatpush.xpose.msk.msra.mxu3 %vm450_vm13, %v1694_v9 }
 0xa95   :  { %2110 = vrot.lane.b32.xlu1 %v1665_v29, %s3441_s12 }
 0xa97   :  { %3042 = vmatmul.msk.f32.vlgmr.msra.gmra.mxu3 %vm450_vm13, %v1665_v29  ;;  %2116 = vrot.lane.b32.xlu0 %v1697_v31, %s3441_s12 }
 0xa98   :  { %1872 = vmatpush.msrb.mxu3 %v1726_v17 }
 0xa9a   :  { %1873 = vmatpush.msrb.mxu3 %v1723_v35  ;;  %v3394_v35 = vld [vmem:[%s4811_s4 + $0xd0] sm:$0xff] }
 0xa9b   :  { %v1699_v53 = vpop.f32.mrf.mxu0 }
 0xa9c   :  { %v1700_v37 = vadd.f32 %v1699_v53, %v3704_v57  ;;  %v1728_v50 = vpop.f32.mrf.mxu1  ;;  %v3395_v53 = vld [vmem:[%s4811_s4 + $0xc8] sm:$0xff] }
 0xa9d   :  { %v1729_v41 = vadd.f32 %v1728_v50, %v3707_v1 }
 0xa9e   :  { %1953 = vrot.lane.b32.xlu1 %v1700_v37, %s3440_s0 }
 0xa9f   :  { %3043 = vmatmul.msk.f32.gmra.mxu3 %vm450_vm13, %v1668_v27  ;;  %1912 = vrot.lane.b32.xlu0 %v1668_v27, %s3440_s0 }
 0xaa1   :  { %v1670_v56 = vpop.f32.mrf.mxu3 }
 0xaa3   :  { %v1702_v54 = vpop.f32.mrf.mxu0 }
 0xaa4   :  { %v1703_v10 = vadd.f32 %v1702_v54, %v3704_v57  ;;  %v1731_v7 = vpop.f32.mrf.mxu1  ;;  %v1671_v57 = vadd.f32 %v1670_v56, %v3699_v28  ;;  %v3396_v54 = vld [vmem:[%s4811_s4 + $0xc0] sm:$0xff] }
 0xaa5   :  { %v1732_v44 = vadd.f32 %v1731_v7, %v3707_v1 }
 0xaa6   :  { %1955 = vrot.lane.b32.xlu2 %v1703_v10, %s3440_s0  ;;  %3044 = vmatpush.xpose.msk.msra.mxu2 %vm450_vm13, %v1703_v10 }
 0xaa7   :  { %1901 = vmatpush.msra.mxu0 %v1732_v44  ;;  %2155 = vrot.lane.b32.xlu1 %v1703_v10, %s3441_s12  ;;  %v4355_v58 = vpack.i.bf16 %v1729_v41, %v1732_v44 }
 0xaa8   :  { %2112 = vrot.lane.b32.xlu0 %v1668_v27, %s3441_s12 }
 0xaa9   :  { %1902 = vmatpush.msra.mxu0 %v1729_v41  ;;  %v1673_v1 = vpop.f32.mrf.mxu3 }
 0xaaa   :  { %3045 = vmatpush.xpose.msk.msra.mxu2 %vm450_vm13, %v1700_v37  ;;  %v1674_v59 = vadd.f32 %v1673_v1, %v3699_v28 }
 0xaad   :  { %3046 = vmatmul.msk.f32.vlgmr.msra.gmra.mxu2 %vm450_vm13, %v1671_v57 }
 0xaae   :  { %2312 = vrot.lane.b32.xlu2 %v1697_v31, %s3442_s13  ;;  %v3392_v31 = vld [vmem:[%s4811_s4 + $0xe0] sm:$0xff] }
 0xaaf   :  { %2310 = vrot.lane.b32.xlu1 %v1694_v9, %s3442_s13 }
 0xab0   :  { %1949 = vrot.lane.b32.xlu0 %v1671_v57, %s3440_s0 }
 0xab5   :  { %3047 = vmatmul.msk.f32.gmra.mxu2 %vm450_vm13, %v1674_v59 }
 0xab6   :  { %1951 = vrot.lane.b32.xlu2 %v1674_v59, %s3440_s0 }
 0xab7   :  { %2151 = vrot.lane.b32.xlu1 %v1674_v59, %s3441_s12 }
 0xab8   :  { %2153 = vrot.lane.b32.xlu0 %v1700_v37, %s3441_s12 }
 0xabe   :  { %2149 = vrot.lane.b32.xlu2 %v1671_v57, %s3441_s12 }
 0xabf   :  { %2349 = vrot.lane.b32.xlu1 %v1700_v37, %s3442_s13 }
 0xac0   :  { %2306 = vrot.lane.b32.xlu0 %v1665_v29, %s3442_s13  ;;  %v3391_v29 = vld [vmem:[%s4811_s4 + $0xe8] sm:$0xff] }
 0xac6   :  { %2308 = vrot.lane.b32.xlu2 %v1668_v27, %s3442_s13 }
 0xac7   :  { %3150 = vrot.lane.b32.xlu1 %v4338_v36, %s3441_s12 }
 0xac8   :  { %2351 = vrot.lane.b32.xlu0 %v1703_v10, %s3442_s13 }
 0xace   :  { %2345 = vrot.lane.b32.xlu2 %v1671_v57, %s3442_s13 }
 0xad0   :  { %2347 = vrot.lane.b32.xlu0 %v1674_v59, %s3442_s13 }
 0xad6   :  { %3145 = vrot.lane.b32.xlu2 %v4338_v36, %s3440_s0 }
 0xad8   :  { %3155 = vrot.lane.b32.xlu0 %v4355_v58, %s3440_s0 }
 0xae1   :  { %v1915_v28 = vpop.permute.xlu2 %1914 }
 0xae9   :  { %v2115_v0 = vpop.permute.xlu2 %2114 }
 0xaff   :  { %v1911_v62 = vpop.permute.xlu1 %1910 }
 0xb00   :  { %v1956_v38 = vpop.permute.xlu2 %1955 }
 0xb01   :  { %3056 = vmatpush.xpose.msk.msrb.mxu2 %vm450_vm13, %v1956_v38  ;;  %v1917_v4 = vpop.permute.xlu0 %1916 }
 0xb02   :  { %3052 = vmatpush.xpose.msk.msrb.mxu1 %vm450_vm13, %v1917_v4 }
 0xb06   :  { %3053 = vmatpush.xpose.msk.msrb.mxu1 %vm450_vm13, %v1915_v28 }
 0xb07   :  { %v2111_v46 = vpop.permute.xlu1 %2110 }
 0xb08   :  { %v2313_v34 = vpop.permute.xlu2 %2312 }
 0xb09   :  { %3054 = vmatmul.msk.f32.vlgmr.msrb.gmra.mxu1 %vm450_vm13, %v1911_v62  ;;  %v2117_v49 = vpop.permute.xlu0 %2116 }
 0xb0a   :  { %3064 = vmatpush.xpose.msk.msra.mxu1 %vm450_vm13, %v2117_v49 }
 0xb0e   :  { %3065 = vmatpush.xpose.msk.msra.mxu1 %vm450_vm13, %v2115_v0 }
 0xb10   :  { %v1954_v22 = vpop.permute.xlu1 %1953  ;;  %v1952_v63 = vpop.permute.xlu2 %1951 }
 0xb11   :  { %3057 = vmatpush.xpose.msk.msrb.mxu2 %vm450_vm13, %v1954_v22  ;;  %v1913_v26 = vpop.permute.xlu0 %1912 }
 0xb12   :  { %3076 = vmatpush.xpose.msk.msrb.mxu1 %vm450_vm13, %v2313_v34 }
 0xb13   :  { %3055 = vmatmul.msk.f32.gmra.mxu1 %vm450_vm13, %v1913_v26 }
 0xb18   :  { %v2150_v8 = vpop.permute.xlu2 %2149 }
 0xb19   :  { %v2156_v40 = vpop.permute.xlu1 %2155 }
 0xb1a   :  { %v1763_v39 = vpop.f32.mrf.mxu3  ;;  %3068 = vmatpush.xpose.msk.msra.mxu2 %vm450_vm13, %v2156_v40  ;;  %v2113_v52 = vpop.permute.xlu0 %2112 }
 0xb1b   :  { %3066 = vmatmul.msk.f32.vlgmr.msra.gmra.mxu1 %vm450_vm13, %v2111_v46  ;;  %v4393_v60 = vmul.f32 0.25, %v1763_v39 }
 0xb1d   :  { %v1808_v30 = vsel %vm450_vm13, %v4393_v60, -inf }
 0xb1e   :  { %1809 = vmax.xlane.f32.xlu1 %v1808_v30 }
 0xb20   :  { %v2309_v2 = vpop.permute.xlu2 %2308 }
 0xb21   :  { %v2311_v33 = vpop.permute.xlu1 %2310 }
 0xb22   :  { %3077 = vmatpush.xpose.msk.msrb.mxu1 %vm450_vm13, %v2311_v33  ;;  %v1950_v42 = vpop.permute.xlu0 %1949  ;;  %v1766_v55 = vpop.f32.mrf.mxu3 }
 0xb23   :  { %v4398_v14 = vmul.f32 0.25, %v1766_v55  ;;  %3058 = vmatmul.msk.f32.vlgmr.msrb.gmra.mxu2 %vm450_vm13, %v1950_v42  ;;  %3067 = vmatmul.msk.f32.gmra.mxu1 %vm450_vm13, %v2113_v52 }
 0xb25   :  { %v1811_v9 = vsel %vm450_vm13, %v4398_v14, -inf }
 0xb26   :  { %2582 = vmatpush.msra.mxu1 %v3389_v51  ;;  %1812 = vmax.xlane.f32.xlu2 %v1811_v9 }
 0xb28   :  { %2583 = vmatpush.msra.mxu1 %v3390_v61  ;;  %v2346_v24 = vpop.permute.xlu2 %2345 }
 0xb29   :  { %v2152_v41 = vpop.permute.xlu1 %2151 }
 0xb2a   :  { %2584 = vmatpush.msra.mxu1 %v3391_v29  ;;  %v2154_v43 = vpop.permute.xlu0 %2153 }
 0xb2b   :  { %3059 = vmatmul.msk.f32.gmra.mxu2 %vm450_vm13, %v1952_v63 }
 0xb2c   :  { %2585 = vmatpush.msra.mxu1 %v3392_v31  ;;  %3069 = vmatpush.xpose.msk.msra.mxu2 %vm450_vm13, %v2154_v43 }
 0xb2e   :  { %2586 = vmatpush.msra.mxu1 %v3393_v32 }
 0xb30   :  { %2587 = vmatpush.msra.mxu1 %v3394_v35  ;;  %v1798_v17 = vpop.f32.mrf.mxu2  ;;  %v3146_v5 = vpop.permute.xlu2 %3145 }
 0xb31   :  { %v4427_v37 = vmul.f32 0.25, %v1798_v17  ;;  %v3147_v50 = vunpack.i.l.bf16 %v3146_v5  ;;  %v3148_v7 = vunpack.i.h.bf16 %v3146_v5  ;;  %v2350_v59 = vpop.permute.xlu1 %2349 }
 0xb32   :  { %2588 = vmatpush.msra.mxu1 %v3395_v53  ;;  %v2307_v27 = vpop.permute.xlu0 %2306 }
 0xb33   :  { %3070 = vmatmul.msk.f32.vlgmr.msra.gmra.mxu2 %vm450_vm13, %v2150_v8  ;;  %3078 = vmatmul.msk.f32.vlgmr.msrb.gmra.mxu1 %vm450_vm13, %v2307_v27  ;;  %v1814_v10 = vsel %vm450_vm13, %v4427_v37, -inf }
 0xb34   :  { %2589 = vmatpush.msra.mxu1 %v3396_v54  ;;  %2064 = vmatpush.msra.mxu3 %v3147_v50 }
 0xb35   :  { %1815 = vmax.xlane.f32.xlu1 %v1814_v10 }
 0xb36   :  { %2065 = vmatpush.msra.mxu3 %v3148_v7 }
 0xb38   :  { %v1801_v44 = vpop.f32.mrf.mxu2 }
 0xb39   :  { %v4436_v56 = vmul.f32 0.25, %v1801_v44 }
 0xb3a   :  { %v2352_v57 = vpop.permute.xlu0 %2351 }
 0xb3b   :  { %3071 = vmatmul.msk.f32.gmra.mxu2 %vm450_vm13, %v2152_v41  ;;  %3079 = vmatmul.msk.f32.gmra.mxu1 %vm450_vm13, %v2309_v2  ;;  %v1817_v1 = vsel %vm450_vm13, %v4436_v56, -inf }
 0xb3c   :  { %3080 = vmatpush.xpose.msk.msrb.mxu2 %vm450_vm13, %v2352_v57  ;;  %1818 = vmax.xlane.f32.xlu0 %v1817_v1 }
 0xb40   :  { %3081 = vmatpush.xpose.msk.msrb.mxu2 %vm450_vm13, %v2350_v59 }
 0xb42   :  { %v2348_v28 = vpop.permute.xlu0 %2347 }
 0xb43   :  { %3082 = vmatmul.msk.f32.vlgmr.msrb.gmra.mxu2 %vm450_vm13, %v2346_v24 }
 0xb44   :  { %2723 = vmatpush.msra.mxu2 %v4098_v12 }
 0xb46   :  { %2724 = vmatpush.msra.mxu2 %v4104_v21 }
 0xb48   :  { %2725 = vmatpush.msra.mxu2 %v4110_v45  ;;  %v4456_v45 = vpop.permute.xlu1 %3150 }
 0xb4a   :  { %2726 = vmatpush.msra.mxu2 %v4116_v13  ;;  %v3156_v0 = vpop.permute.xlu0 %3155 }
 0xb4b   :  { %v3157_v62 = vunpack.i.l.bf16 %v3156_v0  ;;  %3083 = vmatmul.msk.f32.gmra.mxu2 %vm450_vm13, %v2348_v28  ;;  %v3158_v38 = vunpack.i.h.bf16 %v3156_v0 }
 0xb4c   :  { %2727 = vmatpush.msra.mxu2 %v4122_v23 }
 0xb4d   :  { %2101 = vmatpush.msrb.mxu0 %v3157_v62 }
 0xb4e   :  { %2728 = vmatpush.msra.mxu2 %v4128_v47 }
 0xb4f   :  { %2102 = vmatpush.msrb.mxu0 %v3158_v38 }
 0xb50   :  { %2729 = vmatpush.msra.mxu2 %v4134_v18 }
 0xb52   :  { %2730 = vmatpush.msra.mxu2 %v4140_v48 }
 0xb86   :  { %v1943_v12 = vpop.f32.mrf.mxu1 }
 0xb87   :  { %v4454_v21 = vmul.f32 0.25, %v1943_v12 }
 0xb89   :  { %v1992_v13 = vsel %vm450_vm13, %v4454_v21, -inf }
 0xb8a   :  { %1993 = vmax.xlane.f32.xlu0 %v1992_v13 }
 0xb90   :  { %v1946_v23 = vpop.f32.mrf.mxu1 }
 0xb91   :  { %v4460_v4 = vmul.f32 0.25, %v1946_v23  ;;  %v1810_v47 = vpop.xlane.xlu1 %1809 }
 0xb92   :  { %v1820_v46 = vsub.f32 %v4393_v60, %v1810_v47 }
 0xb93   :  { %v1995_v18 = vsel %vm450_vm13, %v4460_v4, -inf }
 0xb94   :  { %1996 = vmax.xlane.f32.xlu2 %v1995_v18  ;;  %v1824_v48 = vmul.f32 1.442695, %v1820_v46 }
 0xb96   :  { %3280 = vpow2.f32 %v1824_v48 }
 0xb98   :  { %v2143_v34 = vpop.f32.mrf.mxu1 }
 0xb99   :  { %v4465_v49 = vmul.f32 0.25, %v2143_v34  ;;  %v1813_v22 = vpop.xlane.xlu2 %1812 }
 0xb9a   :  { %v1821_v8 = vsub.f32 %v4398_v14, %v1813_v22 }
 0xb9b   :  { %v2192_v63 = vsel %vm450_vm13, %v4465_v49, -inf }
 0xb9c   :  { %2193 = vmax.xlane.f32.xlu1 %v2192_v63  ;;  %v4469_v26 = vpop.eup %3280  ;;  %v1826_v39 = vmul.f32 1.442695, %v1821_v8 }
 0xb9d   :  { %v1832_v40 = vsel %vm450_vm13, %v4469_v26, 0.0 }
 0xb9e   :  { %1833 = vadd.xlane.f32.xlu0 %v1832_v40  ;;  %3282 = vpow2.f32 %v1826_v39 }
 0xba0   :  { %v2146_v52 = vpop.f32.mrf.mxu1 }
 0xba1   :  { %v4474_v60 = vmul.f32 0.25, %v2146_v52 }
 0xba3   :  { %v2195_v30 = vsel %vm450_vm13, %v4474_v60, -inf }
 0xba4   :  { %v4483_v51 = vpop.eup %3282 }
 0xba5   :  { %v1835_v61 = vsel %vm450_vm13, %v4483_v51, 0.0 }
 0xba6   :  { %2196 = vmax.xlane.f32.xlu0 %v2195_v30  ;;  %v1982_v2 = vpop.f32.mrf.mxu2 }
 0xba7   :  { %v4478_v33 = vmul.f32 0.25, %v1982_v2 }
 0xba8   :  { %v1816_v42 = vpop.xlane.xlu1 %1815 }
 0xba9   :  { %v1822_v55 = vsub.f32 %v4427_v37, %v1816_v42  ;;  %v1998_v14 = vsel %vm450_vm13, %v4478_v33, -inf }
 0xbaa   :  { %1999 = vmax.xlane.f32.xlu2 %v1998_v14 }
 0xbab   :  { %v1828_v9 = vmul.f32 1.442695, %v1822_v55 }
 0xbad   :  { %3284 = vpow2.f32 %v1828_v9  ;;  %v3152_v9 = vunpack.i.l.bf16 %v4456_v45 }
 0xbae   :  { %v1985_v24 = vpop.f32.mrf.mxu2  ;;  %1836 = vadd.xlane.f32.xlu0 %v1835_v61 }
 0xbaf   :  { %v4487_v29 = vmul.f32 0.25, %v1985_v24  ;;  %v1819_v43 = vpop.xlane.xlu0 %1818  ;;  %v3153_v24 = vunpack.i.h.bf16 %v4456_v45 }
 0xbb0   :  { %v2339_v31 = vpop.f32.mrf.mxu1  ;;  %v1823_v32 = vsub.f32 %v4436_v56, %v1819_v43 }
 0xbb1   :  { %v4490_v35 = vmul.f32 0.25, %v2339_v31  ;;  %v2001_v17 = vsel %vm450_vm13, %v4487_v29, -inf }
 0xbb2   :  { %v1830_v5 = vmul.f32 1.442695, %v1823_v32  ;;  %2002 = vmax.xlane.f32.xlu1 %v2001_v17 }
 0xbb3   :  { %v2388_v53 = vsel %vm450_vm13, %v4490_v35, -inf  ;;  %v4496_v37 = vpop.eup %3284 }
 0xbb4   :  { %3286 = vpow2.f32 %v1830_v5  ;;  %2389 = vmax.xlane.f32.xlu2 %v2388_v53  ;;  %v1838_v10 = vsel %vm450_vm13, %v4496_v37, 0.0 }
 0xbb6   :  { %v2182_v50 = vpop.f32.mrf.mxu2 }
 0xbb7   :  { %v4508_v56 = vmul.f32 0.25, %v2182_v50 }
 0xbb8   :  { %v2342_v27 = vpop.f32.mrf.mxu1 }
 0xbb9   :  { %v4498_v54 = vmul.f32 0.25, %v2342_v27  ;;  %v2198_v1 = vsel %vm450_vm13, %v4508_v56, -inf }
 0xbba   :  { %v4502_v7 = vpop.eup %3286  ;;  %1839 = vadd.xlane.f32.xlu1 %v1838_v10 }
 0xbbb   :  { %v2391_v41 = vsel %vm450_vm13, %v4498_v54, -inf  ;;  %v1841_v44 = vsel %vm450_vm13, %v4502_v7, 0.0 }
 0xbbc   :  { %2392 = vmax.xlane.f32.xlu2 %v2391_v41  ;;  %1842 = vadd.xlane.f32.xlu0 %v1841_v44 }
 0xbbe   :  { %v2185_v57 = vpop.f32.mrf.mxu2 }
 0xbbf   :  { %v4512_v59 = vmul.f32 0.25, %v2185_v57 }
 0xbc1   :  { %v2201_v62 = vsel %vm450_vm13, %v4512_v59, -inf }
 0xbc2   :  { %2199 = vmax.xlane.f32.xlu1 %v2198_v1 }
 0xbc6   :  { %v2378_v28 = vpop.f32.mrf.mxu2 }
 0xbc7   :  { %v4514_v0 = vmul.f32 0.25, %v2378_v28 }
 0xbc9   :  { %v2394_v38 = vsel %vm450_vm13, %v4514_v0, -inf }
 0xbca   :  { %2202 = vmax.xlane.f32.xlu1 %v2201_v62  ;;  %2395 = vmax.xlane.f32.xlu0 %v2394_v38 }
 0xbce   :  { %v2381_v12 = vpop.f32.mrf.mxu2 }
 0xbcf   :  { %v4520_v13 = vmul.f32 0.25, %v2381_v12 }
 0xbd1   :  { %v2397_v23 = vsel %vm450_vm13, %v4520_v13, -inf }
 0xbd2   :  { %2398 = vmax.xlane.f32.xlu1 %v2397_v23 }
 0xbfd   :  { %v1994_v47 = vpop.xlane.xlu0 %1993 }
 0xbfe   :  { %v2004_v46 = vsub.f32 %v4454_v21, %v1994_v47 }
 0xc00   :  { %v2008_v18 = vmul.f32 1.442695, %v2004_v46 }
 0xc02   :  { %3288 = vpow2.f32 %v2008_v18 }
 0xc07   :  { %v1997_v48 = vpop.xlane.xlu2 %1996 }
 0xc08   :  { %v2005_v34 = vsub.f32 %v4460_v4, %v1997_v48  ;;  %v4526_v22 = vpop.eup %3288 }
 0xc09   :  { %v2016_v8 = vsel %vm450_vm13, %v4526_v22, 0.0 }
 0xc0a   :  { %v2010_v63 = vmul.f32 1.442695, %v2005_v34  ;;  %2017 = vadd.xlane.f32.xlu2 %v2016_v8 }
 0xc0c   :  { %3290 = vpow2.f32 %v2010_v63 }
 0xc0f   :  { %v2194_v40 = vpop.xlane.xlu1 %2193 }
 0xc10   :  { %v2204_v39 = vsub.f32 %v4465_v49, %v2194_v40 }
 0xc11   :  { %v1834_v21 = vpop.xlane.xlu0 %1833 }
 0xc12   :  { %v4531_v52 = vpop.eup %3290  ;;  %v2208_v30 = vmul.f32 1.442695, %v2204_v39  ;;  %3292 = vrcp.f32 %v1834_v21 }
 0xc13   :  { %v2019_v2 = vsel %vm450_vm13, %v4531_v52, 0.0 }
 0xc14   :  { %3294 = vpow2.f32 %v2208_v30  ;;  %2020 = vadd.xlane.f32.xlu0 %v2019_v2 }
 0xc18   :  { %v3293_v4 = vpop.eup %3292 }
 0xc19   :  { %v1848_v55 = vmul.f32 %v3293_v4, %v4469_v26  ;;  %v2197_v14 = vpop.xlane.xlu0 %2196 }
 0xc1a   :  { %v4535_v42 = vpop.eup %3294  ;;  %v2205_v49 = vsub.f32 %v4474_v60, %v2197_v14 }
 0xc1b   :  { %v2216_v61 = vsel %vm450_vm13, %v4535_v42, 0.0  ;;  %3048 = vmatmul.msk.f32.vlgmr.msrb.gmra.mxu3 %vm450_vm13, %v1848_v55 }
 0xc1c   :  { %2217 = vadd.xlane.f32.xlu1 %v2216_v61  ;;  %v2210_v43 = vmul.f32 1.442695, %v2205_v49  ;;  %2262 = vmatpush.msrb.mxu3 %v3152_v9 }
 0xc1d   :  { %v2000_v31 = vpop.xlane.xlu2 %1999 }
 0xc1e   :  { %3296 = vpow2.f32 %v2210_v43  ;;  %2263 = vmatpush.msrb.mxu3 %v3153_v24  ;;  %v2006_v26 = vsub.f32 %v4478_v33, %v2000_v31 }
 0xc20   :  { %v2012_v32 = vmul.f32 1.442695, %v2006_v26 }
 0xc21   :  { %v1837_v17 = vpop.xlane.xlu0 %1836 }
 0xc22   :  { %3298 = vpow2.f32 %v2012_v32 }
 0xc23   :  { %3300 = vrcp.f32 %v1837_v17 }
 0xc24   :  { %v4545_v60 = vpop.eup %3296 }
 0xc25   :  { %v2003_v5 = vpop.xlane.xlu1 %2002  ;;  %v2219_v53 = vsel %vm450_vm13, %v4545_v60, 0.0 }
 0xc26   :  { %v2007_v50 = vsub.f32 %v4487_v29, %v2003_v5  ;;  %2220 = vadd.xlane.f32.xlu2 %v2219_v53 }
 0xc27   :  { %v2390_v45 = vpop.xlane.xlu2 %2389 }
 0xc28   :  { %v4550_v27 = vpop.eup %3298  ;;  %v2014_v10 = vmul.f32 1.442695, %v2007_v50  ;;  %v2400_v41 = vsub.f32 %v4490_v35, %v2390_v45 }
 0xc29   :  { %v3301_v33 = vpop.eup %3300  ;;  %v2022_v44 = vsel %vm450_vm13, %v4550_v27, 0.0 }
 0xc2a   :  { %3302 = vpow2.f32 %v2014_v10  ;;  %v2404_v57 = vmul.f32 1.442695, %v2400_v41  ;;  %2023 = vadd.xlane.f32.xlu0 %v2022_v44  ;;  %v1849_v1 = vmul.f32 %v3301_v33, %v4483_v51 }
 0xc2c   :  { %3304 = vpow2.f32 %v2404_v57  ;;  %3049 = vmatmul.msk.f32.gmra.mxu3 %vm450_vm13, %v1849_v1 }
 0xc2d   :  { %v1840_v29 = vpop.xlane.xlu1 %1839 }
 0xc2e   :  { %3306 = vrcp.f32 %v1840_v29 }
 0xc2f   :  { %v2393_v28 = vpop.xlane.xlu2 %2392  ;;  %v1843_v35 = vpop.xlane.xlu0 %1842 }
 0xc30   :  { %v4557_v62 = vpop.eup %3302  ;;  %v2401_v38 = vsub.f32 %v4498_v54, %v2393_v28  ;;  %3308 = vrcp.f32 %v1843_v35  ;;  %v3397_v28 = vld [vmem:[%s4813_s6 + $0x78] sm:$0xff] }
 0xc31   :  { %v2025_v12 = vsel %vm450_vm13, %v4557_v62, 0.0 }
 0xc32   :  { %v4562_v23 = vpop.eup %3304  ;;  %v2406_v47 = vmul.f32 1.442695, %v2401_v38  ;;  %2026 = vadd.xlane.f32.xlu0 %v2025_v12  ;;  %v3400_v12 = vld [vmem:[%s4813_s6 + $0x60] sm:$0xff] }
 0xc33   :  { %v2412_v51 = vsel %vm450_vm13, %v4562_v23, 0.0 }
 0xc34   :  { %v3307_v46 = vpop.eup %3306  ;;  %3310 = vpow2.f32 %v2406_v47  ;;  %2413 = vadd.xlane.f32.xlu1 %v2412_v51 }
 0xc35   :  { %v1850_v18 = vmul.f32 %v3307_v46, %v4496_v37  ;;  %v2200_v21 = vpop.xlane.xlu1 %2199 }
 0xc36   :  { %v3309_v54 = vpop.eup %3308 }
 0xc37   :  { %3050 = vmatmul.msk.f32.vlgmr.msra.gmra.mxu0 %vm450_vm13, %v1850_v18  ;;  %v1851_v8 = vmul.f32 %v3309_v54, %v4502_v7  ;;  %v2206_v7 = vsub.f32 %v4508_v56, %v2200_v21  ;;  %v3401_v18 = vld [vmem:[%s4813_s6 + $0x58] sm:$0xff] }
 0xc39   :  { %v2212_v2 = vmul.f32 1.442695, %v2206_v7  ;;  %v3409_v7 = vld [vmem:[%s4813_s6 + $0x18] sm:$0xff] }
 0xc3a   :  { %v4568_v48 = vpop.eup %3310 }
 0xc3b   :  { %v2415_v34 = vsel %vm450_vm13, %v4568_v48, 0.0 }
 0xc3c   :  { %2416 = vadd.xlane.f32.xlu0 %v2415_v34  ;;  %v3404_v34 = vld [vmem:[%s4813_s6 + $0x40] sm:$0xff] }
 0xc3d   :  { %v2396_v63 = vpop.xlane.xlu0 %2395 }
 0xc3e   :  { %v2402_v40 = vsub.f32 %v4514_v0, %v2396_v63  ;;  %3160 = vrot.lane.b32.xlu2 %v4338_v36, %s3442_s13  ;;  %v2203_v0 = vpop.xlane.xlu1 %2202 }
 0xc3f   :  { %3051 = vmatmul.msk.f32.gmra.mxu0 %vm450_vm13, %v1851_v8  ;;  %v2207_v36 = vsub.f32 %v4512_v59, %v2203_v0  ;;  %v3405_v8 = vld [vmem:[%s4813_s6 + $0x38] sm:$0xff] }
 0xc40   :  { %v2408_v37 = vmul.f32 1.442695, %v2402_v40  ;;  %v3406_v40 = vld [vmem:[%s4813_s6 + $0x30] sm:$0xff] }
 0xc41   :  { %v2214_v4 = vmul.f32 1.442695, %v2207_v36  ;;  %v3411_v36 = vld [vmem:[%s4813_s6 + $0x8] sm:$0xff] }
 0xc42   :  { %3312 = vpow2.f32 %v2408_v37  ;;  %v3407_v37 = vld [vmem:[%s4813_s6 + $0x28] sm:$0xff] }
 0xc43   :  { %3314 = vpow2.f32 %v2212_v2  ;;  %v3410_v2 = vld [vmem:[%s4813_s6 + $0x10] sm:$0xff] }
 0xc44   :  { %3316 = vpow2.f32 %v2214_v4  ;;  %v3412_v4 = vld [vmem:[%s4813_s6] sm:$0xff] }
 0xc46   :  { %v2399_v55 = vpop.xlane.xlu1 %2398 }
 0xc47   :  { %v2403_v9 = vsub.f32 %v4520_v13, %v2399_v55 }
 0xc48   :  { %v4577_v39 = vpop.eup %3312 }
 0xc49   :  { %v2418_v30 = vsel %vm450_vm13, %v4577_v39, 0.0  ;;  %v4587_v14 = vpop.eup %3314  ;;  %v2410_v56 = vmul.f32 1.442695, %v2403_v9 }
 0xc4a   :  { %2419 = vadd.xlane.f32.xlu0 %v2418_v30  ;;  %v2222_v49 = vsel %vm450_vm13, %v4587_v14, 0.0  ;;  %v4592_v61 = vpop.eup %3316 }
 0xc4b   :  { %3318 = vpow2.f32 %v2410_v56  ;;  %v2225_v59 = vsel %vm450_vm13, %v4592_v61, 0.0 }
 0xc4d   :  { %3165 = vrot.lane.b32.xlu1 %v4355_v58, %s3441_s12 }
 0xc5e   :  { %3170 = vrot.lane.b32.xlu0 %v4355_v58, %s3442_s13  ;;  %v4596_v58 = vpop.eup %3318 }
 0xc5f   :  { %v2421_v24 = vsel %vm450_vm13, %v4596_v58, 0.0 }
 0xc67   :  { %2223 = vadd.xlane.f32.xlu2 %v2222_v49 }
 0xc6f   :  { %2226 = vadd.xlane.f32.xlu2 %v2225_v59 }
 0xc77   :  { %2422 = vadd.xlane.f32.xlu1 %v2421_v24 }
 0xc7d   :  { %v2018_v43 = vpop.xlane.xlu2 %2017 }
 0xc7e   :  { %3320 = vrcp.f32 %v2018_v43 }
 0xc84   :  { %v3321_v13 = vpop.eup %3320 }
 0xc85   :  { %v2032_v31 = vmul.f32 %v3321_v13, %v4526_v22 }
 0xc87   :  { %v2021_v26 = vpop.xlane.xlu0 %2020  ;;  %3060 = vmatmul.msk.f32.vlgmr.msra.gmra.mxu3 %vm450_vm13, %v2032_v31 }
 0xc88   :  { %3322 = vrcp.f32 %v2021_v26 }
 0xc8e   :  { %v3323_v32 = vpop.eup %3322 }
 0xc8f   :  { %v2218_v17 = vpop.xlane.xlu1 %2217  ;;  %v2033_v5 = vmul.f32 %v3323_v32, %v4531_v52 }
 0xc90   :  { %3324 = vrcp.f32 %v2218_v17 }
 0xc91   :  { %3061 = vmatmul.msk.f32.gmra.mxu3 %vm450_vm13, %v2033_v5 }
 0xc96   :  { %v3325_v53 = vpop.eup %3324 }
 0xc97   :  { %v2232_v50 = vmul.f32 %v3325_v53, %v4535_v42 }
 0xc99   :  { %3072 = vmatmul.msk.f32.vlgmr.msrb.gmra.mxu3 %vm450_vm13, %v2232_v50  ;;  %v2221_v45 = vpop.xlane.xlu2 %2220 }
 0xc9a   :  { %3326 = vrcp.f32 %v2221_v45 }
 0xc9d   :  { %v2024_v10 = vpop.xlane.xlu0 %2023 }
 0xc9e   :  { %3328 = vrcp.f32 %v2024_v10  ;;  %v1875_v50 = vpop.f32.mrf.mxu3 }
 0xca0   :  { %v3327_v22 = vpop.eup %3326 }
 0xca1   :  { %v3161_v41 = vpop.permute.xlu2 %3160  ;;  %v2233_v33 = vmul.f32 %v3327_v22, %v4545_v60  ;;  %v3398_v60 = vld [vmem:[%s4813_s6 + $0x70] sm:$0xff] }
 0xca2   :  { %v3162_v44 = vunpack.i.l.bf16 %v3161_v41  ;;  %v3163_v57 = vunpack.i.h.bf16 %v3161_v41 }
 0xca3   :  { %3073 = vmatmul.msk.f32.gmra.mxu3 %vm450_vm13, %v2233_v33 }
 0xca4   :  { %v3329_v52 = vpop.eup %3328  ;;  %2458 = vmatpush.msra.mxu3 %v3162_v44 }
 0xca5   :  { %v2034_v1 = vmul.f32 %v3329_v52, %v4550_v27  ;;  %v2027_v29 = vpop.xlane.xlu0 %2026  ;;  %v3399_v27 = vld [vmem:[%s4813_s6 + $0x68] sm:$0xff] }
 0xca6   :  { %3330 = vrcp.f32 %v2027_v29  ;;  %2459 = vmatpush.msra.mxu3 %v3163_v57 }
 0xca7   :  { %3062 = vmatmul.msk.f32.vlgmr.msrb.gmra.mxu0 %vm450_vm13, %v2034_v1  ;;  %v2414_v42 = vpop.xlane.xlu1 %2413 }
 0xca8   :  { %2780 = vmatpush.msrb.mxu3 %v3397_v28  ;;  %3332 = vrcp.f32 %v2414_v42 }
 0xcaa   :  { %2781 = vmatpush.msrb.mxu3 %v3398_v60 }
 0xcac   :  { %2782 = vmatpush.msrb.mxu3 %v3399_v27  ;;  %v3331_v38 = vpop.eup %3330 }
 0xcad   :  { %v2035_v35 = vmul.f32 %v3331_v38, %v4557_v62  ;;  %v3402_v62 = vld [vmem:[%s4813_s6 + $0x50] sm:$0xff] }
 0xcae   :  { %2783 = vmatpush.msrb.mxu3 %v3400_v12  ;;  %v3333_v47 = vpop.eup %3332 }
 0xcaf   :  { %v2428_v51 = vmul.f32 %v3333_v47, %v4562_v23  ;;  %3063 = vmatmul.msk.f32.gmra.mxu0 %vm450_vm13, %v2035_v35  ;;  %v2417_v46 = vpop.xlane.xlu0 %2416  ;;  %v3403_v23 = vld [vmem:[%s4813_s6 + $0x48] sm:$0xff]  ;;  %v1878_v45 = vpop.f32.mrf.mxu3 }
 0xcb0   :  { %2784 = vmatpush.msrb.mxu3 %v3401_v18  ;;  %3334 = vrcp.f32 %v2417_v46 }
 0xcb1   :  { %3084 = vmatmul.msk.f32.vlgmr.msra.gmra.mxu3 %vm450_vm13, %v2428_v51 }
 0xcb2   :  { %2785 = vmatpush.msrb.mxu3 %v3402_v62 }
 0xcb4   :  { %2786 = vmatpush.msrb.mxu3 %v3403_v23 }
 0xcb6   :  { %v3335_v54 = vpop.eup %3334  ;;  %2787 = vmatpush.msrb.mxu3 %v3404_v34 }
 0xcb7   :  { %v2429_v63 = vmul.f32 %v3335_v54, %v4568_v48  ;;  %v3408_v48 = vld [vmem:[%s4813_s6 + $0x20] sm:$0xff]  ;;  %s3446_s6 = smov [#allocation2]  }
 0xcb8   :  { %2788 = vmatpush.msrb.mxu3 %v3405_v8 }
 0xcb9   :  { %3085 = vmatmul.msk.f32.gmra.mxu3 %vm450_vm13, %v2429_v63 }
 0xcba   :  { %2789 = vmatpush.msrb.mxu3 %v3406_v40 }
 0xcbc   :  { %2790 = vmatpush.msrb.mxu3 %v3407_v37 }
 0xcbd   :  { %v2420_v55 = vpop.xlane.xlu0 %2419 }
 0xcbe   :  { %2791 = vmatpush.msrb.mxu3 %v3408_v48 }
 0xcbf   :  { %v3166_v30 = vpop.permute.xlu1 %3165 }
 0xcc0   :  { %v3167_v21 = vunpack.i.l.bf16 %v3166_v30  ;;  %2792 = vmatpush.msrb.mxu3 %v3409_v7  ;;  %v3168_v0 = vunpack.i.h.bf16 %v3166_v30 }
 0xcc2   :  { %2297 = vmatpush.msra.mxu0 %v3167_v21  ;;  %2793 = vmatpush.msrb.mxu3 %v3410_v2 }
 0xcc4   :  { %2298 = vmatpush.msra.mxu0 %v3168_v0  ;;  %2794 = vmatpush.msrb.mxu3 %v3411_v36 }
 0xcc6   :  { %2795 = vmatpush.msrb.mxu3 %v3412_v4 }
 0xcd0   :  { %v3171_v9 = vpop.permute.xlu0 %3170 }
 0xcd1   :  { %v3172_v49 = vunpack.i.l.bf16 %v3171_v9  ;;  %v3173_v56 = vunpack.i.h.bf16 %v3171_v9 }
 0xcd3   :  { %2493 = vmatpush.msrb.mxu0 %v3172_v49 }
 0xcd5   :  { %2494 = vmatpush.msrb.mxu0 %v3173_v56 }
 0xcda   :  { %v2224_v59 = vpop.xlane.xlu2 %2223 }
 0xcdb   :  { %3336 = vrcp.f32 %v2224_v59 }
 0xce1   :  { %v3337_v24 = vpop.eup %3336 }
 0xce2   :  { %v2234_v43 = vmul.f32 %v3337_v24, %v4587_v14  ;;  %v2227_v13 = vpop.xlane.xlu2 %2226 }
 0xce3   :  { %3338 = vrcp.f32 %v2227_v13 }
 0xce4   :  { %3074 = vmatmul.msk.f32.vlgmr.msra.gmra.mxu0 %vm450_vm13, %v2234_v43  ;;  %3340 = vrcp.f32 %v2420_v55 }
 0xce9   :  { %v3339_v31 = vpop.eup %3338 }
 0xcea   :  { %v2235_v26 = vmul.f32 %v3339_v31, %v4592_v61  ;;  %v2423_v32 = vpop.xlane.xlu1 %2422  ;;  %v3341_v17 = vpop.eup %3340 }
 0xceb   :  { %3342 = vrcp.f32 %v2423_v32  ;;  %v2430_v5 = vmul.f32 %v3341_v17, %v4577_v39  ;;  %v1904_v61 = vpop.f32.mrf.mxu0 }
 0xcec   :  { %3075 = vmatmul.msk.f32.gmra.mxu0 %vm450_vm13, %v2235_v26 }
 0xcf1   :  { %v3343_v53 = vpop.eup %3342 }
 0xcf2   :  { %v2431_v14 = vmul.f32 %v3343_v53, %v4596_v58 }
 0xcf3   :  { %v1907_v33 = vpop.f32.mrf.mxu0 }
 0xcf4   :  { %3086 = vmatmul.msk.f32.vlgmr.msrb.gmra.mxu0 %vm450_vm13, %v2430_v5 }
 0xcfc   :  { %3087 = vmatmul.msk.f32.gmra.mxu0 %vm450_vm13, %v2431_v14 }
 0xd0a   :  { %v2067_v10 = vpop.f32.mrf.mxu3 }
 0xd0b   :  { %2506 = vrot.lane.b32.xlu0 %v2067_v10, %s3443_s21 }
 0xd14   :  { %v2070_v22 = vpop.f32.mrf.mxu3 }
 0xd15   :  { %2508 = vrot.lane.b32.xlu0 %v2070_v22, %s3443_s21 }
 0xd1c   :  { %v2265_v41 = vpop.f32.mrf.mxu3 }
 0xd1d   :  { %2522 = vrot.lane.b32.xlu0 %v2265_v41, %s3444_s22 }
 0xd24   :  { %v2104_v39 = vpop.f32.mrf.mxu0 }
 0xd25   :  { %2510 = vrot.lane.b32.xlu1 %v2104_v39, %s3443_s21 }
 0xd26   :  { %v2268_v44 = vpop.f32.mrf.mxu3 }
 0xd27   :  { %2524 = vrot.lane.b32.xlu0 %v2268_v44, %s3444_s22 }
 0xd2c   :  { %v2107_v57 = vpop.f32.mrf.mxu0 }
 0xd34   :  { %v2461_v58 = vpop.f32.mrf.mxu3 }
 0xd35   :  { %2538 = vrot.lane.b32.xlu2 %v2461_v58, %s3445_s23 }
 0xd3c   :  { %v2464_v52 = vpop.f32.mrf.mxu3 }
 0xd3d   :  { %2540 = vrot.lane.b32.xlu0 %v2464_v52, %s3445_s23 }
 0xd61   :  { %v2300_v1 = vpop.f32.mrf.mxu0 }
 0xd62   :  { %2526 = vrot.lane.b32.xlu2 %v2300_v1, %s3444_s22 }
 0xd69   :  { %v2303_v29 = vpop.f32.mrf.mxu0 }
 0xd6a   :  { %2512 = vrot.lane.b32.xlu2 %v2107_v57, %s3443_s21  ;;  %s2917_s21 = sshll.u32 %s3446_s6, 4  ;;  %s2918_s21 = int_to_ptr.vmem [resolvable:$true] %s2917_s21 }
 0xd71   :  { %v2496_v42 = vpop.f32.mrf.mxu0 }
 0xd72   :  { %2542 = vrot.lane.b32.xlu0 %v2496_v42, %s3445_s23 }
 0xd79   :  { %v2499_v28 = vpop.f32.mrf.mxu0 }
 0xd7a   :  { %2544 = vrot.lane.b32.xlu2 %v2499_v28, %s3445_s23  ;;  %2528 = vrot.lane.b32.xlu0 %v2303_v29, %s3444_s22 }
 0xd7d   :  { %v2507_v60 = vpop.permute.xlu0 %2506 }
 0xd7e   :  { %v2550_v38 = vsel %vm450_vm13, %v1875_v50, %v2507_v60 }
 0xd87   :  { %v2509_v27 = vpop.permute.xlu0 %2508 }
 0xd88   :  { %v2551_v18 = vsel %vm450_vm13, %v1878_v45, %v2509_v27 }
 0xd8f   :  { %v2523_v35 = vpop.permute.xlu0 %2522  ;;  %v2539_v47 = vpop.permute.xlu2 %2538 }
 0xd90   :  { %v2554_v12 = vsel %vm1271_vm14, %v2550_v38, %v2523_v35 }
 0xd91   :  { %v2558_v51 = vsel %vm1276_vm15, %v2554_v12, %v2539_v47 }
 0xd92   :  { %3088 = vmatmul.msk.f32.vlgmr.msra.gmra.mxu1 %vm81_vm2, %v2558_v51 }
 0xd97   :  { %v2511_v63 = vpop.permute.xlu1 %2510 }
 0xd98   :  { %v2552_v8 = vsel %vm450_vm13, %v1904_v61, %v2511_v63 }
 0xd99   :  { %v2525_v46 = vpop.permute.xlu0 %2524 }
 0xd9a   :  { %v2555_v62 = vsel %vm1271_vm14, %v2551_v18, %v2525_v46 }
 0xdaf   :  { %v2541_v23 = vpop.permute.xlu0 %2540 }
 0xdb0   :  { %v2559_v54 = vsel %vm1276_vm15, %v2555_v62, %v2541_v23 }
 0xdb1   :  { %3089 = vmatmul.msk.f32.gmra.mxu1 %vm81_vm2, %v2559_v54 }
 0xdbc   :  { %v2527_v34 = vpop.permute.xlu2 %2526 }
 0xdbd   :  { %v2556_v40 = vsel %vm1271_vm14, %v2552_v8, %v2527_v34 }
 0xdc4   :  { %v2513_v48 = vpop.permute.xlu2 %2512 }
 0xdc5   :  { %v2553_v21 = vsel %vm450_vm13, %v1907_v33, %v2513_v48 }
 0xdd4   :  { %v2545_v0 = vpop.permute.xlu2 %2544 }
 0xde4   :  { %v2543_v37 = vpop.permute.xlu0 %2542 }
 0xde5   :  { %v2560_v30 = vsel %vm1276_vm15, %v2556_v40, %v2543_v37 }
 0xde6   :  { %3090 = vmatmul.msk.f32.gmra.mxu1 %vm81_vm2, %v2560_v30 }
 0xdec   :  { %v2529_v7 = vpop.permute.xlu0 %2528 }
 0xded   :  { %v2557_v2 = vsel %vm1271_vm14, %v2553_v21, %v2529_v7 }
 0xdee   :  { %v2561_v36 = vsel %vm1276_vm15, %v2557_v2, %v2545_v0 }
 0xdef   :  { %3091 = vmatmul.msk.f32.gmra.mxu1 %vm81_vm2, %v2561_v36 }
 0xe0f   :  { %v2591_v4 = vpop.f32.mrf.mxu1 }
 0xe10   :  { %v2592_v55 = vadd.f32 %v2591_v4, %v4061_v19 }
 0xe12   :  { %v2603_v9 = vadd.f32 %v2592_v55, %v2558_v51 }
 0xe14   :  { %v2607_v49 = vsel %vm81_vm2, %v2603_v9, 0.0 }
 0xe15   :  { %2608 = vadd.xlane.f32.xlu0 %v2607_v49 }
 0xe2e   :  { %v2594_v56 = vpop.f32.mrf.mxu1 }
 0xe2f   :  { %v2595_v59 = vadd.f32 %v2594_v56, %v4061_v19 }
 0xe31   :  { %v2604_v24 = vadd.f32 %v2595_v59, %v2559_v54 }
 0xe33   :  { %v2610_v43 = vsel %vm81_vm2, %v2604_v24, 0.0 }
 0xe34   :  { %2611 = vadd.xlane.f32.xlu1 %v2610_v43 }
 0xe63   :  { %v2597_v13 = vpop.f32.mrf.mxu1 }
 0xe64   :  { %v2598_v31 = vadd.f32 %v2597_v13, %v4061_v19 }
 0xe66   :  { %v2605_v26 = vadd.f32 %v2598_v31, %v2560_v30 }
 0xe68   :  { %v2613_v32 = vsel %vm81_vm2, %v2605_v26, 0.0 }
 0xe69   :  { %2614 = vadd.xlane.f32.xlu2 %v2613_v32 }
 0xe6c   :  { %v2600_v17 = vpop.f32.mrf.mxu1 }
 0xe6d   :  { %v2601_v5 = vadd.f32 %v2600_v17, %v4061_v19 }
 0xe6f   :  { %v2606_v53 = vadd.f32 %v2601_v5, %v2561_v36 }
 0xe71   :  { %v2616_v50 = vsel %vm81_vm2, %v2606_v53, 0.0 }
 0xe72   :  { %2617 = vadd.xlane.f32.xlu0 %v2616_v50 }
 0xe88   :  { %v2609_v14 = vpop.xlane.xlu0 %2608 }
 0xe89   :  { %v2619_v45 = vmul.f32 %v2609_v14, %v3514_v25 }
 0xe8b   :  { %v2623_v10 = vsub.f32 %v2603_v9, %v2619_v45 }
 0xe8d   :  { %v2627_v61 = vmul.f32 %v2623_v10, %v2623_v10  ;;  %v2647_v34 = vmul.f32 %v2623_v10, %v4170_v6 }
 0xe8f   :  { %v2631_v22 = vsel %vm81_vm2, %v2627_v61, 0.0 }
 0xe90   :  { %2632 = vadd.xlane.f32.xlu1 %v2631_v22 }
 0xea7   :  { %v2612_v41 = vpop.xlane.xlu1 %2611 }
 0xea8   :  { %v2620_v33 = vmul.f32 %v2612_v41, %v3514_v25 }
 0xeaa   :  { %v2624_v39 = vsub.f32 %v2604_v24, %v2620_v33 }
 0xeac   :  { %v2628_v44 = vmul.f32 %v2624_v39, %v2624_v39  ;;  %v2648_v55 = vmul.f32 %v2624_v39, %v4170_v6 }
 0xeae   :  { %v2634_v58 = vsel %vm81_vm2, %v2628_v44, 0.0 }
 0xeaf   :  { %2635 = vadd.xlane.f32.xlu2 %v2634_v58 }
 0xedc   :  { %v2615_v19 = vpop.xlane.xlu2 %2614 }
 0xedd   :  { %v2621_v52 = vmul.f32 %v2615_v19, %v3514_v25 }
 0xedf   :  { %v4713_v57 = vsub.f32 %v2605_v26, %v2621_v52 }
 0xee1   :  { %v2629_v1 = vmul.f32 %v4713_v57, %v4713_v57  ;;  %v2649_v10 = vmul.f32 %v4713_v57, %v4170_v6 }
 0xee3   :  { %v2637_v29 = vsel %vm81_vm2, %v2629_v1, 0.0 }
 0xee4   :  { %2638 = vadd.xlane.f32.xlu0 %v2637_v29 }
 0xee5   :  { %v2618_v42 = vpop.xlane.xlu0 %2617 }
 0xee6   :  { %v2622_v28 = vmul.f32 %v2618_v42, %v3514_v25 }
 0xee8   :  { %v4719_v60 = vsub.f32 %v2606_v53, %v2622_v28 }
 0xeea   :  { %v2630_v27 = vmul.f32 %v4719_v60, %v4719_v60  ;;  %v2650_v52 = vmul.f32 %v4719_v60, %v4170_v6 }
 0xeec   :  { %v2640_v38 = vsel %vm81_vm2, %v2630_v27, 0.0 }
 0xeed   :  { %2641 = vadd.xlane.f32.xlu1 %v2640_v38 }
 0xf03   :  { %v2633_v35 = vpop.xlane.xlu1 %2632 }
 0xf04   :  { %v2643_v12 = vmul.f32 %v2633_v35, %v3514_v25 }
 0xf06   :  { %v2651_v47 = vadd.f32 1e-12, %v2643_v12 }
 0xf08   :  { %3344 = vrsqrt.f32 %v2651_v47  ;;  %vm2661_vm14 = vweird.f32 %v2651_v47 }
 0xf0e   :  { %v3345_v51 = vpop.eup %3344 }
 0xf0f   :  { %v2656_v46 = vmul.f32 %v3345_v51, %v2651_v47  ;;  %vm2662_vm13 = vweird.f32 %v3345_v51 }
 0xf10   :  { %vm2663_vm15 = vmor %vm2661_vm14, %vm2662_vm13 }
 0xf11   :  { %v2657_v18 = vmul.f32 %v3345_v51, %v2656_v46 }
 0xf13   :  { %v2658_v62 = vmul.f32 0.5, %v2657_v18 }
 0xf15   :  { %v2659_v23 = vsub.f32 1.5, %v2658_v62 }
 0xf17   :  { %v2660_v54 = vmul.f32 %v3345_v51, %v2659_v23 }
 0xf19   :  { %v2664_v63 = vsel %vm2663_vm15, %v3345_v51, %v2660_v54 }
 0xf1a   :  { %v2695_v8 = vmul.f32 %v2664_v63, %v2647_v34 }
 0xf1c   :  { %v4727_v40 = vadd.f32 %v2695_v8, %v4180_v11 }
 0xf1e   :  { %3092 = vmatmul.msk.f32.vlgmr.msra.gmra.mxu2 %vm81_vm2, %v4727_v40 }
 0xf22   :  { %v2636_v37 = vpop.xlane.xlu2 %2635 }
 0xf23   :  { %v2644_v48 = vmul.f32 %v2636_v37, %v3514_v25 }
 0xf25   :  { %v2652_v30 = vadd.f32 1e-12, %v2644_v48 }
 0xf27   :  { %3346 = vrsqrt.f32 %v2652_v30  ;;  %vm2671_vm1 = vweird.f32 %v2652_v30 }
 0xf2d   :  { %v3347_v21 = vpop.eup %3346 }
 0xf2e   :  { %v2666_v7 = vmul.f32 %v3347_v21, %v2652_v30  ;;  %vm2672_vm0 = vweird.f32 %v3347_v21 }
 0xf2f   :  { %vm2673_vm3 = vmor %vm2671_vm1, %vm2672_vm0 }
 0xf30   :  { %v2667_v0 = vmul.f32 %v3347_v21, %v2666_v7 }
 0xf32   :  { %v2668_v2 = vmul.f32 0.5, %v2667_v0 }
 0xf34   :  { %v2669_v36 = vsub.f32 1.5, %v2668_v2 }
 0xf36   :  { %v2670_v4 = vmul.f32 %v3347_v21, %v2669_v36 }
 0xf38   :  { %v2674_v9 = vsel %vm2673_vm3, %v3347_v21, %v2670_v4 }
 0xf39   :  { %v2696_v49 = vmul.f32 %v2674_v9, %v2648_v55 }
 0xf3b   :  { %v4734_v56 = vadd.f32 %v2696_v49, %v4180_v11 }
 0xf3d   :  { %3093 = vmatmul.msk.f32.gmra.mxu2 %vm81_vm2, %v4734_v56 }
 0xf57   :  { %v2639_v59 = vpop.xlane.xlu0 %2638 }
 0xf58   :  { %v2645_v24 = vmul.f32 %v2639_v59, %v3514_v25 }
 0xf5a   :  { %v2653_v43 = vadd.f32 1e-12, %v2645_v24 }
 0xf5c   :  { %3348 = vrsqrt.f32 %v2653_v43  ;;  %vm2681_vm5 = vweird.f32 %v2653_v43 }
 0xf60   :  { %v2642_v13 = vpop.xlane.xlu1 %2641 }
 0xf61   :  { %v2646_v31 = vmul.f32 %v2642_v13, %v3514_v25 }
 0xf62   :  { %v3349_v26 = vpop.eup %3348 }
 0xf63   :  { %v2676_v32 = vmul.f32 %v3349_v26, %v2653_v43  ;;  %v2654_v17 = vadd.f32 1e-12, %v2646_v31  ;;  %vm2682_vm4 = vweird.f32 %v3349_v26 }
 0xf64   :  { %vm2683_vm6 = vmor %vm2681_vm5, %vm2682_vm4 }
 0xf65   :  { %v2677_v5 = vmul.f32 %v3349_v26, %v2676_v32  ;;  %3350 = vrsqrt.f32 %v2654_v17  ;;  %vm2691_vm8 = vweird.f32 %v2654_v17 }
 0xf67   :  { %v2678_v53 = vmul.f32 0.5, %v2677_v5 }
 0xf69   :  { %v2679_v50 = vsub.f32 1.5, %v2678_v53 }
 0xf6b   :  { %v3351_v14 = vpop.eup %3350  ;;  %v2680_v45 = vmul.f32 %v3349_v26, %v2679_v50 }
 0xf6c   :  { %v2686_v61 = vmul.f32 %v3351_v14, %v2654_v17  ;;  %vm2692_vm7 = vweird.f32 %v3351_v14 }
 0xf6d   :  { %v2684_v22 = vsel %vm2683_vm6, %v3349_v26, %v2680_v45  ;;  %vm2693_vm9 = vmor %vm2691_vm8, %vm2692_vm7 }
 0xf6e   :  { %v2687_v41 = vmul.f32 %v3351_v14, %v2686_v61  ;;  %v2697_v33 = vmul.f32 %v2684_v22, %v2649_v10 }
 0xf70   :  { %v2688_v39 = vmul.f32 0.5, %v2687_v41  ;;  %v4743_v44 = vadd.f32 %v2697_v33, %v4180_v11 }
 0xf72   :  { %v2689_v58 = vsub.f32 1.5, %v2688_v39  ;;  %3094 = vmatmul.msk.f32.gmra.mxu2 %vm81_vm2, %v4743_v44 }
 0xf74   :  { %v2690_v19 = vmul.f32 %v3351_v14, %v2689_v58 }
 0xf76   :  { %v2694_v57 = vsel %vm2693_vm9, %v3351_v14, %v2690_v19 }
 0xf77   :  { %v2698_v1 = vmul.f32 %v2694_v57, %v2650_v52 }
 0xf79   :  { %v4750_v29 = vadd.f32 %v2698_v1, %v4180_v11 }
 0xf7b   :  { %3095 = vmatmul.msk.f32.gmra.mxu2 %vm81_vm2, %v4750_v29 }
 0xfa1   :  { %v2732_v42 = vpop.f32.mrf.mxu2 }
 0xfa2   :  { %v2733_v28 = vadd.f32 %v2732_v42, %v4259_v15 }
 0xfa4   :  { %v2748_v27 = vmul.f32 0.044715, %v2733_v28  ;;  %v2744_v6 = vmul.f32 0.5, %v2733_v28 }
 0xfa6   :  { %v2752_v38 = vmul.f32 %v2748_v27, %v2733_v28 }
 0xfa8   :  { %v2756_v35 = vmul.f32 %v2752_v38, %v2733_v28 }
 0xfaa   :  { %v2760_v12 = vadd.f32 %v2756_v35, %v2733_v28 }
 0xfac   :  { %v2764_v47 = vmul.f32 0.7978846, %v2760_v12 }
 0xfae   :  { %3352 = vtanh.f32 %v2764_v47 }
 0xfb4   :  { %v3353_v51 = vpop.eup %3352 }
 0xfb5   :  { %v2772_v60 = vadd.f32 1.0, %v3353_v51 }
 0xfb7   :  { %v2776_v46 = vmul.f32 %v2772_v60, %v2744_v6 }
 0xfb9   :  { %2796 = vmatmul.f32.vlgmr.msrb.gmra.mxu3 %v2776_v46 }
 0xfc0   :  { %v2735_v18 = vpop.f32.mrf.mxu2 }
 0xfc1   :  { %v2736_v11 = vadd.f32 %v2735_v18, %v4259_v15 }
 0xfc3   :  { %v2749_v62 = vmul.f32 0.044715, %v2736_v11  ;;  %v2745_v37 = vmul.f32 0.5, %v2736_v11 }
 0xfc5   :  { %v2753_v23 = vmul.f32 %v2749_v62, %v2736_v11 }
 0xfc7   :  { %v2757_v54 = vmul.f32 %v2753_v23, %v2736_v11 }
 0xfc9   :  { %v2761_v34 = vadd.f32 %v2757_v54, %v2736_v11 }
 0xfcb   :  { %v2765_v63 = vmul.f32 0.7978846, %v2761_v34 }
 0xfcd   :  { %3354 = vtanh.f32 %v2765_v63 }
 0xfd3   :  { %v3355_v8 = vpop.eup %3354 }
 0xfd4   :  { %v2773_v48 = vadd.f32 1.0, %v3355_v8 }
 0xfd6   :  { %v2777_v30 = vmul.f32 %v2773_v48, %v2745_v37 }
 0xfd8   :  { %2799 = vmatmul.f32.gmra.mxu3 %v2777_v30 }
 0xff5   :  { %v2738_v21 = vpop.f32.mrf.mxu2 }
 0xff6   :  { %v2739_v7 = vadd.f32 %v2738_v21, %v4259_v15 }
 0xff8   :  { %v2750_v0 = vmul.f32 0.044715, %v2739_v7  ;;  %v2746_v26 = vmul.f32 0.5, %v2739_v7 }
 0xffa   :  { %v2754_v2 = vmul.f32 %v2750_v0, %v2739_v7 }
 0xffc   :  { %v2758_v36 = vmul.f32 %v2754_v2, %v2739_v7 }
 0xffe   :  { %v2741_v4 = vpop.f32.mrf.mxu2  ;;  %v2762_v55 = vadd.f32 %v2758_v36, %v2739_v7 }
 0xfff   :  { %v2742_v9 = vadd.f32 %v2741_v4, %v4259_v15 }
0x1000   :  { %v2766_v49 = vmul.f32 0.7978846, %v2762_v55 }
0x1001   :  { %v2751_v59 = vmul.f32 0.044715, %v2742_v9  ;;  %v2747_v50 = vmul.f32 0.5, %v2742_v9 }
0x1002   :  { %3356 = vtanh.f32 %v2766_v49 }
0x1003   :  { %v2755_v24 = vmul.f32 %v2751_v59, %v2742_v9 }
0x1005   :  { %v2759_v43 = vmul.f32 %v2755_v24, %v2742_v9 }
0x1007   :  { %v2763_v13 = vadd.f32 %v2759_v43, %v2742_v9 }
0x1008   :  { %v3357_v31 = vpop.eup %3356 }
0x1009   :  { %v2774_v32 = vadd.f32 1.0, %v3357_v31  ;;  %v2767_v17 = vmul.f32 0.7978846, %v2763_v13 }
0x100b   :  { %v2778_v5 = vmul.f32 %v2774_v32, %v2746_v26  ;;  %3358 = vtanh.f32 %v2767_v17 }
0x100d   :  { %2802 = vmatmul.f32.gmra.mxu3 %v2778_v5 }
0x1011   :  { %v3359_v53 = vpop.eup %3358 }
0x1012   :  { %v2775_v14 = vadd.f32 1.0, %v3359_v53 }
0x1014   :  { %v2779_v45 = vmul.f32 %v2775_v14, %v2747_v50 }
0x1016   :  { %2805 = vmatmul.f32.gmra.mxu3 %v2779_v45 }
0x103c   :  { %v2797_v10 = vpop.f32.mrf.mxu3 }
0x103d   :  { %v2798_v15 = vadd.f32 %v2797_v10, %v4266_v20 }
0x103f   :  { %v2809_v61 = vadd.f32 %v2798_v15, %v4727_v40 }
0x1041   :  { %v2813_v22 = vsel %vm81_vm2, %v2809_v61, 0.0 }
0x1042   :  { %2814 = vadd.xlane.f32.xlu2 %v2813_v22 }
0x105b   :  { %v2800_v41 = vpop.f32.mrf.mxu3 }
0x105c   :  { %v2801_v33 = vadd.f32 %v2800_v41, %v4266_v20 }
0x105e   :  { %v2810_v39 = vadd.f32 %v2801_v33, %v4734_v56 }
0x1060   :  { %v2816_v58 = vsel %vm81_vm2, %v2810_v39, 0.0 }
0x1061   :  { %2817 = vadd.xlane.f32.xlu0 %v2816_v58 }
0x1090   :  { %v2803_v19 = vpop.f32.mrf.mxu3 }
0x1091   :  { %v2804_v52 = vadd.f32 %v2803_v19, %v4266_v20 }
0x1093   :  { %v2811_v57 = vadd.f32 %v2804_v52, %v4743_v44 }
0x1095   :  { %v2819_v1 = vsel %vm81_vm2, %v2811_v57, 0.0 }
0x1096   :  { %2820 = vadd.xlane.f32.xlu1 %v2819_v1 }
0x1099   :  { %v2806_v40 = vpop.f32.mrf.mxu3 }
0x109a   :  { %v2807_v42 = vadd.f32 %v2806_v40, %v4266_v20 }
0x109c   :  { %v2812_v28 = vadd.f32 %v2807_v42, %v4750_v29 }
0x109e   :  { %v2822_v27 = vsel %vm81_vm2, %v2812_v28, 0.0 }
0x109f   :  { %2823 = vadd.xlane.f32.xlu2 %v2822_v27 }
0x10b5   :  { %v2815_v56 = vpop.xlane.xlu2 %2814 }
0x10b6   :  { %v2825_v38 = vmul.f32 %v2815_v56, %v3514_v25 }
0x10b8   :  { %v2829_v35 = vsub.f32 %v2809_v61, %v2825_v38 }
0x10ba   :  { %v2833_v12 = vmul.f32 %v2829_v35, %v2829_v35  ;;  %v2853_v55 = vmul.f32 %v2829_v35, %v4299_v16 }
0x10bc   :  { %v2837_v47 = vsel %vm81_vm2, %v2833_v12, 0.0 }
0x10bd   :  { %2838 = vadd.xlane.f32.xlu0 %v2837_v47 }
0x10d4   :  { %v2818_v44 = vpop.xlane.xlu0 %2817 }
0x10d5   :  { %v2826_v51 = vmul.f32 %v2818_v44, %v3514_v25 }
0x10d7   :  { %v2830_v6 = vsub.f32 %v2810_v39, %v2826_v51 }
0x10d9   :  { %v2834_v60 = vmul.f32 %v2830_v6, %v2830_v6  ;;  %v2854_v50 = vmul.f32 %v2830_v6, %v4299_v16 }
0x10db   :  { %v2840_v20 = vsel %vm81_vm2, %v2834_v60, 0.0 }
0x10dc   :  { %2841 = vadd.xlane.f32.xlu1 %v2840_v20 }
0x1109   :  { %v2821_v29 = vpop.xlane.xlu1 %2820 }
0x110a   :  { %v2827_v46 = vmul.f32 %v2821_v29, %v3514_v25 }
0x110c   :  { %v4775_v18 = vsub.f32 %v2811_v57, %v2827_v46 }
0x110e   :  { %v2835_v11 = vmul.f32 %v4775_v18, %v4775_v18 }
0x1110   :  { %v2843_v62 = vsel %vm81_vm2, %v2835_v11, 0.0 }
0x1111   :  { %2844 = vadd.xlane.f32.xlu2 %v2843_v62 }
0x1112   :  { %v2824_v23 = vpop.xlane.xlu2 %2823 }
0x1113   :  { %v2828_v54 = vmul.f32 %v2824_v23, %v3514_v25 }
0x1115   :  { %v4781_v34 = vsub.f32 %v2812_v28, %v2828_v54  ;;  %v2855_v28 = vmul.f32 %v4775_v18, %v4299_v16 }
0x1117   :  { %v2836_v63 = vmul.f32 %v4781_v34, %v4781_v34  ;;  %v2856_v51 = vmul.f32 %v4781_v34, %v4299_v16 }
0x1119   :  { %v2846_v8 = vsel %vm81_vm2, %v2836_v63, 0.0 }
0x111a   :  { %2847 = vadd.xlane.f32.xlu0 %v2846_v8 }
0x1130   :  { %v2839_v37 = vpop.xlane.xlu0 %2838 }
0x1131   :  { %v2849_v48 = vmul.f32 %v2839_v37, %v3514_v25 }
0x1133   :  { %v2857_v30 = vadd.f32 1e-12, %v2849_v48 }
0x1135   :  { %3360 = vrsqrt.f32 %v2857_v30  ;;  %vm2867_vm11 = vweird.f32 %v2857_v30 }
0x113b   :  { %v3361_v21 = vpop.eup %3360 }
0x113c   :  { %v2862_v7 = vmul.f32 %v3361_v21, %v2857_v30  ;;  %vm2868_vm10 = vweird.f32 %v3361_v21 }
0x113d   :  { %vm2869_vm12 = vmor %vm2867_vm11, %vm2868_vm10 }
0x113e   :  { %v2863_v0 = vmul.f32 %v3361_v21, %v2862_v7 }
0x1140   :  { %v2864_v2 = vmul.f32 0.5, %v2863_v0 }
0x1142   :  { %v2865_v36 = vsub.f32 1.5, %v2864_v2 }
0x1144   :  { %v2866_v4 = vmul.f32 %v3361_v21, %v2865_v36 }
0x1146   :  { %v2870_v9 = vsel %vm2869_vm12, %v3361_v21, %v2866_v4 }
0x1147   :  { %v2901_v49 = vmul.f32 %v2870_v9, %v2853_v55 }
0x1149   :  { %v2905_v59 = vadd.f32 %v2901_v49, %v4303_v3 }
0x114b   :  { %2909 = vst.msk [vmem:[#allocation2] sm:$0xff] %vm81_vm2, %v2905_v59 }
0x114f   :  { %v2842_v24 = vpop.xlane.xlu1 %2841 }
0x1150   :  { %v2850_v43 = vmul.f32 %v2842_v24, %v3514_v25 }
0x1152   :  { %v2858_v13 = vadd.f32 1e-12, %v2850_v43 }
0x1154   :  { %3362 = vrsqrt.f32 %v2858_v13  ;;  %vm2877_vm14 = vweird.f32 %v2858_v13 }
0x115a   :  { %v3363_v31 = vpop.eup %3362 }
0x115b   :  { %v2872_v26 = vmul.f32 %v3363_v31, %v2858_v13  ;;  %vm2878_vm13 = vweird.f32 %v3363_v31 }
0x115c   :  { %vm2879_vm15 = vmor %vm2877_vm14, %vm2878_vm13 }
0x115d   :  { %v2873_v32 = vmul.f32 %v3363_v31, %v2872_v26 }
0x115f   :  { %v2874_v17 = vmul.f32 0.5, %v2873_v32 }
0x1161   :  { %v2875_v5 = vsub.f32 1.5, %v2874_v17 }
0x1163   :  { %v2876_v53 = vmul.f32 %v3363_v31, %v2875_v5 }
0x1165   :  { %v2880_v14 = vsel %vm2879_vm15, %v3363_v31, %v2876_v53 }
0x1166   :  { %v2902_v45 = vmul.f32 %v2880_v14, %v2854_v50 }
0x1168   :  { %v2906_v10 = vadd.f32 %v2902_v45, %v4303_v3 }
0x116a   :  { %2910 = vst.msk [vmem:[#allocation2 + $0x8] sm:$0xff] %vm81_vm2, %v2906_v10 }
0x1184   :  { %v2845_v15 = vpop.xlane.xlu2 %2844 }
0x1185   :  { %v2851_v61 = vmul.f32 %v2845_v15, %v3514_v25 }
0x1187   :  { %v2859_v22 = vadd.f32 1e-12, %v2851_v61 }
0x1189   :  { %3364 = vrsqrt.f32 %v2859_v22  ;;  %vm2887_vm1 = vweird.f32 %v2859_v22 }
0x118d   :  { %v2848_v41 = vpop.xlane.xlu0 %2847 }
0x118e   :  { %v2852_v33 = vmul.f32 %v2848_v41, %v3514_v25 }
0x118f   :  { %v3365_v39 = vpop.eup %3364 }
0x1190   :  { %v2882_v58 = vmul.f32 %v3365_v39, %v2859_v22  ;;  %v2860_v19 = vadd.f32 1e-12, %v2852_v33  ;;  %vm2888_vm0 = vweird.f32 %v3365_v39 }
0x1191   :  { %vm2889_vm3 = vmor %vm2887_vm1, %vm2888_vm0 }
0x1192   :  { %v2883_v52 = vmul.f32 %v3365_v39, %v2882_v58  ;;  %3366 = vrsqrt.f32 %v2860_v19  ;;  %vm2897_vm5 = vweird.f32 %v2860_v19 }
0x1194   :  { %v2884_v57 = vmul.f32 0.5, %v2883_v52 }
0x1196   :  { %v2885_v1 = vsub.f32 1.5, %v2884_v57 }
0x1198   :  { %v3367_v40 = vpop.eup %3366  ;;  %v2886_v42 = vmul.f32 %v3365_v39, %v2885_v1 }
0x1199   :  { %v2892_v27 = vmul.f32 %v3367_v40, %v2860_v19  ;;  %vm2898_vm4 = vweird.f32 %v3367_v40 }
0x119a   :  { %v2890_v56 = vsel %vm2889_vm3, %v3365_v39, %v2886_v42  ;;  %vm2899_vm6 = vmor %vm2897_vm5, %vm2898_vm4 }
0x119b   :  { %v2903_v38 = vmul.f32 %v2890_v56, %v2855_v28  ;;  %v2893_v35 = vmul.f32 %v3367_v40, %v2892_v27 }
0x119d   :  { %v2907_v25 = vadd.f32 %v2903_v38, %v4303_v3  ;;  %v2894_v12 = vmul.f32 0.5, %v2893_v35 }
0x119f   :  { %2911 = vst.msk [vmem:[#allocation2 + $0x10] sm:$0xff] %vm81_vm2, %v2907_v25  ;;  %v2895_v47 = vsub.f32 1.5, %v2894_v12 }
0x11a1   :  { %v2896_v44 = vmul.f32 %v3367_v40, %v2895_v47 }
0x11a3   :  { %v2900_v6 = vsel %vm2899_vm6, %v3367_v40, %v2896_v44 }
0x11a4   :  { %v2904_v60 = vmul.f32 %v2900_v6, %v2856_v51 }
0x11a6   :  { %v2908_v20 = vadd.f32 %v2904_v60, %v4303_v3 }
0x11a8   :  { %2912 = vst.msk [vmem:[#allocation2 + $0x18] sm:$0xff] %vm81_vm2, %v2908_v20 }
0x11a9   :  { %2925 = dma.vmem_to_hbm [thread:$0]  %s2918_s21, 512, %s2920_s14, [#allocation3], %s3447_s3, %s3447_s3, %s3448_s15  }
0x11aa   :  { %3437 = dma.done.wait [#allocation3], 512  }
0x11ab   :  { %3438 = vsyncadd [#allocation3], 4294966784 }
0x11ac   :  { %2930 = vsyncpa [#allocation3], 1 }

</bundles_post_ra>
